<compile_context>
chip_gen: v7x
topology: tpu7x:2x2x1
jax: 0.10.0
libtpu: 0.0.40
codegen_flags: <defaults>
</compile_context>

<pallas_src>
import functools

import jax
import jax.numpy as jnp
from jax.experimental import pallas as pl
from jax.experimental.pallas import tpu as pltpu

EPS = 1e-5           # nn.BatchNorm1d default eps
TN_PREF = 256        # output-feature tile (multiple of MXU width on v6e/v7x)
TK_PREF = 256        # contraction tile
VMEM_LIMIT_BYTES = 48 * 1024 * 1024   # fits v7x's 64 MiB VMEM with headroom


def _pick_tile(dim, pref):
    """Largest of (pref, 512, 256, 128) that divides `dim`, else the full dim."""
    for t in (pref, 512, 256, 128):
        if t <= dim and dim % t == 0:
            return t
    return dim


def _linear_bn_kernel(x_ref, w_ref, g_ref, b_ref, o_ref, acc_ref, *, batch, relu):
    """One grid step of: out = BN(x @ W) [+ ReLU], BN stats computed per view.

    x_ref : (2B, tk)  bf16   (both views stacked on the batch axis)
    w_ref : (tk, tn)  bf16
    g_ref : (1, tn)   f32    BN gamma (ones for the affine=False final BN)
    b_ref : (1, tn)   f32    BN beta  (zeros for the affine=False final BN)
    o_ref : (2B, tn)  out dtype
    acc_ref: (2B, tn) f32    VMEM accumulator, persists across the K grid axis
    """
    k = pl.program_id(1)

    @pl.when(k == 0)
    def _():
        acc_ref[...] = jnp.zeros_like(acc_ref)

    # bf16 x bf16 -> f32 accumulate on the MXU.
    acc_ref[...] += jnp.dot(x_ref[...], w_ref[...],
                            preferred_element_type=jnp.float32)

    @pl.when(k == pl.num_programs(1) - 1)
    def _():
        g = g_ref[...]
        b = b_ref[...]

        def bn_one_view(h):
            # Training-mode BatchNorm1d: batch mean, biased variance, folded affine.
            mu = jnp.mean(h, axis=0, keepdims=True)
            var = jnp.mean(jnp.square(h - mu), axis=0, keepdims=True)
            s = g * jax.lax.rsqrt(var + EPS)          # EUP
            out = h * s + (b - mu * s)                # single scale/shift
            if relu:
                out = jnp.maximum(out, 0.0)
            return out

        h = acc_ref[...]
        # Per-view statistics: rows [0:B] are view 1, rows [B:2B] are view 2.
        o_ref[pl.ds(0, batch), :] = bn_one_view(h[:batch]).astype(o_ref.dtype)
        o_ref[pl.ds(batch, batch), :] = bn_one_view(h[batch:]).astype(o_ref.dtype)


def _linear_bn(x, w, gamma, beta, *, batch, relu, out_dtype,
               tn_pref=TN_PREF, tk_pref=TK_PREF):
    """Tiled pallas_call for Linear(bias=False) -> BatchNorm1d -> [ReLU]."""
    two_b, kdim = x.shape
    ndim = w.shape[1]
    tn = _pick_tile(ndim, tn_pref)
    tk = _pick_tile(kdim, tk_pref)
    grid = (ndim // tn, kdim // tk)   # K innermost (reduction axis)

    kernel = functools.partial(_linear_bn_kernel, batch=batch, relu=relu)
    return pl.pallas_call(
        kernel,
        out_shape=jax.ShapeDtypeStruct((two_b, ndim), out_dtype),
        grid_spec=pltpu.PrefetchScalarGridSpec(
            num_scalar_prefetch=0,
            grid=grid,
            in_specs=[
                pl.BlockSpec((two_b, tk), lambda n, k: (0, k)),   # activations
                pl.BlockSpec((tk, tn), lambda n, k: (k, n)),      # weights
                pl.BlockSpec((1, tn), lambda n, k: (0, n)),       # gamma
                pl.BlockSpec((1, tn), lambda n, k: (0, n)),       # beta
            ],
            out_specs=pl.BlockSpec((two_b, tn), lambda n, k: (0, n)),
            scratch_shapes=[pltpu.VMEM((two_b, tn), jnp.float32)],
        ),
        compiler_params=pltpu.CompilerParams(
            dimension_semantics=("parallel", "arbitrary"),
            vmem_limit_bytes=VMEM_LIMIT_BYTES,
        ),
    )(x, w, gamma, beta)


def barlow_twins_forward(z1, z2, params):
    """BarlowTwins.forward: returns (bn(projector(z1)), bn(projector(z2)))."""
    w1, g1, b1, w2, g2, b2, w3 = params
    batch = z1.shape[0]
    f3 = w3.shape[1]

    # Fuse both views so each weight tile is DMA'd from HBM once per layer.
    x = jnp.concatenate([z1, z2], axis=0).astype(jnp.bfloat16)
    w1b = w1.astype(jnp.bfloat16)
    w2b = w2.astype(jnp.bfloat16)
    w3b = w3.astype(jnp.bfloat16)

    # Linear -> BN(affine) -> ReLU  (x2), intermediates kept in bf16.
    h = _linear_bn(x, w1b, g1, b1, batch=batch, relu=True, out_dtype=jnp.bfloat16)
    h = _linear_bn(h, w2b, g2, b2, batch=batch, relu=True, out_dtype=jnp.bfloat16)

    # Final Linear fused with self.bn = BatchNorm1d(num_feats, affine=False).
    one = jnp.ones((1, f3), jnp.float32)
    zero = jnp.zeros((1, f3), jnp.float32)
    out = _linear_bn(h, w3b, one, zero, batch=batch, relu=False,
                     out_dtype=jnp.float32)
    return out[:batch], out[batch:]


# ----------------------------- pure-JAX reference -----------------------------
def _bn_ref(h, gamma, beta):
    mu = jnp.mean(h, axis=0, keepdims=True)
    var = jnp.mean(jnp.square(h - mu), axis=0, keepdims=True)
    s = gamma * jax.lax.rsqrt(var + EPS)
    return h * s + (beta - mu * s)


def barlow_twins_forward_ref(z1, z2, params):
    """Mirrors the PyTorch forward (training-mode BN) with the same bf16 casts."""
    w1, g1, b1, w2, g2, b2, w3 = params

    def per_view(z):
        h = jnp.dot(z.astype(jnp.bfloat16), w1.astype(jnp.bfloat16),
                    preferred_element_type=jnp.float32)
        h = jnp.maximum(_bn_ref(h, g1, b1), 0.0).astype(jnp.bfloat16)
        h = jnp.dot(h, w2.astype(jnp.bfloat16), preferred_element_type=jnp.float32)
        h = jnp.maximum(_bn_ref(h, g2, b2), 0.0).astype(jnp.bfloat16)
        h = jnp.dot(h, w3.astype(jnp.bfloat16), preferred_element_type=jnp.float32)
        return _bn_ref(h, 1.0, 0.0)

    return per_view(z1), per_view(z2)


def init_params(key, sizes):
    """Deterministic init. Linear weights stored as (F_in, F_out) (pre-transposed)."""
    f0, f1, f2, f3 = sizes
    k1, k2, k3 = jax.random.split(key, 3)
    w1 = jax.random.normal(k1, (f0, f1), jnp.float32) * (1.0 / jnp.sqrt(f0))
    w2 = jax.random.normal(k2, (f1, f2), jnp.float32) * (1.0 / jnp.sqrt(f1))
    w3 = jax.random.normal(k3, (f2, f3), jnp.float32) * (1.0 / jnp.sqrt(f2))
    # BatchNorm1d affine params (PyTorch default init: gamma=1, beta=0).
    g1 = jnp.ones((1, f1), jnp.float32)
    b1 = jnp.zeros((1, f1), jnp.float32)
    g2 = jnp.ones((1, f2), jnp.float32)
    b2 = jnp.zeros((1, f2), jnp.float32)
    return (w1, g1, b1, w2, g2, b2, w3)


# TODO(synk): compute_final_loss / off_diagonal are loss helpers outside forward()
# and are not implemented here.

if __name__ == "__main__":
    # Module-default projector widths, small batch; lane-dense (multiples of 128).
    B = 64
    sizes = (512, 512, 512, 512)   # num_feats == sizes[-1]

    key = jax.random.PRNGKey(0)
    kz1, kz2, kp = jax.random.split(key, 3)
    z1 = jax.random.normal(kz1, (B, sizes[0]), jnp.float32)
    z2 = jax.random.normal(kz2, (B, sizes[0]), jnp.float32)
    params = init_params(kp, sizes)

    fwd = jax.jit(barlow_twins_forward)
    out1, out2 = fwd(z1, z2, params)
    jax.block_until_ready((out1, out2))

    ref1, ref2 = barlow_twins_forward_ref(z1, z2, params)
    assert out1.shape == (B, sizes[-1]) and out2.shape == (B, sizes[-1])
    err1 = float(jnp.max(jnp.abs(out1 - ref1)))
    err2 = float(jnp.max(jnp.abs(out2 - ref2)))
    assert jnp.allclose(out1, ref1, atol=1e-2, rtol=1e-2), err1
    assert jnp.allclose(out2, ref2, atol=1e-2, rtol=1e-2), err2

    print("KERNEL_OK")
</pallas_src>

<mosaic_0001>
module attributes {stable_mosaic.version = 11 : i64} {
  func.func @_linear_bn_kernel(%arg0: i32, %arg1: i32, %arg2: memref<128x256xbf16, #tpu.memory_space<vmem>>, %arg3: memref<256x256xbf16, #tpu.memory_space<vmem>>, %arg4: memref<1x256xf32, #tpu.memory_space<vmem>>, %arg5: memref<1x256xf32, #tpu.memory_space<vmem>>, %arg6: memref<128x256xbf16, #tpu.memory_space<vmem>>, %arg7: memref<128x256xf32, #tpu.memory_space<vmem>>) attributes {dimension_semantics = [#tpu.dimension_semantics<parallel>, #tpu.dimension_semantics<arbitrary>], iteration_bounds = array<i64: 2, 2>, scalar_prefetch = 0 : i64, scratch_operands = 1 : i64, tpu.core_type = #tpu.core_type<tc>, window_params = [{transform_indices = @transform_0, window_bounds = array<i64: 128, 256>}, {transform_indices = @transform_1, window_bounds = array<i64: 256, 256>}, {transform_indices = @transform_2, window_bounds = array<i64: 1, 256>}, {transform_indices = @transform_3, window_bounds = array<i64: 1, 256>}, {transform_indices = @transform_4, window_bounds = array<i64: 128, 256>}]} {
    %c0_i32 = arith.constant 0 : i32
    %0 = arith.cmpi eq, %arg1, %c0_i32 : i32
    %1 = arith.extui %0 : i1 to i32
    %c0_i32_0 = arith.constant 0 : i32
    %2 = arith.cmpi ne, %1, %c0_i32_0 : i32
    scf.if %2 {
      %cst_9 = arith.constant 0.000000e+00 : f32
      %12 = vector.broadcast %cst_9 : f32 to vector<128x256xf32>
      %c0_10 = arith.constant 0 : index
      %c0_11 = arith.constant 0 : index
      %13 = vector.load %arg7[%c0_10, %c0_11] : memref<128x256xf32, #tpu.memory_space<vmem>>, vector<128x256xf32>
      tpu.vector_store %arg7[%c0_10, %c0_11], %12 {strides = array<i32>} : memref<128x256xf32, #tpu.memory_space<vmem>>, vector<128x256xf32>,
    } else {
    }
    %c0 = arith.constant 0 : index
    %c0_1 = arith.constant 0 : index
    %3 = vector.load %arg7[%c0, %c0_1] : memref<128x256xf32, #tpu.memory_space<vmem>>, vector<128x256xf32>
    %c0_2 = arith.constant 0 : index
    %c0_3 = arith.constant 0 : index
    %4 = vector.load %arg2[%c0_2, %c0_3] : memref<128x256xbf16, #tpu.memory_space<vmem>>, vector<128x256xbf16>
    %c0_4 = arith.constant 0 : index
    %c0_5 = arith.constant 0 : index
    %5 = vector.load %arg3[%c0_4, %c0_5] : memref<256x256xbf16, #tpu.memory_space<vmem>>, vector<256x256xbf16>
    %cst = arith.constant dense<0.000000e+00> : vector<128x256xf32>
    %6 = tpu.matmul %4, %5, %cst {dimension_numbers = #tpu.dot_dimension_numbers<[1], [0], [0], [1], [0, 0, 1, 1], [], []>} : vector<128x256xbf16>, vector<256x256xbf16>, vector<128x256xf32> -> vector<128x256xf32>
    %7 = arith.addf %3, %6 : vector<128x256xf32>
    %c0_6 = arith.constant 0 : index
    %c0_7 = arith.constant 0 : index
    %8 = vector.load %arg7[%c0_6, %c0_7] : memref<128x256xf32, #tpu.memory_space<vmem>>, vector<128x256xf32>
    tpu.vector_store %arg7[%c0_6, %c0_7], %7 {strides = array<i32>} : memref<128x256xf32, #tpu.memory_space<vmem>>, vector<128x256xf32>,
    %c1_i32 = arith.constant 1 : i32
    %9 = arith.cmpi eq, %arg1, %c1_i32 : i32
    %10 = arith.extui %9 : i1 to i32
    %c0_i32_8 = arith.constant 0 : i32
    %11 = arith.cmpi ne, %10, %c0_i32_8 : i32
    scf.if %11 {
      %c0_9 = arith.constant 0 : index
      %c0_10 = arith.constant 0 : index
      %12 = vector.load %arg4[%c0_9, %c0_10] : memref<1x256xf32, #tpu.memory_space<vmem>>, vector<1x256xf32>
      %c0_11 = arith.constant 0 : index
      %c0_12 = arith.constant 0 : index
      %13 = vector.load %arg5[%c0_11, %c0_12] : memref<1x256xf32, #tpu.memory_space<vmem>>, vector<1x256xf32>
      %c0_13 = arith.constant 0 : index
      %c0_14 = arith.constant 0 : index
      %14 = vector.load %arg7[%c0_13, %c0_14] : memref<128x256xf32, #tpu.memory_space<vmem>>, vector<128x256xf32>
      %15 = vector.extract_strided_slice %14 {offsets = [0, 0], sizes = [64, 256], strides = [1, 1]} : vector<128x256xf32> to vector<64x256xf32>
      %cst_15 = arith.constant dense<0.000000e+00> : vector<256xf32>
      %16 = vector.multi_reduction <add>, %15, %cst_15 [0] : vector<64x256xf32> to vector<256xf32>
      %17 = vector.shape_cast %16 : vector<256xf32> to vector<1x256xf32>
      %cst_16 = arith.constant 6.400000e+01 : f32
      %18 = vector.broadcast %cst_16 : f32 to vector<1x256xf32>
      %19 = arith.divf %17, %18 : vector<1x256xf32>
      %20 = vector.broadcast %19 : vector<1x256xf32> to vector<64x256xf32>
      %21 = arith.subf %15, %20 : vector<64x256xf32>
      %22 = arith.mulf %21, %21 : vector<64x256xf32>
      %cst_17 = arith.constant dense<0.000000e+00> : vector<256xf32>
      %23 = vector.multi_reduction <add>, %22, %cst_17 [0] : vector<64x256xf32> to vector<256xf32>
      %24 = vector.shape_cast %23 : vector<256xf32> to vector<1x256xf32>
      %cst_18 = arith.constant 6.400000e+01 : f32
      %25 = vector.broadcast %cst_18 : f32 to vector<1x256xf32>
      %26 = arith.divf %24, %25 : vector<1x256xf32>
      %cst_19 = arith.constant 9.99999974E-6 : f32
      %27 = vector.broadcast %cst_19 : f32 to vector<1x256xf32>
      %28 = arith.addf %26, %27 : vector<1x256xf32>
      %29 = math.rsqrt %28 : vector<1x256xf32>
      %30 = arith.mulf %12, %29 : vector<1x256xf32>
      %31 = vector.broadcast %30 : vector<1x256xf32> to vector<64x256xf32>
      %32 = arith.mulf %15, %31 : vector<64x256xf32>
      %33 = arith.mulf %19, %30 : vector<1x256xf32>
      %34 = arith.subf %13, %33 : vector<1x256xf32>
      %35 = vector.broadcast %34 : vector<1x256xf32> to vector<64x256xf32>
      %36 = arith.addf %32, %35 : vector<64x256xf32>
      %cst_20 = arith.constant 0.000000e+00 : f32
      %37 = vector.broadcast %cst_20 : f32 to vector<64x256xf32>
      %38 = arith.maximumf %36, %37 : vector<64x256xf32>
      %39 = arith.truncf %38 : vector<64x256xf32> to vector<64x256xbf16>
      %c0_21 = arith.constant 0 : index
      %c0_22 = arith.constant 0 : index
      %40 = vector.load %arg6[%c0_21, %c0_22] : memref<128x256xbf16, #tpu.memory_space<vmem>>, vector<64x256xbf16>
      tpu.vector_store %arg6[%c0_21, %c0_22], %39 {strides = array<i32>} : memref<128x256xbf16, #tpu.memory_space<vmem>>, vector<64x256xbf16>,
      %41 = vector.extract_strided_slice %14 {offsets = [64, 0], sizes = [64, 256], strides = [1, 1]} : vector<128x256xf32> to vector<64x256xf32>
      %cst_23 = arith.constant dense<0.000000e+00> : vector<256xf32>
      %42 = vector.multi_reduction <add>, %41, %cst_23 [0] : vector<64x256xf32> to vector<256xf32>
      %43 = vector.shape_cast %42 : vector<256xf32> to vector<1x256xf32>
      %cst_24 = arith.constant 6.400000e+01 : f32
      %44 = vector.broadcast %cst_24 : f32 to vector<1x256xf32>
      %45 = arith.divf %43, %44 : vector<1x256xf32>
      %46 = vector.broadcast %45 : vector<1x256xf32> to vector<64x256xf32>
      %47 = arith.subf %41, %46 : vector<64x256xf32>
      %48 = arith.mulf %47, %47 : vector<64x256xf32>
      %cst_25 = arith.constant dense<0.000000e+00> : vector<256xf32>
      %49 = vector.multi_reduction <add>, %48, %cst_25 [0] : vector<64x256xf32> to vector<256xf32>
      %50 = vector.shape_cast %49 : vector<256xf32> to vector<1x256xf32>
      %cst_26 = arith.constant 6.400000e+01 : f32
      %51 = vector.broadcast %cst_26 : f32 to vector<1x256xf32>
      %52 = arith.divf %50, %51 : vector<1x256xf32>
      %cst_27 = arith.constant 9.99999974E-6 : f32
      %53 = vector.broadcast %cst_27 : f32 to vector<1x256xf32>
      %54 = arith.addf %52, %53 : vector<1x256xf32>
      %55 = math.rsqrt %54 : vector<1x256xf32>
      %56 = arith.mulf %12, %55 : vector<1x256xf32>
      %57 = vector.broadcast %56 : vector<1x256xf32> to vector<64x256xf32>
      %58 = arith.mulf %41, %57 : vector<64x256xf32>
      %59 = arith.mulf %45, %56 : vector<1x256xf32>
      %60 = arith.subf %13, %59 : vector<1x256xf32>
      %61 = vector.broadcast %60 : vector<1x256xf32> to vector<64x256xf32>
      %62 = arith.addf %58, %61 : vector<64x256xf32>
      %cst_28 = arith.constant 0.000000e+00 : f32
      %63 = vector.broadcast %cst_28 : f32 to vector<64x256xf32>
      %64 = arith.maximumf %62, %63 : vector<64x256xf32>
      %65 = arith.truncf %64 : vector<64x256xf32> to vector<64x256xbf16>
      %c64 = arith.constant 64 : index
      %c0_29 = arith.constant 0 : index
      %66 = vector.load %arg6[%c64, %c0_29] : memref<128x256xbf16, #tpu.memory_space<vmem>>, vector<64x256xbf16>
      tpu.vector_store %arg6[%c64, %c0_29], %65 {strides = array<i32>} : memref<128x256xbf16, #tpu.memory_space<vmem>>, vector<64x256xbf16>,
    } else {
    }
    return
  }
  func.func @transform_0(%arg0: i32, %arg1: i32) -> (i32, i32) {
    %c0_i32 = arith.constant 0 : i32
    %c0_i32_0 = arith.constant 0 : i32
    return %c0_i32, %arg1 : i32, i32
  }
  func.func @transform_1(%arg0: i32, %arg1: i32) -> (i32, i32) {
    %c0_i32 = arith.constant 0 : i32
    return %arg1, %arg0 : i32, i32
  }
  func.func @transform_2(%arg0: i32, %arg1: i32) -> (i32, i32) {
    %c0_i32 = arith.constant 0 : i32
    %c0_i32_0 = arith.constant 0 : i32
    return %c0_i32, %arg0 : i32, i32
  }
  func.func @transform_3(%arg0: i32, %arg1: i32) -> (i32, i32) {
    %c0_i32 = arith.constant 0 : i32
    %c0_i32_0 = arith.constant 0 : i32
    return %c0_i32, %arg0 : i32, i32
  }
  func.func @transform_4(%arg0: i32, %arg1: i32) -> (i32, i32) {
    %c0_i32 = arith.constant 0 : i32
    %c0_i32_0 = arith.constant 0 : i32
    return %c0_i32, %arg0 : i32, i32
  }
}

module attributes {stable_mosaic.version = 11 : i64} {
  func.func @_linear_bn_kernel(%arg0: i32, %arg1: i32, %arg2: memref<128x256xbf16, #tpu.memory_space<vmem>>, %arg3: memref<256x256xbf16, #tpu.memory_space<vmem>>, %arg4: memref<1x256xf32, #tpu.memory_space<vmem>>, %arg5: memref<1x256xf32, #tpu.memory_space<vmem>>, %arg6: memref<128x256xf32, #tpu.memory_space<vmem>>, %arg7: memref<128x256xf32, #tpu.memory_space<vmem>>) attributes {dimension_semantics = [#tpu.dimension_semantics<parallel>, #tpu.dimension_semantics<arbitrary>], iteration_bounds = array<i64: 2, 2>, scalar_prefetch = 0 : i64, scratch_operands = 1 : i64, tpu.core_type = #tpu.core_type<tc>, window_params = [{transform_indices = @transform_0, window_bounds = array<i64: 128, 256>}, {transform_indices = @transform_1, window_bounds = array<i64: 256, 256>}, {transform_indices = @transform_2, window_bounds = array<i64: 1, 256>}, {transform_indices = @transform_3, window_bounds = array<i64: 1, 256>}, {transform_indices = @transform_4, window_bounds = array<i64: 128, 256>}]} {
    %c0_i32 = arith.constant 0 : i32
    %0 = arith.cmpi eq, %arg1, %c0_i32 : i32
    %1 = arith.extui %0 : i1 to i32
    %c0_i32_0 = arith.constant 0 : i32
    %2 = arith.cmpi ne, %1, %c0_i32_0 : i32
    scf.if %2 {
      %cst_9 = arith.constant 0.000000e+00 : f32
      %12 = vector.broadcast %cst_9 : f32 to vector<128x256xf32>
      %c0_10 = arith.constant 0 : index
      %c0_11 = arith.constant 0 : index
      %13 = vector.load %arg7[%c0_10, %c0_11] : memref<128x256xf32, #tpu.memory_space<vmem>>, vector<128x256xf32>
      tpu.vector_store %arg7[%c0_10, %c0_11], %12 {strides = array<i32>} : memref<128x256xf32, #tpu.memory_space<vmem>>, vector<128x256xf32>,
    } else {
    }
    %c0 = arith.constant 0 : index
    %c0_1 = arith.constant 0 : index
    %3 = vector.load %arg7[%c0, %c0_1] : memref<128x256xf32, #tpu.memory_space<vmem>>, vector<128x256xf32>
    %c0_2 = arith.constant 0 : index
    %c0_3 = arith.constant 0 : index
    %4 = vector.load %arg2[%c0_2, %c0_3] : memref<128x256xbf16, #tpu.memory_space<vmem>>, vector<128x256xbf16>
    %c0_4 = arith.constant 0 : index
    %c0_5 = arith.constant 0 : index
    %5 = vector.load %arg3[%c0_4, %c0_5] : memref<256x256xbf16, #tpu.memory_space<vmem>>, vector<256x256xbf16>
    %cst = arith.constant dense<0.000000e+00> : vector<128x256xf32>
    %6 = tpu.matmul %4, %5, %cst {dimension_numbers = #tpu.dot_dimension_numbers<[1], [0], [0], [1], [0, 0, 1, 1], [], []>} : vector<128x256xbf16>, vector<256x256xbf16>, vector<128x256xf32> -> vector<128x256xf32>
    %7 = arith.addf %3, %6 : vector<128x256xf32>
    %c0_6 = arith.constant 0 : index
    %c0_7 = arith.constant 0 : index
    %8 = vector.load %arg7[%c0_6, %c0_7] : memref<128x256xf32, #tpu.memory_space<vmem>>, vector<128x256xf32>
    tpu.vector_store %arg7[%c0_6, %c0_7], %7 {strides = array<i32>} : memref<128x256xf32, #tpu.memory_space<vmem>>, vector<128x256xf32>,
    %c1_i32 = arith.constant 1 : i32
    %9 = arith.cmpi eq, %arg1, %c1_i32 : i32
    %10 = arith.extui %9 : i1 to i32
    %c0_i32_8 = arith.constant 0 : i32
    %11 = arith.cmpi ne, %10, %c0_i32_8 : i32
    scf.if %11 {
      %c0_9 = arith.constant 0 : index
      %c0_10 = arith.constant 0 : index
      %12 = vector.load %arg4[%c0_9, %c0_10] : memref<1x256xf32, #tpu.memory_space<vmem>>, vector<1x256xf32>
      %c0_11 = arith.constant 0 : index
      %c0_12 = arith.constant 0 : index
      %13 = vector.load %arg5[%c0_11, %c0_12] : memref<1x256xf32, #tpu.memory_space<vmem>>, vector<1x256xf32>
      %c0_13 = arith.constant 0 : index
      %c0_14 = arith.constant 0 : index
      %14 = vector.load %arg7[%c0_13, %c0_14] : memref<128x256xf32, #tpu.memory_space<vmem>>, vector<128x256xf32>
      %15 = vector.extract_strided_slice %14 {offsets = [0, 0], sizes = [64, 256], strides = [1, 1]} : vector<128x256xf32> to vector<64x256xf32>
      %cst_15 = arith.constant dense<0.000000e+00> : vector<256xf32>
      %16 = vector.multi_reduction <add>, %15, %cst_15 [0] : vector<64x256xf32> to vector<256xf32>
      %17 = vector.shape_cast %16 : vector<256xf32> to vector<1x256xf32>
      %cst_16 = arith.constant 6.400000e+01 : f32
      %18 = vector.broadcast %cst_16 : f32 to vector<1x256xf32>
      %19 = arith.divf %17, %18 : vector<1x256xf32>
      %20 = vector.broadcast %19 : vector<1x256xf32> to vector<64x256xf32>
      %21 = arith.subf %15, %20 : vector<64x256xf32>
      %22 = arith.mulf %21, %21 : vector<64x256xf32>
      %cst_17 = arith.constant dense<0.000000e+00> : vector<256xf32>
      %23 = vector.multi_reduction <add>, %22, %cst_17 [0] : vector<64x256xf32> to vector<256xf32>
      %24 = vector.shape_cast %23 : vector<256xf32> to vector<1x256xf32>
      %cst_18 = arith.constant 6.400000e+01 : f32
      %25 = vector.broadcast %cst_18 : f32 to vector<1x256xf32>
      %26 = arith.divf %24, %25 : vector<1x256xf32>
      %cst_19 = arith.constant 9.99999974E-6 : f32
      %27 = vector.broadcast %cst_19 : f32 to vector<1x256xf32>
      %28 = arith.addf %26, %27 : vector<1x256xf32>
      %29 = math.rsqrt %28 : vector<1x256xf32>
      %30 = arith.mulf %12, %29 : vector<1x256xf32>
      %31 = vector.broadcast %30 : vector<1x256xf32> to vector<64x256xf32>
      %32 = arith.mulf %15, %31 : vector<64x256xf32>
      %33 = arith.mulf %19, %30 : vector<1x256xf32>
      %34 = arith.subf %13, %33 : vector<1x256xf32>
      %35 = vector.broadcast %34 : vector<1x256xf32> to vector<64x256xf32>
      %36 = arith.addf %32, %35 : vector<64x256xf32>
      %c0_20 = arith.constant 0 : index
      %c0_21 = arith.constant 0 : index
      %37 = vector.load %arg6[%c0_20, %c0_21] : memref<128x256xf32, #tpu.memory_space<vmem>>, vector<64x256xf32>
      tpu.vector_store %arg6[%c0_20, %c0_21], %36 {strides = array<i32>} : memref<128x256xf32, #tpu.memory_space<vmem>>, vector<64x256xf32>,
      %38 = vector.extract_strided_slice %14 {offsets = [64, 0], sizes = [64, 256], strides = [1, 1]} : vector<128x256xf32> to vector<64x256xf32>
      %cst_22 = arith.constant dense<0.000000e+00> : vector<256xf32>
      %39 = vector.multi_reduction <add>, %38, %cst_22 [0] : vector<64x256xf32> to vector<256xf32>
      %40 = vector.shape_cast %39 : vector<256xf32> to vector<1x256xf32>
      %cst_23 = arith.constant 6.400000e+01 : f32
      %41 = vector.broadcast %cst_23 : f32 to vector<1x256xf32>
      %42 = arith.divf %40, %41 : vector<1x256xf32>
      %43 = vector.broadcast %42 : vector<1x256xf32> to vector<64x256xf32>
      %44 = arith.subf %38, %43 : vector<64x256xf32>
      %45 = arith.mulf %44, %44 : vector<64x256xf32>
      %cst_24 = arith.constant dense<0.000000e+00> : vector<256xf32>
      %46 = vector.multi_reduction <add>, %45, %cst_24 [0] : vector<64x256xf32> to vector<256xf32>
      %47 = vector.shape_cast %46 : vector<256xf32> to vector<1x256xf32>
      %cst_25 = arith.constant 6.400000e+01 : f32
      %48 = vector.broadcast %cst_25 : f32 to vector<1x256xf32>
      %49 = arith.divf %47, %48 : vector<1x256xf32>
      %cst_26 = arith.constant 9.99999974E-6 : f32
      %50 = vector.broadcast %cst_26 : f32 to vector<1x256xf32>
      %51 = arith.addf %49, %50 : vector<1x256xf32>
      %52 = math.rsqrt %51 : vector<1x256xf32>
      %53 = arith.mulf %12, %52 : vector<1x256xf32>
      %54 = vector.broadcast %53 : vector<1x256xf32> to vector<64x256xf32>
      %55 = arith.mulf %38, %54 : vector<64x256xf32>
      %56 = arith.mulf %42, %53 : vector<1x256xf32>
      %57 = arith.subf %13, %56 : vector<1x256xf32>
      %58 = vector.broadcast %57 : vector<1x256xf32> to vector<64x256xf32>
      %59 = arith.addf %55, %58 : vector<64x256xf32>
      %c64 = arith.constant 64 : index
      %c0_27 = arith.constant 0 : index
      %60 = vector.load %arg6[%c64, %c0_27] : memref<128x256xf32, #tpu.memory_space<vmem>>, vector<64x256xf32>
      tpu.vector_store %arg6[%c64, %c0_27], %59 {strides = array<i32>} : memref<128x256xf32, #tpu.memory_space<vmem>>, vector<64x256xf32>,
    } else {
    }
    return
  }
  func.func @transform_0(%arg0: i32, %arg1: i32) -> (i32, i32) {
    %c0_i32 = arith.constant 0 : i32
    %c0_i32_0 = arith.constant 0 : i32
    return %c0_i32, %arg1 : i32, i32
  }
  func.func @transform_1(%arg0: i32, %arg1: i32) -> (i32, i32) {
    %c0_i32 = arith.constant 0 : i32
    return %arg1, %arg0 : i32, i32
  }
  func.func @transform_2(%arg0: i32, %arg1: i32) -> (i32, i32) {
    %c0_i32 = arith.constant 0 : i32
    %c0_i32_0 = arith.constant 0 : i32
    return %c0_i32, %arg0 : i32, i32
  }
  func.func @transform_3(%arg0: i32, %arg1: i32) -> (i32, i32) {
    %c0_i32 = arith.constant 0 : i32
    %c0_i32_0 = arith.constant 0 : i32
    return %c0_i32, %arg0 : i32, i32
  }
  func.func @transform_4(%arg0: i32, %arg1: i32) -> (i32, i32) {
    %c0_i32 = arith.constant 0 : i32
    %c0_i32_0 = arith.constant 0 : i32
    return %c0_i32, %arg0 : i32, i32
  }
}

</mosaic_0001>

<bundles_post_ra>
// kernel: barlow_twins_forward.3
= control target key start
LH: loop header
LB: loop body
LE: loop exit
PB: predicated region body
PF: predicated region fallthrough
CT: control target
= control target key end

     0   :  { %s2830_s0 = inlined_call_operand.vmem [shape: bf16[128,512], index: 0, kind: input, shape index: {}]   ;;  %s2831_s1 = inlined_call_operand.vmem [shape: bf16[512,512], index: 1, kind: input, shape index: {}]   ;;  %s2832_s2 = inlined_call_operand.vmem [shape: f32[1,512], index: 2, kind: input, shape index: {}]   ;;  %s2833_s3 = inlined_call_operand.vmem [shape: f32[1,512], index: 3, kind: input, shape index: {}]   ;;  %s2834_s4 = inlined_call_operand.vmem [shape: bf16[128,512], index: 4, kind: output, shape index: {}]  }
   0x1   :  { %2845 = sst [smem:[#allocation16_spill]] %s2830_s0 }
   0x2   :  { %2846 = sst [smem:[#allocation17_spill]] %s2831_s1 }
   0x3   :  { %s2247_s15 = smov 0   ;;  %s2249_s16 = smov 0  }
   0x4   :  { %s2251_s17 = smov 0   ;;  %s2253_s18 = smov 0  }
   0x5   :  { %s2255_s19 = smov 0   ;;  %s2257_s20 = smov 0  }
   0x6   :  { %s2259_s21 = smov 0   ;;  %s2261_s22 = smov 0  }
   0x7   :  { %s2263_s23 = smov 0   ;;  %s2265_s24 = smov 0  }
   0x8   :  { %s2267_s25 = smov 0  }
   0x9 LB: > { %s1822_s26 = sadd.s32 4294967295, %s2218_s25   ;;  %s23_s27 = sadd.s32 1, %s2210_s23  ;;  %s2218_s25 = sphi %s2267_s25, %s14_s25   ;;  %s2214_s24 = sphi %s2265_s24, %s2881_s24   ;;  %s2210_s23 = sphi %s2263_s23, %s2880_s23   ;;  %s2206_s22 = sphi %s2261_s22, %s2879_s22   ;;  %s2202_s21 = sphi %s2259_s21, %s2878_s21   ;;  %s2198_s20 = sphi %s2257_s20, %s2877_s20   ;;  %s2194_s19 = sphi %s2255_s19, %s2876_s19   ;;  %s2190_s18 = sphi %s2253_s18, %s2875_s18   ;;  %s2186_s17 = sphi %s2251_s17, %s2874_s17   ;;  %s2182_s16 = sphi %s2249_s16, %s2873_s16   ;;  %s2178_s15 = sphi %s2247_s15, %s2872_s15  }
   0xa   : > { %p24_p0 = scmp.ge.s32.totalorder %s23_s27, 2  ;;  %s26_s28 = sadd.s32 1, %s2214_s24 }
   0xb   : > { %s33_s29 = sadd.s32 1, %s2198_s20  ;;  %p40_p1 = scmp.ne.s32.totalorder %s2198_s20, %s2194_s19 }
   0xc   : > { %s2883_s27 = smov (%p24_p0, %s23_s27), 0  ;;  %s2885_s28 = smov (!%p24_p0, %s26_s28), %s2214_s24 }
   0xd   : > { %2847 = sst [smem:[#allocation6_spill]] %s2883_s27  ;;  %s30_s30 = ssub.s32 %s2210_s23, %s2883_s27 }
   0xe   : > { %p41_p2 = scmp.eq.s32.totalorder %s2218_s25, 0  ;;  %p28_p3 = scmp.ge.s32.totalorder %s2885_s28, 2 }
   0xf   : > { %p31_p4 = scmp.eq.s32.totalorder %s30_s30, 0  ;;  %s61_s6 = sadd.s32 1, %s2190_s18 }
  0x10   : > { %p2314_p5 = por %p41_p2, %p40_p1  ;;  %s2887_s28 = smov (%p28_p3, %s2885_s28), 0 }
  0x11   : > { %2849 = sst [smem:[#allocation7_spill]] %s2887_s28  ;;  %s57_s8 = ssub.s32 %s2214_s24, %s2887_s28 }
  0x12   : > { %s2322_s7 = scalar_select %p31_p4, %s2198_s20, %s33_s29  }
  0x13   : > { %p68_p6 = scmp.ne.s32.totalorder %s2190_s18, %s2186_s17  ;;  %s58_s9 = sor.u32 %s57_s8, %s30_s30 }
  0x14   : > { %p137_p7 = scmp.eq.s32.totalorder %s57_s8, 0  ;;  %p59_p8 = scmp.eq.s32.totalorder %s58_s9, 0 }
  0x15   : > { %p2328_p9 = por %p68_p6, %p41_p2  ;;  %s139_s11 = sadd.s32 1, %s2182_s16 }
  0x16   : > { %p149_p10 = scmp.ne.s32.totalorder %s2182_s16, %s2178_s15  ;;  %p150_p11 = scmp.eq.s32.totalorder %s1822_s26, 3 }
  0x17   : > { %s2336_s12 = scalar_select %p59_p8, %s2190_s18, %s61_s6  }
  0x18   : > { %s2339_s13 = scalar_select %p137_p7, %s2182_s16, %s139_s11  }
  0x19   : > { %p2341_p12 = por %p150_p11, %p149_p10  ;;  %p1825_p13 = scmp.ge.s32.totalorder %s2218_s25, 4 }
  0x1b   : > { %172 = sbr.rel (%p1825_p13) target bundleno = 78 (0x4e), region = 16 }
  0x22   : > { %175 = sbr.rel (!%p2314_p5) target bundleno = 52 (0x34), region = 20  ;;  %s177_s29 = sand.u32 (%p2314_p5), 1, %s2198_s20  }
  0x23   : > { %s1911_s30 = sshll.u32 (%p2314_p5), %s2210_s23, 3  ;;  %s1826_s8 = sshll.u32 (%p2314_p5), %s177_s29, 7 }
  0x24   : > { %s2852_s0 = sld [smem:[#allocation16_spill]] (%p2314_p5)  ;;  %s179_s26 = scalar_lea.vmem (%p2314_p5), [#allocation3], %s1826_s8 }
  0x2a   : > { %s2353_s11 = scalar_lea.vmem %s2852_s0, %s1911_s30 }
  0x2b   : > { %v240_v0 = vld [vmem:[%s2353_s11] sm:$0xff]  ;;  %v242_v1 = vld [vmem:[%s2353_s11 + $0x10] sm:$0xff] }
  0x2c   : > { %v244_v2 = vld [vmem:[%s2353_s11 + $0x20] sm:$0xff]  ;;  %241 = vst [vmem:[%s179_s26] sm:$0xff] %v240_v0  ;;  %243 = vst [vmem:[%s179_s26 + $0x8] sm:$0xff] %v242_v1  ;;  %v246_v3 = vld [vmem:[%s2353_s11 + $0x30] sm:$0xff] }
  0x2d   : > { %245 = vst [vmem:[%s179_s26 + $0x10] sm:$0xff] %v244_v2  ;;  %v248_v4 = vld [vmem:[%s2353_s11 + $0x40] sm:$0xff]  ;;  %v250_v5 = vld [vmem:[%s2353_s11 + $0x50] sm:$0xff]  ;;  %247 = vst [vmem:[%s179_s26 + $0x18] sm:$0xff] %v246_v3 }
  0x2e   : > { %249 = vst [vmem:[%s179_s26 + $0x20] sm:$0xff] %v248_v4  ;;  %251 = vst [vmem:[%s179_s26 + $0x28] sm:$0xff] %v250_v5  ;;  %v252_v6 = vld [vmem:[%s2353_s11 + $0x60] sm:$0xff]  ;;  %v254_v7 = vld [vmem:[%s2353_s11 + $0x70] sm:$0xff] }
  0x2f   : > { %v256_v8 = vld [vmem:[%s2353_s11 + $0x80] sm:$0xff]  ;;  %253 = vst [vmem:[%s179_s26 + $0x30] sm:$0xff] %v252_v6  ;;  %255 = vst [vmem:[%s179_s26 + $0x38] sm:$0xff] %v254_v7  ;;  %v258_v9 = vld [vmem:[%s2353_s11 + $0x90] sm:$0xff] }
  0x30   : > { %257 = vst [vmem:[%s179_s26 + $0x40] sm:$0xff] %v256_v8  ;;  %v260_v10 = vld [vmem:[%s2353_s11 + $0xa0] sm:$0xff]  ;;  %v262_v11 = vld [vmem:[%s2353_s11 + $0xb0] sm:$0xff]  ;;  %259 = vst [vmem:[%s179_s26 + $0x48] sm:$0xff] %v258_v9 }
  0x31   : > { %261 = vst [vmem:[%s179_s26 + $0x50] sm:$0xff] %v260_v10  ;;  %263 = vst [vmem:[%s179_s26 + $0x58] sm:$0xff] %v262_v11  ;;  %v264_v12 = vld [vmem:[%s2353_s11 + $0xc0] sm:$0xff]  ;;  %v266_v13 = vld [vmem:[%s2353_s11 + $0xd0] sm:$0xff] }
  0x32   : > { %v268_v14 = vld [vmem:[%s2353_s11 + $0xe0] sm:$0xff]  ;;  %265 = vst [vmem:[%s179_s26 + $0x60] sm:$0xff] %v264_v12  ;;  %267 = vst [vmem:[%s179_s26 + $0x68] sm:$0xff] %v266_v13  ;;  %v270_v15 = vld [vmem:[%s2353_s11 + $0xf0] sm:$0xff] }
  0x33   : > { %269 = vst [vmem:[%s179_s26 + $0x70] sm:$0xff] %v268_v14  ;;  %271 = vst [vmem:[%s179_s26 + $0x78] sm:$0xff] %v270_v15 }
  0x34 PF: > { %277 = sbr.rel (!%p2328_p9) target bundleno = 78 (0x4e), region = 58  ;;  %s279_s5 = sand.u32 (%p2328_p9), 1, %s2190_s18  }
  0x35   : > { %s1831_s29 = sshll.u32 (%p2328_p9), %s2214_s24, 1  ;;  %s1829_s30 = sshll.u32 (%p2328_p9), %s279_s5, 8 }
  0x36   : > { %s1912_s8 = sshll.u32 (%p2328_p9), %s2210_s23, 7  ;;  %s2853_s1 = sld [smem:[#allocation17_spill]] (%p2328_p9) }
  0x37   : > { %s285_s6 = sadd.s32 (%p2328_p9), %s1912_s8, %s1831_s29  ;;  %s2384_s10 = scalar_lea.vmem (%p2328_p9), [#allocation4], %s1829_s30 }
  0x38   : > { %s1833_s9 = sshll.u32 (%p2328_p9), %s285_s6, 2 }
  0x3c   : > { %s2379_s27 = scalar_lea.vmem %s2853_s1, %s1833_s9 }
  0x3d   : > { %v377_v16 = vld [vmem:[%s2379_s27] sm:$0xff]  ;;  %v379_v17 = vld [vmem:[%s2379_s27 + $0x10] sm:$0xff] }
  0x3e   : > { %v381_v18 = vld [vmem:[%s2379_s27 + $0x20] sm:$0xff]  ;;  %378 = vst [vmem:[%s2384_s10] sm:$0xff] %v377_v16  ;;  %380 = vst [vmem:[%s2384_s10 + $0x8] sm:$0xff] %v379_v17  ;;  %v383_v19 = vld [vmem:[%s2379_s27 + $0x30] sm:$0xff] }
  0x3f   : > { %382 = vst [vmem:[%s2384_s10 + $0x10] sm:$0xff] %v381_v18  ;;  %v385_v20 = vld [vmem:[%s2379_s27 + $0x40] sm:$0xff]  ;;  %v387_v21 = vld [vmem:[%s2379_s27 + $0x50] sm:$0xff]  ;;  %384 = vst [vmem:[%s2384_s10 + $0x18] sm:$0xff] %v383_v19 }
  0x40   : > { %386 = vst [vmem:[%s2384_s10 + $0x20] sm:$0xff] %v385_v20  ;;  %388 = vst [vmem:[%s2384_s10 + $0x28] sm:$0xff] %v387_v21  ;;  %v389_v22 = vld [vmem:[%s2379_s27 + $0x60] sm:$0xff]  ;;  %v391_v23 = vld [vmem:[%s2379_s27 + $0x70] sm:$0xff] }
  0x41   : > { %v393_v24 = vld [vmem:[%s2379_s27 + $0x80] sm:$0xff]  ;;  %390 = vst [vmem:[%s2384_s10 + $0x30] sm:$0xff] %v389_v22  ;;  %392 = vst [vmem:[%s2384_s10 + $0x38] sm:$0xff] %v391_v23  ;;  %v395_v25 = vld [vmem:[%s2379_s27 + $0x90] sm:$0xff] }
  0x42   : > { %394 = vst [vmem:[%s2384_s10 + $0x40] sm:$0xff] %v393_v24  ;;  %v397_v26 = vld [vmem:[%s2379_s27 + $0xa0] sm:$0xff]  ;;  %v399_v27 = vld [vmem:[%s2379_s27 + $0xb0] sm:$0xff]  ;;  %396 = vst [vmem:[%s2384_s10 + $0x48] sm:$0xff] %v395_v25 }
  0x43   : > { %398 = vst [vmem:[%s2384_s10 + $0x50] sm:$0xff] %v397_v26  ;;  %400 = vst [vmem:[%s2384_s10 + $0x58] sm:$0xff] %v399_v27  ;;  %v401_v28 = vld [vmem:[%s2379_s27 + $0xc0] sm:$0xff]  ;;  %v403_v29 = vld [vmem:[%s2379_s27 + $0xd0] sm:$0xff] }
  0x44   : > { %v405_v30 = vld [vmem:[%s2379_s27 + $0xe0] sm:$0xff]  ;;  %402 = vst [vmem:[%s2384_s10 + $0x60] sm:$0xff] %v401_v28  ;;  %404 = vst [vmem:[%s2384_s10 + $0x68] sm:$0xff] %v403_v29  ;;  %v407_v31 = vld [vmem:[%s2379_s27 + $0xf0] sm:$0xff] }
  0x45   : > { %406 = vst [vmem:[%s2384_s10 + $0x70] sm:$0xff] %v405_v30  ;;  %v409_v32 = vld [vmem:[%s2379_s27 + $0x100] sm:$0xff]  ;;  %v411_v33 = vld [vmem:[%s2379_s27 + $0x110] sm:$0xff]  ;;  %408 = vst [vmem:[%s2384_s10 + $0x78] sm:$0xff] %v407_v31 }
  0x46   : > { %410 = vst [vmem:[%s2384_s10 + $0x80] sm:$0xff] %v409_v32  ;;  %412 = vst [vmem:[%s2384_s10 + $0x88] sm:$0xff] %v411_v33  ;;  %v413_v34 = vld [vmem:[%s2379_s27 + $0x120] sm:$0xff]  ;;  %v415_v35 = vld [vmem:[%s2379_s27 + $0x130] sm:$0xff] }
  0x47   : > { %v417_v36 = vld [vmem:[%s2379_s27 + $0x140] sm:$0xff]  ;;  %414 = vst [vmem:[%s2384_s10 + $0x90] sm:$0xff] %v413_v34  ;;  %416 = vst [vmem:[%s2384_s10 + $0x98] sm:$0xff] %v415_v35  ;;  %v419_v37 = vld [vmem:[%s2379_s27 + $0x150] sm:$0xff] }
  0x48   : > { %418 = vst [vmem:[%s2384_s10 + $0xa0] sm:$0xff] %v417_v36  ;;  %v421_v38 = vld [vmem:[%s2379_s27 + $0x160] sm:$0xff]  ;;  %v423_v39 = vld [vmem:[%s2379_s27 + $0x170] sm:$0xff]  ;;  %420 = vst [vmem:[%s2384_s10 + $0xa8] sm:$0xff] %v419_v37 }
  0x49   : > { %422 = vst [vmem:[%s2384_s10 + $0xb0] sm:$0xff] %v421_v38  ;;  %424 = vst [vmem:[%s2384_s10 + $0xb8] sm:$0xff] %v423_v39  ;;  %v425_v40 = vld [vmem:[%s2379_s27 + $0x180] sm:$0xff]  ;;  %v427_v41 = vld [vmem:[%s2379_s27 + $0x190] sm:$0xff] }
  0x4a   : > { %v429_v42 = vld [vmem:[%s2379_s27 + $0x1a0] sm:$0xff]  ;;  %426 = vst [vmem:[%s2384_s10 + $0xc0] sm:$0xff] %v425_v40  ;;  %428 = vst [vmem:[%s2384_s10 + $0xc8] sm:$0xff] %v427_v41  ;;  %v431_v43 = vld [vmem:[%s2379_s27 + $0x1b0] sm:$0xff] }
  0x4b   : > { %430 = vst [vmem:[%s2384_s10 + $0xd0] sm:$0xff] %v429_v42  ;;  %v433_v44 = vld [vmem:[%s2379_s27 + $0x1c0] sm:$0xff]  ;;  %v435_v45 = vld [vmem:[%s2379_s27 + $0x1d0] sm:$0xff]  ;;  %432 = vst [vmem:[%s2384_s10 + $0xd8] sm:$0xff] %v431_v43 }
  0x4c   : > { %434 = vst [vmem:[%s2384_s10 + $0xe0] sm:$0xff] %v433_v44  ;;  %436 = vst [vmem:[%s2384_s10 + $0xe8] sm:$0xff] %v435_v45  ;;  %v437_v46 = vld [vmem:[%s2379_s27 + $0x1e0] sm:$0xff]  ;;  %v439_v47 = vld [vmem:[%s2379_s27 + $0x1f0] sm:$0xff] }
  0x4d   : > { %438 = vst [vmem:[%s2384_s10 + $0xf0] sm:$0xff] %v437_v46  ;;  %440 = vst [vmem:[%s2384_s10 + $0xf8] sm:$0xff] %v439_v47 }
  0x4e PF: > { %p1834_p0 = scmp.ge.s32.totalorder %s2218_s25, 1  ;;  %p461_p1 = scmp.lt.s32.totalorder %s2218_s25, 5 }
  0x50   : > { %p462_p2 = pnand %p1834_p0, %p461_p1 }
  0x51   : > { %s468_s0 = sand.u32 (!%p462_p2), 1, %s2194_s19   ;;  %s475_s28 = sand.u32 (!%p462_p2), 1, %s2186_s17  }
  0x52   : > { %465 = sbr.rel (%p462_p2) target bundleno = 559 (0x22f), region = 104  ;;  %s1835_s11 = sshll.u32 (!%p462_p2), %s468_s0, 7 }
  0x53   : > { %s1836_s26 = sshll.u32 (!%p462_p2), %s475_s28, 8  ;;  %s508_s5 = sand.u32 (!%p462_p2), 1, %s2178_s15  }
  0x54   : > { %s1838_s27 = sshll.u32 (!%p462_p2), %s2206_s22, 1  ;;  %s1837_s29 = sshll.u32 (!%p462_p2), %s508_s5, 7 }
  0x55   : > { %p515_p3 = scmp.lt.s32.totalorder (!%p462_p2), %s1838_s27, 3  ;;  %s2463_s19 = scalar_lea.vmem (!%p462_p2), [#allocation3], %s1835_s11 }
  0x56   : > { %s2465_s17 = scalar_lea.vmem (!%p462_p2), [#allocation4], %s1836_s26  ;;  %s2467_s15 = scalar_lea.vmem (!%p462_p2), [#allocation5], %s1837_s29 }
  0x57   : > { %p1840_p4 = scmp.ne.s32.totalorder (!%p462_p2), %s2202_s21, 0 }
  0x59   : > { %s2889_s27 = smov (!%p515_p3, %s1838_s27), 3  ;;  %528 = sbr.rel (%p1840_p4) target bundleno = 107 (0x6b), region = 116 }
  0x5a   : > { %s517_s6 = scalar_lea.vmem %s2832_s2, %s2889_s27  ;;  %s522_s1 = scalar_lea.vmem %s2833_s3, %s2889_s27  ;;  %v2220_v48 = vmov (!%p1840_p4), 0.0  }
  0x5b   : > { %529 = vst [vmem:[#allocation2] sm:$0xff] (!%p1840_p4), %v2220_v48  ;;  %530 = vst [vmem:[#allocation2 + $0x8] sm:$0xff] (!%p1840_p4), %v2220_v48 }
  0x5c   : > { %531 = vst [vmem:[#allocation2 + $0x10] sm:$0xff] (!%p1840_p4), %v2220_v48  ;;  %532 = vst [vmem:[#allocation2 + $0x18] sm:$0xff] (!%p1840_p4), %v2220_v48 }
  0x5d   : > { %533 = vst [vmem:[#allocation2 + $0x20] sm:$0xff] (!%p1840_p4), %v2220_v48  ;;  %534 = vst [vmem:[#allocation2 + $0x28] sm:$0xff] (!%p1840_p4), %v2220_v48 }
  0x5e   : > { %535 = vst [vmem:[#allocation2 + $0x30] sm:$0xff] (!%p1840_p4), %v2220_v48  ;;  %536 = vst [vmem:[#allocation2 + $0x38] sm:$0xff] (!%p1840_p4), %v2220_v48 }
  0x5f   : > { %537 = vst [vmem:[#allocation2 + $0x40] sm:$0xff] (!%p1840_p4), %v2220_v48  ;;  %538 = vst [vmem:[#allocation2 + $0x48] sm:$0xff] (!%p1840_p4), %v2220_v48 }
  0x60   : > { %539 = vst [vmem:[#allocation2 + $0x50] sm:$0xff] %v2220_v48  ;;  %540 = vst [vmem:[#allocation2 + $0x58] sm:$0xff] %v2220_v48 }
  0x61   : > { %541 = vst [vmem:[#allocation2 + $0x60] sm:$0xff] %v2220_v48  ;;  %542 = vst [vmem:[#allocation2 + $0x68] sm:$0xff] %v2220_v48 }
  0x62   : > { %543 = vst [vmem:[#allocation2 + $0x70] sm:$0xff] %v2220_v48  ;;  %544 = vst [vmem:[#allocation2 + $0x78] sm:$0xff] %v2220_v48 }
  0x63   : > { %545 = vst [vmem:[#allocation2 + $0x80] sm:$0xff] %v2220_v48  ;;  %546 = vst [vmem:[#allocation2 + $0x88] sm:$0xff] %v2220_v48 }
  0x64   : > { %547 = vst [vmem:[#allocation2 + $0x90] sm:$0xff] %v2220_v48  ;;  %548 = vst [vmem:[#allocation2 + $0x98] sm:$0xff] %v2220_v48 }
  0x65   : > { %549 = vst [vmem:[#allocation2 + $0xa0] sm:$0xff] %v2220_v48  ;;  %550 = vst [vmem:[#allocation2 + $0xa8] sm:$0xff] %v2220_v48 }
  0x66   : > { %551 = vst [vmem:[#allocation2 + $0xb0] sm:$0xff] %v2220_v48  ;;  %552 = vst [vmem:[#allocation2 + $0xb8] sm:$0xff] %v2220_v48 }
  0x67   : > { %553 = vst [vmem:[#allocation2 + $0xc0] sm:$0xff] %v2220_v48  ;;  %554 = vst [vmem:[#allocation2 + $0xc8] sm:$0xff] %v2220_v48 }
  0x68   : > { %555 = vst [vmem:[#allocation2 + $0xd0] sm:$0xff] %v2220_v48  ;;  %556 = vst [vmem:[#allocation2 + $0xd8] sm:$0xff] %v2220_v48 }
  0x69   : > { %557 = vst [vmem:[#allocation2 + $0xe0] sm:$0xff] %v2220_v48  ;;  %558 = vst [vmem:[#allocation2 + $0xe8] sm:$0xff] %v2220_v48 }
  0x6a   : > { %559 = vst [vmem:[#allocation2 + $0xf0] sm:$0xff] %v2220_v48  ;;  %560 = vst [vmem:[#allocation2 + $0xf8] sm:$0xff] %v2220_v48 }
  0x6b PF: > { %v2052_v49 = vld [vmem:[%s2465_s17 + $0x4] ss:$8 sps:$4 sm:$0xff]   ;;  %v2054_v50 = vld [vmem:[%s2465_s17] ss:$8 sps:$4 sm:$0xff]   ;;  %v2055_v51 = vld [vmem:[%s2465_s17 + $0x14] ss:$8 sps:$4 sm:$0xff]  }
  0x6c   : > { %881 = vmatprep.subr.bf16.mxu0 %v2052_v49  ;;  %1930 = vmatprep.subr.bf16.mxu1 %v2052_v49  ;;  %v2057_v52 = vld [vmem:[%s2465_s17 + $0x10] ss:$8 sps:$4 sm:$0xff]   ;;  %v2058_v53 = vld [vmem:[%s2465_s17 + $0x24] ss:$8 sps:$4 sm:$0xff]   ;;  %v2060_v54 = vld [vmem:[%s2465_s17 + $0x20] ss:$8 sps:$4 sm:$0xff]  }
  0x6d   : > { %882 = vmatpush1.bf16.msra.mxu0 %v2054_v50  ;;  %1946 = vmatpush1.bf16.msra.mxu1 %v2054_v50  ;;  %v2061_v55 = vld [vmem:[%s2465_s17 + $0x34] ss:$8 sps:$4 sm:$0xff]   ;;  %v2063_v56 = vld [vmem:[%s2465_s17 + $0x30] ss:$8 sps:$4 sm:$0xff]   ;;  %v2064_v57 = vld [vmem:[%s2465_s17 + $0x44] ss:$8 sps:$4 sm:$0xff]  }
  0x6e   : > { %883 = vmatprep.subr.bf16.mxu0 %v2055_v51  ;;  %1931 = vmatprep.subr.bf16.mxu1 %v2055_v51  ;;  %v2066_v58 = vld [vmem:[%s2465_s17 + $0x40] ss:$8 sps:$4 sm:$0xff]   ;;  %v2067_v59 = vld [vmem:[%s2465_s17 + $0x54] ss:$8 sps:$4 sm:$0xff]   ;;  %v2069_v60 = vld [vmem:[%s2465_s17 + $0x50] ss:$8 sps:$4 sm:$0xff]  }
  0x6f   : > { %v2070_v61 = vld [vmem:[%s2465_s17 + $0x64] ss:$8 sps:$4 sm:$0xff]   ;;  %v2072_v63 = vld [vmem:[%s2465_s17 + $0x60] ss:$8 sps:$4 sm:$0xff]   ;;  %v2073_v1 = vld [vmem:[%s2465_s17 + $0x74] ss:$8 sps:$4 sm:$0xff]  }
  0x70   : > { %v2102_v62 = vld [vmem:[%s2463_s19 + $0x4] ss:$8 sps:$4 sm:$0xff]   ;;  %v2075_v2 = vld [vmem:[%s2465_s17 + $0x70] ss:$8 sps:$4 sm:$0xff]   ;;  %v2078_v4 = vld [vmem:[%s2465_s17 + $0x80] ss:$8 sps:$4 sm:$0xff]  }
  0x71   : > { %884 = vmatpush1.bf16.msra.mxu0 %v2057_v52  ;;  %1947 = vmatpush1.bf16.msra.mxu1 %v2057_v52  ;;  %v2105_v0 = vld [vmem:[%s2463_s19 + $0x44] ss:$8 sps:$4 sm:$0xff]   ;;  %v2079_v5 = vld [vmem:[%s2465_s17 + $0x94] ss:$8 sps:$4 sm:$0xff]   ;;  %v2081_v6 = vld [vmem:[%s2465_s17 + $0x90] ss:$8 sps:$4 sm:$0xff]  }
  0x72   : > { %885 = vmatprep.subr.bf16.mxu0 %v2058_v53  ;;  %1932 = vmatprep.subr.bf16.mxu1 %v2058_v53  ;;  %v2076_v3 = vld [vmem:[%s2465_s17 + $0x84] ss:$8 sps:$4 sm:$0xff]   ;;  %v2084_v8 = vld [vmem:[%s2465_s17 + $0xa0] ss:$8 sps:$4 sm:$0xff]   ;;  %v2085_v9 = vld [vmem:[%s2465_s17 + $0xb4] ss:$8 sps:$4 sm:$0xff]  }
  0x73   : > { %913 = vmatprep.mubr.bf16.mxu0 %v2102_v62  ;;  %953 = vmatprep.mubr.bf16.mxu1 %v2105_v0  ;;  %v2082_v7 = vld [vmem:[%s2465_s17 + $0xa4] ss:$8 sps:$4 sm:$0xff]   ;;  %v2087_v10 = vld [vmem:[%s2465_s17 + $0xb0] ss:$8 sps:$4 sm:$0xff]   ;;  %v2090_v12 = vld [vmem:[%s2465_s17 + $0xc0] ss:$8 sps:$4 sm:$0xff]  }
  0x74   : > { %v2088_v11 = vld [vmem:[%s2465_s17 + $0xc4] ss:$8 sps:$4 sm:$0xff]   ;;  %v2091_v13 = vld [vmem:[%s2465_s17 + $0xd4] ss:$8 sps:$4 sm:$0xff]   ;;  %v2093_v14 = vld [vmem:[%s2465_s17 + $0xd0] ss:$8 sps:$4 sm:$0xff]  }
  0x75   : > { %886 = vmatpush1.bf16.msra.mxu0 %v2060_v54  ;;  %1948 = vmatpush1.bf16.msra.mxu1 %v2060_v54  ;;  %v2094_v15 = vld [vmem:[%s2465_s17 + $0xe4] ss:$8 sps:$4 sm:$0xff]   ;;  %v2096_v16 = vld [vmem:[%s2465_s17 + $0xe0] ss:$8 sps:$4 sm:$0xff]   ;;  %v2097_v17 = vld [vmem:[%s2465_s17 + $0xf4] ss:$8 sps:$4 sm:$0xff]  }
  0x76   : > { %887 = vmatprep.subr.bf16.mxu0 %v2061_v55  ;;  %1933 = vmatprep.subr.bf16.mxu1 %v2061_v55  ;;  %v2099_v18 = vld [vmem:[%s2465_s17 + $0xf0] ss:$8 sps:$4 sm:$0xff]   ;;  %v2100_v19 = vld [vmem:[%s2463_s19] ss:$8 sps:$4 sm:$0xff]   ;;  %v2106_v21 = vld [vmem:[%s2463_s19 + $0x14] ss:$8 sps:$4 sm:$0xff]  }
  0x77   : > { %v2103_v20 = vld [vmem:[%s2463_s19 + $0x40] ss:$8 sps:$4 sm:$0xff]   ;;  %v2108_v22 = vld [vmem:[%s2463_s19 + $0x54] ss:$8 sps:$4 sm:$0xff]   ;;  %v2110_v23 = vld [vmem:[%s2463_s19 + $0x10] ss:$8 sps:$4 sm:$0xff]  }
  0x78   : > { %v2111_v24 = vld [vmem:[%s2463_s19 + $0x50] ss:$8 sps:$4 sm:$0xff]   ;;  %v2112_v25 = vld [vmem:[%s2463_s19 + $0x24] ss:$8 sps:$4 sm:$0xff]   ;;  %v2116_v27 = vld [vmem:[%s2463_s19 + $0x20] ss:$8 sps:$4 sm:$0xff]  }
  0x79   : > { %888 = vmatpush1.bf16.msra.mxu0 %v2063_v56  ;;  %1949 = vmatpush1.bf16.msra.mxu1 %v2063_v56  ;;  %v2114_v26 = vld [vmem:[%s2463_s19 + $0x64] ss:$8 sps:$4 sm:$0xff]   ;;  %v2117_v28 = vld [vmem:[%s2463_s19 + $0x60] ss:$8 sps:$4 sm:$0xff]   ;;  %v2118_v29 = vld [vmem:[%s2463_s19 + $0x34] ss:$8 sps:$4 sm:$0xff]  }
  0x7a   : > { %889 = vmatprep.subr.bf16.mxu0 %v2064_v57  ;;  %1934 = vmatprep.subr.bf16.mxu1 %v2064_v57  ;;  %v2120_v30 = vld [vmem:[%s2463_s19 + $0x74] ss:$8 sps:$4 sm:$0xff]   ;;  %v2122_v31 = vld [vmem:[%s2463_s19 + $0x30] ss:$8 sps:$4 sm:$0xff]   ;;  %v561_v33 = vld [vmem:[#allocation2] sm:$0xff]  ;;  %p1889_p5 = scmp.ne.s32.totalorder %s2202_s21, 1 }
  0x7b   : > { %v2123_v32 = vld [vmem:[%s2463_s19 + $0x70] ss:$8 sps:$4 sm:$0xff]   ;;  %v577_v34 = vld [vmem:[#allocation2 + $0x80] sm:$0xff]  ;;  %v562_v35 = vld [vmem:[#allocation2 + $0x8] sm:$0xff] }
  0x7c   : > { %v578_v36 = vld [vmem:[#allocation2 + $0x88] sm:$0xff]  ;;  %v563_v39 = vld [vmem:[#allocation2 + $0x10] sm:$0xff]  ;;  %v564_v45 = vld [vmem:[#allocation2 + $0x18] sm:$0xff] }
  0x7d   : > { %890 = vmatpush1.bf16.msra.mxu0 %v2066_v58  ;;  %1950 = vmatpush1.bf16.msra.mxu1 %v2066_v58  ;;  %v579_v40 = vld [vmem:[#allocation2 + $0x90] sm:$0xff]  ;;  %v580_v46 = vld [vmem:[#allocation2 + $0x98] sm:$0xff]  ;;  %v565_v57 = vld [vmem:[#allocation2 + $0x20] sm:$0xff] }
  0x7e   : > { %891 = vmatprep.subr.bf16.mxu0 %v2067_v59  ;;  %1935 = vmatprep.subr.bf16.mxu1 %v2067_v59  ;;  %v581_v58 = vld [vmem:[#allocation2 + $0xa0] sm:$0xff]  ;;  %v566_v59 = vld [vmem:[#allocation2 + $0x28] sm:$0xff]  ;;  %v583_v0 = vld [vmem:[#allocation2 + $0xb0] sm:$0xff] }
  0x81   : > { %892 = vmatpush1.bf16.msra.mxu0 %v2069_v60  ;;  %1951 = vmatpush1.bf16.msra.mxu1 %v2069_v60  ;;  %v582_v60 = vld [vmem:[#allocation2 + $0xa8] sm:$0xff] }
  0x82   : > { %893 = vmatprep.subr.bf16.mxu0 %v2070_v61  ;;  %1936 = vmatprep.subr.bf16.mxu1 %v2070_v61 }
  0x85   : > { %894 = vmatpush1.bf16.msra.mxu0 %v2072_v63  ;;  %1952 = vmatpush1.bf16.msra.mxu1 %v2072_v63  ;;  %v567_v63 = vld [vmem:[#allocation2 + $0x30] sm:$0xff] }
  0x86   : > { %895 = vmatprep.subr.bf16.mxu0 %v2073_v1  ;;  %1937 = vmatprep.subr.bf16.mxu1 %v2073_v1 }
  0x89   : > { %896 = vmatpush1.bf16.msra.mxu0 %v2075_v2  ;;  %1953 = vmatpush1.bf16.msra.mxu1 %v2075_v2 }
  0x8a   : > { %897 = vmatprep.subr.bf16.mxu0 %v2076_v3  ;;  %1938 = vmatprep.subr.bf16.mxu1 %v2076_v3 }
  0x8d   : > { %898 = vmatpush1.bf16.msra.mxu0 %v2078_v4  ;;  %1954 = vmatpush1.bf16.msra.mxu1 %v2078_v4 }
  0x8e   : > { %899 = vmatprep.subr.bf16.mxu0 %v2079_v5  ;;  %1939 = vmatprep.subr.bf16.mxu1 %v2079_v5  ;;  %v568_v5 = vld [vmem:[#allocation2 + $0x38] sm:$0xff] }
  0x91   : > { %900 = vmatpush1.bf16.msra.mxu0 %v2081_v6  ;;  %1955 = vmatpush1.bf16.msra.mxu1 %v2081_v6  ;;  %v584_v6 = vld [vmem:[#allocation2 + $0xb8] sm:$0xff] }
  0x92   : > { %901 = vmatprep.subr.bf16.mxu0 %v2082_v7  ;;  %1940 = vmatprep.subr.bf16.mxu1 %v2082_v7 }
  0x95   : > { %902 = vmatpush1.bf16.msra.mxu0 %v2084_v8  ;;  %1956 = vmatpush1.bf16.msra.mxu1 %v2084_v8 }
  0x96   : > { %903 = vmatprep.subr.bf16.mxu0 %v2085_v9  ;;  %1941 = vmatprep.subr.bf16.mxu1 %v2085_v9 }
  0x99   : > { %904 = vmatpush1.bf16.msra.mxu0 %v2087_v10  ;;  %1957 = vmatpush1.bf16.msra.mxu1 %v2087_v10 }
  0x9a   : > { %905 = vmatprep.subr.bf16.mxu0 %v2088_v11  ;;  %1942 = vmatprep.subr.bf16.mxu1 %v2088_v11 }
  0x9d   : > { %906 = vmatpush1.bf16.msra.mxu0 %v2090_v12  ;;  %1958 = vmatpush1.bf16.msra.mxu1 %v2090_v12 }
  0x9e   : > { %907 = vmatprep.subr.bf16.mxu0 %v2091_v13  ;;  %1943 = vmatprep.subr.bf16.mxu1 %v2091_v13 }
  0xa1   : > { %908 = vmatpush1.bf16.msra.mxu0 %v2093_v14  ;;  %1959 = vmatpush1.bf16.msra.mxu1 %v2093_v14 }
  0xa2   : > { %909 = vmatprep.subr.bf16.mxu0 %v2094_v15  ;;  %1944 = vmatprep.subr.bf16.mxu1 %v2094_v15 }
  0xa5   : > { %910 = vmatpush1.bf16.msra.mxu0 %v2096_v16  ;;  %1960 = vmatpush1.bf16.msra.mxu1 %v2096_v16 }
  0xa6   : > { %911 = vmatprep.subr.bf16.mxu0 %v2097_v17  ;;  %1945 = vmatprep.subr.bf16.mxu1 %v2097_v17  ;;  %v569_v17 = vld [vmem:[#allocation2 + $0x40] sm:$0xff] }
  0xa9   : > { %912 = vmatpush1.bf16.msra.mxu0 %v2099_v18  ;;  %1961 = vmatpush1.bf16.msra.mxu1 %v2099_v18  ;;  %v585_v18 = vld [vmem:[#allocation2 + $0xc0] sm:$0xff] }
  0xac   : > { %914 = vmatmul.mubr.bf16.vlgmr.msra.gmra.mrb[0].mxu0 %v2100_v19  ;;  %954 = vmatmul.mubr.bf16.vlgmr.msra.gmra.mrb[0].mxu1 %v2103_v20  ;;  %v570_v19 = vld [vmem:[#allocation2 + $0x48] sm:$0xff] }
  0xad   : > { %923 = vmatprep.mubr.bf16.mxu0 %v2106_v21  ;;  %963 = vmatprep.mubr.bf16.mxu1 %v2108_v22  ;;  %v586_v20 = vld [vmem:[#allocation2 + $0xc8] sm:$0xff] }
  0xb4   : > { %924 = vmatmul.mubr.bf16.gmra.mrb[4].mxu0 %v2110_v23  ;;  %964 = vmatmul.mubr.bf16.gmra.mrb[4].mxu1 %v2111_v24  ;;  %v571_v23 = vld [vmem:[#allocation2 + $0x50] sm:$0xff] }
  0xb5   : > { %933 = vmatprep.mubr.bf16.mxu0 %v2112_v25  ;;  %973 = vmatprep.mubr.bf16.mxu1 %v2114_v26  ;;  %v587_v24 = vld [vmem:[#allocation2 + $0xd0] sm:$0xff] }
  0xbc   : > { %934 = vmatmul.mubr.bf16.gmra.mrb[8].mxu0 %v2116_v27  ;;  %974 = vmatmul.mubr.bf16.gmra.mrb[8].mxu1 %v2117_v28 }
  0xbd   : > { %943 = vmatprep.mubr.bf16.mxu0 %v2118_v29  ;;  %983 = vmatprep.mubr.bf16.mxu1 %v2120_v30  ;;  %v572_v29 = vld [vmem:[#allocation2 + $0x58] sm:$0xff] }
  0xbe   : > { %v588_v30 = vld [vmem:[#allocation2 + $0xd8] sm:$0xff] }
  0xc4   : > { %944 = vmatmul.mubr.bf16.gmra.mrb[12].mxu0 %v2122_v31  ;;  %984 = vmatmul.mubr.bf16.gmra.mrb[12].mxu1 %v2123_v32 }
 0x17f   : > { %v915_v37 = vpop.f32.mrb[0].mxu0  ;;  %v955_v38 = vpop.f32.mrb[0].mxu1 }
 0x180   : > { %v994_v41 = vadd.f32 %v915_v37, %v561_v33  ;;  %v1010_v42 = vadd.f32 %v955_v38, %v577_v34  ;;  %v917_v43 = vpop.f32.mrb[1].mxu0  ;;  %v957_v44 = vpop.f32.mrb[1].mxu1 }
 0x181   : > { %v995_v47 = vadd.f32 %v917_v43, %v562_v35  ;;  %v1011_v48 = vadd.f32 %v957_v44, %v578_v36  ;;  %v919_v49 = vpop.f32.mrb[2].mxu0  ;;  %v959_v50 = vpop.f32.mrb[2].mxu1  ;;  %v574_v43 = vld [vmem:[#allocation2 + $0x68] sm:$0xff] }
 0x182   : > { %1026 = vst [vmem:[#allocation2] sm:$0xff] %v994_v41  ;;  %1042 = vst [vmem:[#allocation2 + $0x80] sm:$0xff] %v1010_v42  ;;  %v996_v51 = vadd.f32 %v919_v49, %v563_v39  ;;  %v1012_v52 = vadd.f32 %v959_v50, %v579_v40  ;;  %v921_v53 = vpop.f32.mrb[3].mxu0  ;;  %v961_v54 = vpop.f32.mrb[3].mxu1  ;;  %v573_v41 = vld [vmem:[#allocation2 + $0x60] sm:$0xff]  ;;  %v590_v44 = vld [vmem:[#allocation2 + $0xe8] sm:$0xff] }
 0x183   : > { %1027 = vst [vmem:[#allocation2 + $0x8] sm:$0xff] %v995_v47  ;;  %1043 = vst [vmem:[#allocation2 + $0x88] sm:$0xff] %v1011_v48  ;;  %v997_v55 = vadd.f32 %v921_v53, %v564_v45  ;;  %v1013_v56 = vadd.f32 %v961_v54, %v580_v46  ;;  %v589_v42 = vld [vmem:[#allocation2 + $0xe0] sm:$0xff]  ;;  %v575_v47 = vld [vmem:[#allocation2 + $0x70] sm:$0xff] }
 0x184   : > { %1028 = vst [vmem:[#allocation2 + $0x10] sm:$0xff] %v996_v51  ;;  %1044 = vst [vmem:[#allocation2 + $0x90] sm:$0xff] %v1012_v52  ;;  %v591_v48 = vld [vmem:[#allocation2 + $0xf0] sm:$0xff]  ;;  %v576_v53 = vld [vmem:[#allocation2 + $0x78] sm:$0xff] }
 0x185   : > { %1029 = vst [vmem:[#allocation2 + $0x18] sm:$0xff] %v997_v55  ;;  %1045 = vst [vmem:[#allocation2 + $0x98] sm:$0xff] %v1013_v56  ;;  %v592_v54 = vld [vmem:[#allocation2 + $0xf8] sm:$0xff] }
 0x187   : > { %v925_v61 = vpop.f32.mrb[4].mxu0  ;;  %v965_v62 = vpop.f32.mrb[4].mxu1 }
 0x188   : > { %v998_v1 = vadd.f32 %v925_v61, %v565_v57  ;;  %v1014_v2 = vadd.f32 %v965_v62, %v581_v58  ;;  %v927_v3 = vpop.f32.mrb[5].mxu0  ;;  %v967_v4 = vpop.f32.mrb[5].mxu1 }
 0x189   : > { %v999_v7 = vadd.f32 %v927_v3, %v566_v59  ;;  %v1015_v8 = vadd.f32 %v967_v4, %v582_v60  ;;  %v929_v9 = vpop.f32.mrb[6].mxu0  ;;  %v969_v10 = vpop.f32.mrb[6].mxu1 }
 0x18a   : > { %1030 = vst [vmem:[#allocation2 + $0x20] sm:$0xff] %v998_v1  ;;  %1046 = vst [vmem:[#allocation2 + $0xa0] sm:$0xff] %v1014_v2  ;;  %v1000_v11 = vadd.f32 %v929_v9, %v567_v63  ;;  %v1016_v12 = vadd.f32 %v969_v10, %v583_v0  ;;  %v931_v13 = vpop.f32.mrb[7].mxu0  ;;  %v971_v14 = vpop.f32.mrb[7].mxu1 }
 0x18b   : > { %1031 = vst [vmem:[#allocation2 + $0x28] sm:$0xff] %v999_v7  ;;  %1047 = vst [vmem:[#allocation2 + $0xa8] sm:$0xff] %v1015_v8  ;;  %v1001_v15 = vadd.f32 %v931_v13, %v568_v5  ;;  %v1017_v16 = vadd.f32 %v971_v14, %v584_v6 }
 0x18c   : > { %1032 = vst [vmem:[#allocation2 + $0x30] sm:$0xff] %v1000_v11  ;;  %1048 = vst [vmem:[#allocation2 + $0xb0] sm:$0xff] %v1016_v12 }
 0x18d   : > { %1033 = vst [vmem:[#allocation2 + $0x38] sm:$0xff] %v1001_v15  ;;  %1049 = vst [vmem:[#allocation2 + $0xb8] sm:$0xff] %v1017_v16 }
 0x18f   : > { %v935_v21 = vpop.f32.mrb[8].mxu0  ;;  %v975_v22 = vpop.f32.mrb[8].mxu1 }
 0x190   : > { %v1002_v25 = vadd.f32 %v935_v21, %v569_v17  ;;  %v1018_v26 = vadd.f32 %v975_v22, %v585_v18  ;;  %v937_v27 = vpop.f32.mrb[9].mxu0  ;;  %v977_v28 = vpop.f32.mrb[9].mxu1 }
 0x191   : > { %v1003_v31 = vadd.f32 %v937_v27, %v570_v19  ;;  %v1019_v32 = vadd.f32 %v977_v28, %v586_v20  ;;  %v939_v33 = vpop.f32.mrb[10].mxu0  ;;  %v979_v34 = vpop.f32.mrb[10].mxu1 }
 0x192   : > { %1034 = vst [vmem:[#allocation2 + $0x40] sm:$0xff] %v1002_v25  ;;  %1050 = vst [vmem:[#allocation2 + $0xc0] sm:$0xff] %v1018_v26  ;;  %v1004_v35 = vadd.f32 %v939_v33, %v571_v23  ;;  %v1020_v36 = vadd.f32 %v979_v34, %v587_v24  ;;  %v941_v37 = vpop.f32.mrb[11].mxu0  ;;  %v981_v38 = vpop.f32.mrb[11].mxu1 }
 0x193   : > { %1035 = vst [vmem:[#allocation2 + $0x48] sm:$0xff] %v1003_v31  ;;  %1051 = vst [vmem:[#allocation2 + $0xc8] sm:$0xff] %v1019_v32  ;;  %v1005_v39 = vadd.f32 %v941_v37, %v572_v29  ;;  %v1021_v40 = vadd.f32 %v981_v38, %v588_v30 }
 0x194   : > { %1036 = vst [vmem:[#allocation2 + $0x50] sm:$0xff] %v1004_v35  ;;  %1052 = vst [vmem:[#allocation2 + $0xd0] sm:$0xff] %v1020_v36 }
 0x195   : > { %1037 = vst [vmem:[#allocation2 + $0x58] sm:$0xff] %v1005_v39  ;;  %1053 = vst [vmem:[#allocation2 + $0xd8] sm:$0xff] %v1021_v40 }
 0x197   : > { %v945_v45 = vpop.f32.mrb[12].mxu0  ;;  %v985_v46 = vpop.f32.mrb[12].mxu1  ;;  %1061 = sbr.rel (%p1889_p5) target bundleno = 549 (0x225), region = 120 }
 0x198   : > { %v1006_v49 = vadd.f32 %v945_v45, %v573_v41  ;;  %v1022_v50 = vadd.f32 %v985_v46, %v589_v42  ;;  %v947_v51 = vpop.f32.mrb[13].mxu0  ;;  %v987_v52 = vpop.f32.mrb[13].mxu1 }
 0x199   : > { %v1007_v55 = vadd.f32 %v947_v51, %v574_v43  ;;  %v1023_v56 = vadd.f32 %v987_v52, %v590_v44  ;;  %v949_v57 = vpop.f32.mrb[14].mxu0  ;;  %v989_v58 = vpop.f32.mrb[14].mxu1 }
 0x19a   : > { %1038 = vst [vmem:[#allocation2 + $0x60] sm:$0xff] %v1006_v49  ;;  %1054 = vst [vmem:[#allocation2 + $0xe0] sm:$0xff] %v1022_v50  ;;  %v1008_v59 = vadd.f32 %v949_v57, %v575_v47  ;;  %v1024_v60 = vadd.f32 %v989_v58, %v591_v48  ;;  %v951_v61 = vpop.f32.mrb[15].mxu0  ;;  %v991_v62 = vpop.f32.mrb[15].mxu1 }
 0x19b   : > { %1039 = vst [vmem:[#allocation2 + $0x68] sm:$0xff] %v1007_v55  ;;  %1055 = vst [vmem:[#allocation2 + $0xe8] sm:$0xff] %v1023_v56  ;;  %v1009_v63 = vadd.f32 %v951_v61, %v576_v53  ;;  %v1025_v0 = vadd.f32 %v991_v62, %v592_v54 }
 0x19c   : > { %1040 = vst [vmem:[#allocation2 + $0x70] sm:$0xff] %v1008_v59  ;;  %1056 = vst [vmem:[#allocation2 + $0xf0] sm:$0xff] %v1024_v60 }
 0x19d   : > { %1041 = vst [vmem:[#allocation2 + $0x78] sm:$0xff] %v1009_v63  ;;  %1057 = vst [vmem:[#allocation2 + $0xf8] sm:$0xff] %v1025_v0 }
 0x19e   : > { %v2519_v1 = vld [vmem:[#allocation2] sm:$0xff]  ;;  %v2521_v2 = vld [vmem:[#allocation2 + $0x8] sm:$0xff]  ;;  %v2523_v3 = vld [vmem:[#allocation2 + $0x10] sm:$0xff] }
 0x19f   : > { %v2525_v4 = vld [vmem:[#allocation2 + $0x18] sm:$0xff]  ;;  %v2527_v5 = vld [vmem:[#allocation2 + $0x20] sm:$0xff]  ;;  %v2529_v6 = vld [vmem:[#allocation2 + $0x28] sm:$0xff]  ;;  %v1096_v7 = vadd.f32 %v2523_v3, %v2519_v1 }
 0x1a0   : > { %v1109_v8 = vadd.f32 %v2525_v4, %v2521_v2  ;;  %v2535_v9 = vld [vmem:[#allocation2 + $0x30] sm:$0xff]  ;;  %v2537_v10 = vld [vmem:[#allocation2 + $0x38] sm:$0xff]  ;;  %v2539_v11 = vld [vmem:[#allocation2 + $0x40] sm:$0xff] }
 0x1a1   : > { %v1097_v12 = vadd.f32 %v1096_v7, %v2527_v5  ;;  %v2543_v14 = vld [vmem:[#allocation2 + $0x48] sm:$0xff]  ;;  %v2545_v15 = vld [vmem:[#allocation2 + $0x50] sm:$0xff]  ;;  %v2547_v16 = vld [vmem:[#allocation2 + $0x58] sm:$0xff] }
 0x1a2   : > { %v1110_v13 = vadd.f32 %v1109_v8, %v2529_v6  ;;  %v2551_v19 = vld [vmem:[#allocation2 + $0x80] sm:$0xff]  ;;  %v2553_v20 = vld [vmem:[#allocation2 + $0x88] sm:$0xff]  ;;  %v2555_v21 = vld [vmem:[#allocation2 + $0x90] sm:$0xff] }
 0x1a3   : > { %v1098_v17 = vadd.f32 %v1097_v12, %v2535_v9  ;;  %v2557_v22 = vld [vmem:[#allocation2 + $0x98] sm:$0xff]  ;;  %v2559_v23 = vld [vmem:[#allocation2 + $0xa0] sm:$0xff]  ;;  %v2561_v24 = vld [vmem:[#allocation2 + $0xa8] sm:$0xff]  ;;  %v1355_v25 = vadd.f32 %v2555_v21, %v2551_v19 }
 0x1a4   : > { %v1111_v18 = vadd.f32 %v1110_v13, %v2537_v10  ;;  %v2567_v28 = vld [vmem:[#allocation2 + $0xb0] sm:$0xff]  ;;  %v1368_v29 = vadd.f32 %v2557_v22, %v2553_v20  ;;  %v2571_v30 = vld [vmem:[#allocation2 + $0x60] sm:$0xff]  ;;  %v2573_v31 = vld [vmem:[#allocation2 + $0x68] sm:$0xff] }
 0x1a5   : > { %v1099_v26 = vadd.f32 %v1098_v17, %v2539_v11  ;;  %v2575_v32 = vld [vmem:[#allocation2 + $0xb8] sm:$0xff]  ;;  %v1356_v33 = vadd.f32 %v1355_v25, %v2559_v23  ;;  %v2580_v36 = vld [vmem:[#allocation2 + $0xc0] sm:$0xff]  ;;  %v2583_v38 = vld [vmem:[#allocation2 + $0x70] sm:$0xff] }
 0x1a6   : > { %v1112_v27 = vadd.f32 %v1111_v18, %v2543_v14  ;;  %2854 = vst [vmem:[#allocation8_spill] sm:$0xff] %v2580_v36  ;;  %v1369_v37 = vadd.f32 %v1368_v29, %v2561_v24  ;;  %v2585_v39 = vld [vmem:[#allocation2 + $0x78] sm:$0xff]  ;;  %v2587_v40 = vld [vmem:[#allocation2 + $0xc8] sm:$0xff]  ;;  %v2592_v44 = vld [vmem:[#allocation2 + $0xd0] sm:$0xff] }
 0x1a7   : > { %v1100_v34 = vadd.f32 %v1099_v26, %v2545_v15  ;;  %2855 = vst [vmem:[#allocation9_spill] sm:$0xff] %v2587_v40  ;;  %v1357_v41 = vadd.f32 %v1356_v33, %v2567_v28  ;;  %2856 = vst [vmem:[#allocation10_spill] sm:$0xff] %v2592_v44  ;;  %v2595_v46 = vld [vmem:[#allocation2 + $0xd8] sm:$0xff]  ;;  %v2600_v50 = vld [vmem:[#allocation2 + $0xe0] sm:$0xff] }
 0x1a8   : > { %v1113_v35 = vadd.f32 %v1112_v27, %v2547_v16  ;;  %v1370_v45 = vadd.f32 %v1369_v37, %v2575_v32  ;;  %2857 = vst [vmem:[#allocation11_spill] sm:$0xff] %v2595_v46  ;;  %2858 = vst [vmem:[#allocation12_spill] sm:$0xff] %v2600_v50  ;;  %v2603_v52 = vld [vmem:[#allocation2 + $0xe8] sm:$0xff]  ;;  %v2606_v56 = vld [vmem:[#allocation2 + $0xf0] sm:$0xff] }
 0x1a9   : > { %v1101_v42 = vadd.f32 %v1100_v34, %v2571_v30  ;;  %v1358_v47 = vadd.f32 %v1357_v41, %v2580_v36  ;;  %2859 = vst [vmem:[#allocation13_spill] sm:$0xff] %v2603_v52  ;;  %2860 = vst [vmem:[#allocation14_spill] sm:$0xff] %v2606_v56  ;;  %v2609_v58 = vld [vmem:[#allocation2 + $0xf8] sm:$0xff] }
 0x1aa   : > { %v1114_v43 = vadd.f32 %v1113_v35, %v2573_v31  ;;  %v1371_v51 = vadd.f32 %v1370_v45, %v2587_v40  ;;  %2861 = vst [vmem:[#allocation15_spill] sm:$0xff] %v2609_v58 }
 0x1ab   : > { %v1102_v48 = vadd.f32 %v1101_v42, %v2583_v38  ;;  %v1359_v53 = vadd.f32 %v1358_v47, %v2592_v44 }
 0x1ac   : > { %v1115_v49 = vadd.f32 %v1114_v43, %v2585_v39  ;;  %v1372_v57 = vadd.f32 %v1371_v51, %v2595_v46 }
 0x1ad   : > { %v1103_v54 = vrot.slane %v1102_v48, 4  ;;  %v1360_v59 = vadd.f32 %v1359_v53, %v2600_v50 }
 0x1ae   : > { %v1116_v55 = vrot.slane %v1115_v49, 4  ;;  %v1373_v62 = vadd.f32 %v1372_v57, %v2603_v52 }
 0x1af   : > { %v1104_v60 = vadd.f32 %v1103_v54, %v1102_v48  ;;  %v1361_v63 = vadd.f32 %v1360_v59, %v2606_v56 }
 0x1b0   : > { %v1117_v61 = vadd.f32 %v1116_v55, %v1115_v49  ;;  %v1374_v8 = vadd.f32 %v1373_v62, %v2609_v58 }
 0x1b1   : > { %v1105_v0 = vrot.slane %v1104_v60, 2  ;;  %v1362_v12 = vrot.slane %v1361_v63, 4 }
 0x1b2   : > { %v1118_v7 = vrot.slane %v1117_v61, 2  ;;  %v1375_v18 = vrot.slane %v1374_v8, 4 }
 0x1b3   : > { %v1106_v13 = vadd.f32 %v1105_v0, %v1104_v60  ;;  %v1363_v25 = vadd.f32 %v1362_v12, %v1361_v63 }
 0x1b4   : > { %v1119_v17 = vadd.f32 %v1118_v7, %v1117_v61  ;;  %v1376_v33 = vadd.f32 %v1375_v18, %v1374_v8 }
 0x1b5   : > { %v1107_v26 = vrot.slane %v1106_v13, 1  ;;  %v1364_v29 = vrot.slane %v1363_v25, 2 }
 0x1b6   : > { %v1120_v27 = vrot.slane %v1119_v17, 1  ;;  %v1377_v43 = vrot.slane %v1376_v33, 2 }
 0x1b7   : > { %v1108_v34 = vadd.f32 %v1107_v26, %v1106_v13  ;;  %v1365_v42 = vadd.f32 %v1364_v29, %v1363_v25 }
 0x1b8   : > { %v1121_v35 = vadd.f32 %v1120_v27, %v1119_v17  ;;  %v1378_v59 = vadd.f32 %v1377_v43, %v1376_v33 }
 0x1b9   : > { %v2615_v37 = vmul.f32 0.015625, %v1108_v34  ;;  %v1366_v57 = vrot.slane %v1365_v42, 1 }
 0x1ba   : > { %v2617_v41 = vmul.f32 0.015625, %v1121_v35  ;;  %v1379_v33 = vrot.slane %v1378_v59, 1 }
 0x1bb   : > { %v1125_v45 = vsub.f32 %v2519_v1, %v2615_v37  ;;  %v1127_v48 = vsub.f32 %v2523_v3, %v2615_v37  ;;  %v1129_v51 = vsub.f32 %v2527_v5, %v2615_v37  ;;  %v1131_v54 = vsub.f32 %v2535_v9, %v2615_v37 }
 0x1bc   : > { %v1126_v47 = vsub.f32 %v2521_v2, %v2617_v41  ;;  %v1128_v49 = vsub.f32 %v2525_v4, %v2617_v41  ;;  %v1130_v53 = vsub.f32 %v2529_v6, %v2617_v41  ;;  %v1132_v55 = vsub.f32 %v2537_v10, %v2617_v41 }
 0x1bd   : > { %v1141_v60 = vmul.f32 %v1125_v45, %v1125_v45  ;;  %v1143_v62 = vmul.f32 %v1127_v48, %v1127_v48  ;;  %v1133_v0 = vsub.f32 %v2539_v11, %v2615_v37  ;;  %v1134_v7 = vsub.f32 %v2543_v14, %v2617_v41 }
 0x1be   : > { %v1142_v61 = vmul.f32 %v1126_v47, %v1126_v47  ;;  %v1144_v63 = vmul.f32 %v1128_v49, %v1128_v49  ;;  %v1145_v8 = vmul.f32 %v1129_v51, %v1129_v51  ;;  %v1146_v12 = vmul.f32 %v1130_v53, %v1130_v53 }
 0x1bf   : > { %v1135_v13 = vsub.f32 %v2545_v15, %v2615_v37  ;;  %v1136_v17 = vsub.f32 %v2547_v16, %v2617_v41  ;;  %v1147_v18 = vmul.f32 %v1131_v54, %v1131_v54  ;;  %v1148_v25 = vmul.f32 %v1132_v55, %v1132_v55 }
 0x1c0   : > { %v1157_v26 = vadd.f32 %v1143_v62, %v1141_v60  ;;  %v1170_v27 = vadd.f32 %v1144_v63, %v1142_v61  ;;  %v1367_v29 = vadd.f32 %v1366_v57, %v1365_v42  ;;  %v1137_v34 = vsub.f32 %v2571_v30, %v2615_v37 }
 0x1c1   : > { %v1138_v35 = vsub.f32 %v2573_v31, %v2617_v41  ;;  %v1149_v43 = vmul.f32 %v1133_v0, %v1133_v0  ;;  %v1150_v45 = vmul.f32 %v1134_v7, %v1134_v7  ;;  %v1380_v49 = vadd.f32 %v1379_v33, %v1378_v59 }
 0x1c2   : > { %v1158_v47 = vadd.f32 %v1157_v26, %v1145_v8  ;;  %v1171_v48 = vadd.f32 %v1170_v27, %v1146_v12  ;;  %v1139_v51 = vsub.f32 %v2583_v38, %v2615_v37  ;;  %v1140_v53 = vsub.f32 %v2585_v39, %v2617_v41 }
 0x1c3   : > { %v1151_v54 = vmul.f32 %v1135_v13, %v1135_v13  ;;  %v2651_v42 = vmul.f32 0.015625, %v1367_v29  ;;  %v1152_v55 = vmul.f32 %v1136_v17, %v1136_v17  ;;  %v2653_v61 = vmul.f32 0.015625, %v1380_v49 }
 0x1c4   : > { %v1159_v57 = vadd.f32 %v1158_v47, %v1147_v18  ;;  %v1172_v60 = vadd.f32 %v1171_v48, %v1148_v25  ;;  %v1153_v62 = vmul.f32 %v1137_v34, %v1137_v34  ;;  %v1154_v63 = vmul.f32 %v1138_v35, %v1138_v35 }
 0x1c5   : > { %v1383_v59 = vsub.f32 %v2551_v19, %v2651_v42  ;;  %v1384_v8 = vsub.f32 %v2553_v20, %v2653_v61  ;;  %v1385_v12 = vsub.f32 %v2555_v21, %v2651_v42  ;;  %v1386_v13 = vsub.f32 %v2557_v22, %v2653_v61 }
 0x1c6   : > { %v1160_v0 = vadd.f32 %v1159_v57, %v1149_v43  ;;  %v1173_v7 = vadd.f32 %v1172_v60, %v1150_v45  ;;  %v1155_v17 = vmul.f32 %v1139_v51, %v1139_v51  ;;  %v1156_v18 = vmul.f32 %v1140_v53, %v1140_v53 }
 0x1c7   : > { %v1387_v27 = vsub.f32 %v2559_v23, %v2651_v42  ;;  %v1388_v29 = vsub.f32 %v2561_v24, %v2653_v61  ;;  %v1389_v35 = vsub.f32 %v2567_v28, %v2651_v42  ;;  %v1390_v43 = vsub.f32 %v2575_v32, %v2653_v61 }
 0x1c8   : > { %v1161_v25 = vadd.f32 %v1160_v0, %v1151_v54  ;;  %v1174_v26 = vadd.f32 %v1173_v7, %v1152_v55  ;;  %v1399_v45 = vmul.f32 %v1383_v59, %v1383_v59  ;;  %v1400_v47 = vmul.f32 %v1384_v8, %v1384_v8 }
 0x1c9   : > { %v1401_v48 = vmul.f32 %v1385_v12, %v1385_v12  ;;  %v1402_v49 = vmul.f32 %v1386_v13, %v1386_v13  ;;  %v1391_v54 = vsub.f32 %v2580_v36, %v2651_v42  ;;  %v1392_v55 = vsub.f32 %v2587_v40, %v2653_v61 }
 0x1ca   : > { %v1162_v33 = vadd.f32 %v1161_v25, %v1153_v62  ;;  %v1175_v34 = vadd.f32 %v1174_v26, %v1154_v63  ;;  %v1403_v57 = vmul.f32 %v1387_v27, %v1387_v27  ;;  %v1404_v60 = vmul.f32 %v1388_v29, %v1388_v29 }
 0x1cb   : > { %v1393_v0 = vsub.f32 %v2592_v44, %v2651_v42  ;;  %v1394_v7 = vsub.f32 %v2595_v46, %v2653_v61  ;;  %v1405_v59 = vmul.f32 %v1389_v35, %v1389_v35  ;;  %v1406_v8 = vmul.f32 %v1390_v43, %v1390_v43 }
 0x1cc   : > { %v1163_v51 = vadd.f32 %v1162_v33, %v1155_v17  ;;  %v1176_v53 = vadd.f32 %v1175_v34, %v1156_v18  ;;  %v1415_v12 = vadd.f32 %v1401_v48, %v1399_v45  ;;  %v1428_v13 = vadd.f32 %v1402_v49, %v1400_v47 }
 0x1cd   : > { %v1395_v25 = vsub.f32 %v2600_v50, %v2651_v42  ;;  %v1396_v26 = vsub.f32 %v2603_v52, %v2653_v61  ;;  %v1407_v27 = vmul.f32 %v1391_v54, %v1391_v54  ;;  %v1408_v29 = vmul.f32 %v1392_v55, %v1392_v55 }
 0x1ce   : > { %v1164_v62 = vrot.slane %v1163_v51, 4  ;;  %v1177_v63 = vrot.slane %v1176_v53, 4  ;;  %v1416_v33 = vadd.f32 %v1415_v12, %v1403_v57  ;;  %v1429_v34 = vadd.f32 %v1428_v13, %v1404_v60 }
 0x1cf   : > { %v1397_v35 = vsub.f32 %v2606_v56, %v2651_v42  ;;  %v1398_v43 = vsub.f32 %v2609_v58, %v2653_v61  ;;  %v1409_v45 = vmul.f32 %v1393_v0, %v1393_v0  ;;  %v1410_v47 = vmul.f32 %v1394_v7, %v1394_v7 }
 0x1d0   : > { %v1165_v17 = vadd.f32 %v1164_v62, %v1163_v51  ;;  %v1178_v18 = vadd.f32 %v1177_v63, %v1176_v53  ;;  %v1417_v48 = vadd.f32 %v1416_v33, %v1405_v59  ;;  %v1430_v49 = vadd.f32 %v1429_v34, %v1406_v8 }
 0x1d1   : > { %v1411_v62 = vmul.f32 %v1395_v25, %v1395_v25  ;;  %v1412_v63 = vmul.f32 %v1396_v26, %v1396_v26  ;;  %v1413_v12 = vmul.f32 %v1397_v35, %v1397_v35  ;;  %v1414_v13 = vmul.f32 %v1398_v43, %v1398_v43 }
 0x1d2   : > { %v1166_v44 = vrot.slane %v1165_v17, 2  ;;  %v1179_v40 = vrot.slane %v1178_v18, 2  ;;  %v1418_v54 = vadd.f32 %v1417_v48, %v1407_v27  ;;  %v1431_v55 = vadd.f32 %v1430_v49, %v1408_v29 }
 0x1d3   : > { %v2221_v27 = vmov 1966171168   ;;  %v1195_v33 = vlaneseq }
 0x1d4   : > { %v1167_v51 = vadd.f32 %v1166_v44, %v1165_v17  ;;  %v1180_v53 = vadd.f32 %v1179_v40, %v1178_v18  ;;  %v1419_v52 = vadd.f32 %v1418_v54, %v1409_v45  ;;  %v1432_v50 = vadd.f32 %v1431_v55, %v1410_v47 }
 0x1d5   : > { %v1193_v29 = vunpack.c.l.s4 %v2221_v27 }
 0x1d6   : > { %v1168_v57 = vrot.slane %v1167_v51, 1  ;;  %v1181_v60 = vrot.slane %v1180_v53, 1  ;;  %v1420_v36 = vadd.f32 %v1419_v52, %v1411_v62  ;;  %v1433_v58 = vadd.f32 %v1432_v50, %v1412_v63 }
 0x1d7   : > { %v1194_v50 = vunpack.c.0.s8 %v1193_v29 }
 0x1d8   : > { %v1169_v56 = vadd.f32 %v1168_v57, %v1167_v51  ;;  %v1182_v46 = vadd.f32 %v1181_v60, %v1180_v53  ;;  %v1421_v59 = vadd.f32 %v1420_v36, %v1413_v12  ;;  %v1434_v8 = vadd.f32 %v1433_v58, %v1414_v13  ;;  %v1062_v57 = vld [vmem:[%s517_s6] sm:$0x3] }
 0x1da   : > { %v1183_v0 = vmul.f32 0.015625, %v1169_v56  ;;  %v1184_v7 = vmul.f32 0.015625, %v1182_v46  ;;  %v1422_v17 = vrot.slane %v1421_v59, 4  ;;  %v1435_v18 = vrot.slane %v1434_v8, 4 }
 0x1db   : > { %v1196_v46 = vshrl.u32 %v1195_v33, 7 }
 0x1dc   : > { %v1185_v44 = vadd.f32 1e-05, %v1183_v0  ;;  %v1186_v40 = vadd.f32 1e-05, %v1184_v7  ;;  %v1423_v25 = vadd.f32 %v1422_v17, %v1421_v59  ;;  %v1436_v26 = vadd.f32 %v1435_v18, %v1434_v8 }
 0x1dd   : > { %v2687_v48 = vsub.s32 %v1194_v50, %v1196_v46  ;;  %v2696_v12 = vsub.s32 0, %v1196_v46  ;;  %v2698_v13 = vsub.s32 1, %v1196_v46 }
 0x1de   : > { %2124 = vrsqrt.f32 %v1185_v44  ;;  %v1424_v34 = vrot.slane %v1423_v25, 2  ;;  %v1437_v35 = vrot.slane %v1436_v26, 2 }
 0x1df   : > { %2126 = vrsqrt.f32 %v1186_v40 }
 0x1e0   : > { %v1425_v43 = vadd.f32 %v1424_v34, %v1423_v25  ;;  %v1438_v52 = vadd.f32 %v1437_v35, %v1436_v26  ;;  %v2710_v26 = vld [vmem:[%s522_s1] sm:$0x3] }
 0x1e2   : > { %v1426_v36 = vrot.slane %v1425_v43, 1  ;;  %v1439_v56 = vrot.slane %v1438_v52, 1 }
 0x1e4   : > { %v1427_v58 = vadd.f32 %v1426_v36, %v1425_v43  ;;  %v1440_v45 = vadd.f32 %v1439_v56, %v1438_v52 }
 0x1e6   : > { %v1441_v51 = vmul.f32 0.015625, %v1427_v58  ;;  %v1442_v53 = vmul.f32 0.015625, %v1440_v45 }
 0x1e8   : > { %v2125_v47 = vpop.eup %2124  ;;  %v1443_v63 = vadd.f32 1e-05, %v1441_v51  ;;  %v1444_v54 = vadd.f32 1e-05, %v1442_v53 }
 0x1e9   : > { %v2127_v49 = vpop.eup %2126 }
 0x1ea   : > { %v1191_v62 = vcombine.low %v2125_v47, %v2127_v49  ;;  %2128 = vrsqrt.f32 %v1443_v63 }
 0x1eb   : > { %2130 = vrsqrt.f32 %v1444_v54 }
 0x1ec   : > { %v1198_v55 = vrot.slane %v1191_v62, %v2687_v48 }
 0x1ee   : > { %v1205_v60 = vrot.slane %v1198_v55, %v2687_v48 }
 0x1f0   : > { %v1207_v0 = vmul.f32 %v1205_v60, %v1062_v57 }
 0x1f2   : > { %v1212_v7 = vrot.slane %v1207_v0, %v2696_v12  ;;  %v1216_v59 = vrot.slane %v1207_v0, %v2698_v13 }
 0x1f4   : > { %v1235_v8 = vmul.f32 %v1212_v7, %v2615_v37  ;;  %v1236_v44 = vmul.f32 %v1216_v59, %v2617_v41  ;;  %v2129_v17 = vpop.eup %2128  ;;  %v1219_v29 = vmul.f32 %v1212_v7, %v2519_v1  ;;  %v1220_v33 = vmul.f32 %v1216_v59, %v2521_v2 }
 0x1f5   : > { %v2131_v18 = vpop.eup %2130  ;;  %v1221_v41 = vmul.f32 %v1212_v7, %v2523_v3  ;;  %v1222_v34 = vmul.f32 %v1216_v59, %v2525_v4  ;;  %v1223_v35 = vmul.f32 %v1212_v7, %v2527_v5  ;;  %v1224_v50 = vmul.f32 %v1216_v59, %v2529_v6 }
 0x1f6   : > { %v1239_v40 = vcombine.low %v1235_v8, %v1236_v44  ;;  %v1449_v27 = vcombine.low %v2129_v17, %v2131_v18  ;;  %v1225_v46 = vmul.f32 %v1212_v7, %v2535_v9  ;;  %v1226_v1 = vmul.f32 %v1216_v59, %v2537_v10 }
 0x1f7   : > { %v1227_v2 = vmul.f32 %v1212_v7, %v2539_v11  ;;  %v1228_v36 = vmul.f32 %v1216_v59, %v2543_v14  ;;  %v1229_v3 = vmul.f32 %v1212_v7, %v2545_v15  ;;  %v1230_v58 = vmul.f32 %v1216_v59, %v2547_v16 }
 0x1f8   : > { %v1246_v25 = vrot.slane %v1239_v40, %v2687_v48  ;;  %v1456_v43 = vrot.slane %v1449_v27, %v2687_v48  ;;  %v1231_v6 = vmul.f32 %v1212_v7, %v2571_v30  ;;  %v1232_v9 = vmul.f32 %v1216_v59, %v2573_v31 }
 0x1f9   : > { %v1233_v10 = vmul.f32 %v1212_v7, %v2583_v38  ;;  %v1234_v11 = vmul.f32 %v1216_v59, %v2585_v39 }
 0x1fa   : > { %v1253_v37 = vrot.slane %v1246_v25, %v2687_v48  ;;  %v1463_v4 = vrot.slane %v1456_v43, %v2687_v48 }
 0x1fc   : > { %v1255_v52 = vsub.f32 %v2710_v26, %v1253_v37  ;;  %v1465_v45 = vmul.f32 %v1463_v4, %v1062_v57 }
 0x1fe   : > { %v1260_v5 = vrot.slane %v1255_v52, %v2696_v12  ;;  %v1264_v56 = vrot.slane %v1255_v52, %v2698_v13 }
 0x200   : > { %v1267_v14 = vadd.f32 %v1260_v5, %v1219_v29  ;;  %v1268_v47 = vadd.f32 %v1264_v56, %v1220_v33  ;;  %v1269_v15 = vadd.f32 %v1260_v5, %v1221_v41  ;;  %v1270_v49 = vadd.f32 %v1264_v56, %v1222_v34 }
 0x201   : > { %v1271_v51 = vadd.f32 %v1260_v5, %v1223_v35  ;;  %v1272_v53 = vadd.f32 %v1264_v56, %v1224_v50  ;;  %v1273_v62 = vadd.f32 %v1260_v5, %v1225_v46  ;;  %v1274_v63 = vadd.f32 %v1264_v56, %v1226_v1 }
 0x202   : > { %v1283_v54 = vmax.f32 %v1267_v14, 0.0  ;;  %v1284_v16 = vmax.f32 %v1268_v47, 0.0  ;;  %v1285_v30 = vmax.f32 %v1269_v15, 0.0  ;;  %v1286_v55 = vmax.f32 %v1270_v49, 0.0 }
 0x203   : > { %v1287_v31 = vmax.f32 %v1271_v51, 0.0  ;;  %v1288_v60 = vmax.f32 %v1272_v53, 0.0  ;;  %v1289_v38 = vmax.f32 %v1273_v62, 0.0  ;;  %v1290_v39 = vmax.f32 %v1274_v63, 0.0  ;;  %v2862_v51 = vld [vmem:[#allocation8_spill] sm:$0xff]  ;;  %v2863_v53 = vld [vmem:[#allocation9_spill] sm:$0xff] }
 0x204   : > { %v1913_v57 = vpack.c.bf16 %v1284_v16, %v1283_v54  ;;  %v1914_v0 = vpack.c.bf16 %v1286_v55, %v1285_v30  ;;  %v1275_v7 = vadd.f32 %v1260_v5, %v1227_v2  ;;  %v1276_v59 = vadd.f32 %v1264_v56, %v1228_v36  ;;  %v2864_v62 = vld [vmem:[#allocation10_spill] sm:$0xff]  ;;  %v2865_v63 = vld [vmem:[#allocation11_spill] sm:$0xff]  ;;  %v2866_v54 = vld [vmem:[#allocation12_spill] sm:$0xff] }
 0x205   : > { %v1915_v8 = vpack.c.bf16 %v1288_v60, %v1287_v31  ;;  %v1916_v44 = vpack.c.bf16 %v1290_v39, %v1289_v38  ;;  %v1277_v40 = vadd.f32 %v1260_v5, %v1229_v3  ;;  %v1278_v17 = vadd.f32 %v1264_v56, %v1230_v58  ;;  %v2867_v16 = vld [vmem:[#allocation13_spill] sm:$0xff]  ;;  %v2868_v30 = vld [vmem:[#allocation14_spill] sm:$0xff]  ;;  %v2869_v55 = vld [vmem:[#allocation15_spill] sm:$0xff] }
 0x206   : > { %1347 = vst [vmem:[%s2467_s15] sm:$0xff] %v1913_v57  ;;  %1348 = vst [vmem:[%s2467_s15 + $0x8] sm:$0xff] %v1914_v0  ;;  %v1291_v18 = vmax.f32 %v1275_v7, 0.0  ;;  %v1292_v25 = vmax.f32 %v1276_v59, 0.0  ;;  %v1279_v27 = vadd.f32 %v1260_v5, %v1231_v6  ;;  %v1280_v29 = vadd.f32 %v1264_v56, %v1232_v9 }
 0x207   : > { %1349 = vst [vmem:[%s2467_s15 + $0x10] sm:$0xff] %v1915_v8  ;;  %1350 = vst [vmem:[%s2467_s15 + $0x18] sm:$0xff] %v1916_v44  ;;  %v1293_v33 = vmax.f32 %v1277_v40, 0.0  ;;  %v1294_v37 = vmax.f32 %v1278_v17, 0.0  ;;  %v1281_v41 = vadd.f32 %v1260_v5, %v1233_v10  ;;  %v1282_v34 = vadd.f32 %v1264_v56, %v1234_v11 }
 0x208   : > { %v1917_v35 = vpack.c.bf16 %v1292_v25, %v1291_v18  ;;  %v1295_v43 = vmax.f32 %v1279_v27, 0.0  ;;  %v1296_v52 = vmax.f32 %v1280_v29, 0.0  ;;  %v1470_v50 = vrot.slane %v1465_v45, %v2696_v12 }
 0x209   : > { %v1918_v46 = vpack.c.bf16 %v1294_v37, %v1293_v33  ;;  %v1297_v1 = vmax.f32 %v1281_v41, 0.0  ;;  %v1298_v2 = vmax.f32 %v1282_v34, 0.0  ;;  %v1474_v36 = vrot.slane %v1465_v45, %v2698_v13 }
 0x20a   : > { %1351 = vst [vmem:[%s2467_s15 + $0x20] sm:$0xff] %v1917_v35  ;;  %v1919_v3 = vpack.c.bf16 %v1296_v52, %v1295_v43  ;;  %v1493_v4 = vmul.f32 %v1470_v50, %v2651_v42  ;;  %v1477_v10 = vmul.f32 %v1470_v50, %v2551_v19  ;;  %v1479_v45 = vmul.f32 %v1470_v50, %v2555_v21 }
 0x20b   : > { %1352 = vst [vmem:[%s2467_s15 + $0x28] sm:$0xff] %v1918_v46  ;;  %v1920_v58 = vpack.c.bf16 %v1298_v2, %v1297_v1  ;;  %v1494_v5 = vmul.f32 %v1474_v36, %v2653_v61  ;;  %v1478_v11 = vmul.f32 %v1474_v36, %v2553_v20  ;;  %v1480_v42 = vmul.f32 %v1474_v36, %v2557_v22 }
 0x20c   : > { %1353 = vst [vmem:[%s2467_s15 + $0x30] sm:$0xff] %v1919_v3  ;;  %v1481_v47 = vmul.f32 %v1470_v50, %v2559_v23  ;;  %v1482_v61 = vmul.f32 %v1474_v36, %v2561_v24  ;;  %v1483_v15 = vmul.f32 %v1470_v50, %v2567_v28  ;;  %v1484_v49 = vmul.f32 %v1474_v36, %v2575_v32 }
 0x20d   : > { %1354 = vst [vmem:[%s2467_s15 + $0x38] sm:$0xff] %v1920_v58  ;;  %v1497_v56 = vcombine.low %v1493_v4, %v1494_v5  ;;  %v1486_v19 = vmul.f32 %v1474_v36, %v2863_v53  ;;  %v1488_v22 = vmul.f32 %v1474_v36, %v2865_v63  ;;  %v1489_v23 = vmul.f32 %v1470_v50, %v2866_v54 }
 0x20e   : > { %v1490_v24 = vmul.f32 %v1474_v36, %v2867_v16  ;;  %v1491_v28 = vmul.f32 %v1470_v50, %v2868_v30  ;;  %v1492_v32 = vmul.f32 %v1474_v36, %v2869_v55 }
 0x20f   : > { %v1504_v6 = vrot.slane %v1497_v56, %v2687_v48 }
 0x211   : > { %v1511_v9 = vrot.slane %v1504_v6, %v2687_v48  ;;  %v1485_v48 = vmul.f32 %v1470_v50, %v2862_v51 }
 0x213   : > { %v1513_v14 = vsub.f32 %v2710_v26, %v1511_v9  ;;  %v1487_v26 = vmul.f32 %v1470_v50, %v2864_v62 }
 0x215   : > { %v1518_v20 = vrot.slane %v1513_v14, %v2696_v12  ;;  %v1522_v21 = vrot.slane %v1513_v14, %v2698_v13 }
 0x217   : > { %v1525_v31 = vadd.f32 %v1518_v20, %v1477_v10  ;;  %v1526_v60 = vadd.f32 %v1522_v21, %v1478_v11  ;;  %v1527_v38 = vadd.f32 %v1518_v20, %v1479_v45  ;;  %v1528_v39 = vadd.f32 %v1522_v21, %v1480_v42 }
 0x218   : > { %v1529_v57 = vadd.f32 %v1518_v20, %v1481_v47  ;;  %v1530_v12 = vadd.f32 %v1522_v21, %v1482_v61  ;;  %v1531_v0 = vadd.f32 %v1518_v20, %v1483_v15  ;;  %v1532_v13 = vadd.f32 %v1522_v21, %v1484_v49 }
 0x219   : > { %v1541_v7 = vmax.f32 %v1525_v31, 0.0  ;;  %v1542_v59 = vmax.f32 %v1526_v60, 0.0  ;;  %v1543_v8 = vmax.f32 %v1527_v38, 0.0  ;;  %v1544_v44 = vmax.f32 %v1528_v39, 0.0 }
 0x21a   : > { %v1545_v40 = vmax.f32 %v1529_v57, 0.0  ;;  %v1546_v17 = vmax.f32 %v1530_v12, 0.0  ;;  %v1547_v18 = vmax.f32 %v1531_v0, 0.0  ;;  %v1548_v25 = vmax.f32 %v1532_v13, 0.0 }
 0x21b   : > { %v1921_v27 = vpack.c.bf16 %v1542_v59, %v1541_v7  ;;  %v1922_v29 = vpack.c.bf16 %v1544_v44, %v1543_v8  ;;  %v1533_v33 = vadd.f32 %v1518_v20, %v1485_v48  ;;  %v1534_v37 = vadd.f32 %v1522_v21, %v1486_v19 }
 0x21c   : > { %v1923_v41 = vpack.c.bf16 %v1546_v17, %v1545_v40  ;;  %v1924_v34 = vpack.c.bf16 %v1548_v25, %v1547_v18  ;;  %v1535_v35 = vadd.f32 %v1518_v20, %v1487_v26  ;;  %v1536_v43 = vadd.f32 %v1522_v21, %v1488_v22 }
 0x21d   : > { %1605 = vst [vmem:[%s2467_s15 + $0x40] sm:$0xff] %v1921_v27  ;;  %1606 = vst [vmem:[%s2467_s15 + $0x48] sm:$0xff] %v1922_v29  ;;  %v1549_v52 = vmax.f32 %v1533_v33, 0.0  ;;  %v1550_v50 = vmax.f32 %v1534_v37, 0.0  ;;  %v1537_v46 = vadd.f32 %v1518_v20, %v1489_v23  ;;  %v1538_v1 = vadd.f32 %v1522_v21, %v1490_v24 }
 0x21e   : > { %1607 = vst [vmem:[%s2467_s15 + $0x50] sm:$0xff] %v1923_v41  ;;  %1608 = vst [vmem:[%s2467_s15 + $0x58] sm:$0xff] %v1924_v34  ;;  %v1551_v2 = vmax.f32 %v1535_v35, 0.0  ;;  %v1552_v36 = vmax.f32 %v1536_v43, 0.0  ;;  %v1539_v3 = vadd.f32 %v1518_v20, %v1491_v28  ;;  %v1540_v4 = vadd.f32 %v1522_v21, %v1492_v32 }
 0x21f   : > { %v1925_v58 = vpack.c.bf16 %v1550_v50, %v1549_v52  ;;  %v1553_v5 = vmax.f32 %v1537_v46, 0.0  ;;  %v1554_v56 = vmax.f32 %v1538_v1, 0.0 }
 0x220   : > { %v1926_v6 = vpack.c.bf16 %v1552_v36, %v1551_v2  ;;  %v1555_v9 = vmax.f32 %v1539_v3, 0.0  ;;  %v1556_v10 = vmax.f32 %v1540_v4, 0.0 }
 0x221   : > { %1609 = vst [vmem:[%s2467_s15 + $0x60] sm:$0xff] %v1925_v58  ;;  %v1927_v11 = vpack.c.bf16 %v1554_v56, %v1553_v5 }
 0x222   : > { %1610 = vst [vmem:[%s2467_s15 + $0x68] sm:$0xff] %v1926_v6  ;;  %v1928_v45 = vpack.c.bf16 %v1556_v10, %v1555_v9 }
 0x223   : > { %1611 = vst [vmem:[%s2467_s15 + $0x70] sm:$0xff] %v1927_v11 }
 0x224   : > { %1612 = vst [vmem:[%s2467_s15 + $0x78] sm:$0xff] %v1928_v45 }
 0x225 PF: > { %1619 = sbr.rel (!%p2341_p12) target bundleno = 559 (0x22f), region = 124  ;;  %s1929_s1 = sshll.u32 (%p2341_p12), %s2206_s22, 3  ;;  %v1680_v14 = vld [vmem:[%s2467_s15] sm:$0xff] (%p2341_p12)  ;;  %v1682_v42 = vld [vmem:[%s2467_s15 + $0x8] sm:$0xff] (%p2341_p12)  ;;  %v1684_v47 = vld [vmem:[%s2467_s15 + $0x10] sm:$0xff] (%p2341_p12) }
 0x226   : > { %s1622_s27 = scalar_lea.vmem (%p2341_p12), %s2834_s4, %s1929_s1  ;;  %v1686_v61 = vld [vmem:[%s2467_s15 + $0x18] sm:$0xff] (%p2341_p12)  ;;  %v1688_v15 = vld [vmem:[%s2467_s15 + $0x20] sm:$0xff] (%p2341_p12)  ;;  %v1690_v49 = vld [vmem:[%s2467_s15 + $0x28] sm:$0xff] (%p2341_p12) }
 0x227   : > { %1681 = vst [vmem:[%s1622_s27] sm:$0xff] (%p2341_p12), %v1680_v14  ;;  %1683 = vst [vmem:[%s1622_s27 + $0x10] sm:$0xff] (%p2341_p12), %v1682_v42  ;;  %v1692_v51 = vld [vmem:[%s2467_s15 + $0x30] sm:$0xff] (%p2341_p12)  ;;  %v1694_v48 = vld [vmem:[%s2467_s15 + $0x38] sm:$0xff] (%p2341_p12) }
 0x228   : > { %1685 = vst [vmem:[%s1622_s27 + $0x20] sm:$0xff] (%p2341_p12), %v1684_v47  ;;  %1687 = vst [vmem:[%s1622_s27 + $0x30] sm:$0xff] (%p2341_p12), %v1686_v61  ;;  %v1696_v53 = vld [vmem:[%s2467_s15 + $0x40] sm:$0xff] (%p2341_p12)  ;;  %v1698_v19 = vld [vmem:[%s2467_s15 + $0x48] sm:$0xff] (%p2341_p12) }
 0x229   : > { %1689 = vst [vmem:[%s1622_s27 + $0x40] sm:$0xff] (%p2341_p12), %v1688_v15  ;;  %1691 = vst [vmem:[%s1622_s27 + $0x50] sm:$0xff] (%p2341_p12), %v1690_v49  ;;  %v1700_v20 = vld [vmem:[%s2467_s15 + $0x50] sm:$0xff] (%p2341_p12)  ;;  %v1702_v21 = vld [vmem:[%s2467_s15 + $0x58] sm:$0xff] (%p2341_p12) }
 0x22a   : > { %1693 = vst [vmem:[%s1622_s27 + $0x60] sm:$0xff] (%p2341_p12), %v1692_v51  ;;  %1695 = vst [vmem:[%s1622_s27 + $0x70] sm:$0xff] (%p2341_p12), %v1694_v48  ;;  %v1704_v62 = vld [vmem:[%s2467_s15 + $0x60] sm:$0xff] (%p2341_p12)  ;;  %v1706_v26 = vld [vmem:[%s2467_s15 + $0x68] sm:$0xff] (%p2341_p12) }
 0x22b   : > { %1697 = vst [vmem:[%s1622_s27 + $0x80] sm:$0xff] (%p2341_p12), %v1696_v53  ;;  %1699 = vst [vmem:[%s1622_s27 + $0x90] sm:$0xff] (%p2341_p12), %v1698_v19  ;;  %v1708_v63 = vld [vmem:[%s2467_s15 + $0x70] sm:$0xff] (%p2341_p12)  ;;  %v1710_v22 = vld [vmem:[%s2467_s15 + $0x78] sm:$0xff] (%p2341_p12) }
 0x22c   : > { %1701 = vst [vmem:[%s1622_s27 + $0xa0] sm:$0xff] %v1700_v20  ;;  %1703 = vst [vmem:[%s1622_s27 + $0xb0] sm:$0xff] %v1702_v21 }
 0x22d   : > { %1705 = vst [vmem:[%s1622_s27 + $0xc0] sm:$0xff] %v1704_v62  ;;  %1707 = vst [vmem:[%s1622_s27 + $0xd0] sm:$0xff] %v1706_v26 }
 0x22e   : > { %1709 = vst [vmem:[%s1622_s27 + $0xe0] sm:$0xff] %v1708_v63  ;;  %1711 = vst [vmem:[%s1622_s27 + $0xf0] sm:$0xff] %v1710_v22 }
 0x22f PF: > { %s14_s25 = sadd.s32 1, %s2218_s25   ;;  %s2870_s14 = sld [smem:[#allocation6_spill]] }
 0x230   : > { %p11_p6 = scmp.ge.s32.totalorder %s14_s25, 6   ;;  %s2871_s29 = sld [smem:[#allocation7_spill]] }
 0x231   : > { %s2872_s15 = smov %s2182_s16  ;;  %s2873_s16 = smov %s2339_s13 }
 0x232   : > { %s2874_s17 = smov %s2190_s18  ;;  %s2875_s18 = smov %s2336_s12 }
 0x233   : > { %s2876_s19 = smov %s2198_s20  ;;  %s2877_s20 = smov %s2322_s7 }
 0x234   : > { %s2878_s21 = smov %s2210_s23  ;;  %s2879_s22 = smov %s2214_s24 }
 0x235   : > { %s2880_s23 = smov %s2870_s14  ;;  %13 = sbr.rel (!%p11_p6) target bundleno = 9 (0x9), region = 207 }
 0x236   : > { %s2881_s24 = smov %s2871_s29 }

// kernel: barlow_twins_forward.5
= control target key start
LH: loop header
LB: loop body
LE: loop exit
PB: predicated region body
PF: predicated region fallthrough
CT: control target
= control target key end

     0   :  { %s2739_s0 = inlined_call_operand.vmem [shape: bf16[128,512], index: 0, kind: input, shape index: {}]   ;;  %s2740_s1 = inlined_call_operand.vmem [shape: bf16[512,512], index: 1, kind: input, shape index: {}]   ;;  %s2741_s2 = inlined_call_operand.vmem [shape: f32[1,512], index: 2, kind: input, shape index: {}]   ;;  %s2742_s3 = inlined_call_operand.vmem [shape: f32[1,512], index: 3, kind: input, shape index: {}]   ;;  %s2743_s4 = inlined_call_operand.vmem [shape: f32[128,512], index: 4, kind: output, shape index: {}]  }
   0x1   :  { %2754 = sst [smem:[#allocation16_spill]] %s2739_s0 }
   0x2   :  { %2755 = sst [smem:[#allocation17_spill]] %s2740_s1 }
   0x3   :  { %s2090_s15 = smov 0   ;;  %s2092_s16 = smov 0  }
   0x4   :  { %s2094_s17 = smov 0   ;;  %s2096_s18 = smov 0  }
   0x5   :  { %s2098_s19 = smov 0   ;;  %s2100_s20 = smov 0  }
   0x6   :  { %s2102_s21 = smov 0   ;;  %s2104_s22 = smov 0  }
   0x7   :  { %s2106_s23 = smov 0   ;;  %s2108_s24 = smov 0  }
   0x8   :  { %s2110_s25 = smov 0  }
   0x9 LB: > { %s1697_s26 = sadd.s32 4294967295, %s2061_s25   ;;  %s23_s27 = sadd.s32 1, %s2053_s23  ;;  %s2061_s25 = sphi %s2110_s25, %s14_s25   ;;  %s2057_s24 = sphi %s2108_s24, %s2790_s24   ;;  %s2053_s23 = sphi %s2106_s23, %s2789_s23   ;;  %s2049_s22 = sphi %s2104_s22, %s2788_s22   ;;  %s2045_s21 = sphi %s2102_s21, %s2787_s21   ;;  %s2041_s20 = sphi %s2100_s20, %s2786_s20   ;;  %s2037_s19 = sphi %s2098_s19, %s2785_s19   ;;  %s2033_s18 = sphi %s2096_s18, %s2784_s18   ;;  %s2029_s17 = sphi %s2094_s17, %s2783_s17   ;;  %s2025_s16 = sphi %s2092_s16, %s2782_s16   ;;  %s2021_s15 = sphi %s2090_s15, %s2781_s15  }
   0xa   : > { %p24_p0 = scmp.ge.s32.totalorder %s23_s27, 2  ;;  %s26_s28 = sadd.s32 1, %s2057_s24 }
   0xb   : > { %s33_s29 = sadd.s32 1, %s2041_s20  ;;  %p40_p1 = scmp.ne.s32.totalorder %s2041_s20, %s2037_s19 }
   0xc   : > { %s2792_s27 = smov (%p24_p0, %s23_s27), 0  ;;  %s2794_s28 = smov (!%p24_p0, %s26_s28), %s2057_s24 }
   0xd   : > { %2756 = sst [smem:[#allocation6_spill]] %s2792_s27  ;;  %s30_s30 = ssub.s32 %s2053_s23, %s2792_s27 }
   0xe   : > { %p41_p2 = scmp.eq.s32.totalorder %s2061_s25, 0  ;;  %p28_p3 = scmp.ge.s32.totalorder %s2794_s28, 2 }
   0xf   : > { %p31_p4 = scmp.eq.s32.totalorder %s30_s30, 0  ;;  %s61_s6 = sadd.s32 1, %s2033_s18 }
  0x10   : > { %p2157_p5 = por %p41_p2, %p40_p1  ;;  %s2796_s28 = smov (%p28_p3, %s2794_s28), 0 }
  0x11   : > { %2758 = sst [smem:[#allocation7_spill]] %s2796_s28  ;;  %s57_s8 = ssub.s32 %s2057_s24, %s2796_s28 }
  0x12   : > { %s2165_s7 = scalar_select %p31_p4, %s2041_s20, %s33_s29  }
  0x13   : > { %p68_p6 = scmp.ne.s32.totalorder %s2033_s18, %s2029_s17  ;;  %s58_s9 = sor.u32 %s57_s8, %s30_s30 }
  0x14   : > { %p137_p7 = scmp.eq.s32.totalorder %s57_s8, 0  ;;  %p59_p8 = scmp.eq.s32.totalorder %s58_s9, 0 }
  0x15   : > { %p2171_p9 = por %p68_p6, %p41_p2  ;;  %s139_s11 = sadd.s32 1, %s2025_s16 }
  0x16   : > { %p149_p10 = scmp.ne.s32.totalorder %s2025_s16, %s2021_s15  ;;  %p150_p11 = scmp.eq.s32.totalorder %s1697_s26, 3 }
  0x17   : > { %s2179_s12 = scalar_select %p59_p8, %s2033_s18, %s61_s6  }
  0x18   : > { %s2182_s13 = scalar_select %p137_p7, %s2025_s16, %s139_s11  }
  0x19   : > { %p2184_p12 = por %p150_p11, %p149_p10  ;;  %p1700_p13 = scmp.ge.s32.totalorder %s2061_s25, 4 }
  0x1b   : > { %172 = sbr.rel (%p1700_p13) target bundleno = 78 (0x4e), region = 16 }
  0x22   : > { %175 = sbr.rel (!%p2157_p5) target bundleno = 52 (0x34), region = 20  ;;  %s177_s29 = sand.u32 (%p2157_p5), 1, %s2041_s20  }
  0x23   : > { %s1770_s30 = sshll.u32 (%p2157_p5), %s2053_s23, 3  ;;  %s1701_s8 = sshll.u32 (%p2157_p5), %s177_s29, 7 }
  0x24   : > { %s2761_s0 = sld [smem:[#allocation16_spill]] (%p2157_p5)  ;;  %s179_s26 = scalar_lea.vmem (%p2157_p5), [#allocation3], %s1701_s8 }
  0x2a   : > { %s2196_s11 = scalar_lea.vmem %s2761_s0, %s1770_s30 }
  0x2b   : > { %v240_v0 = vld [vmem:[%s2196_s11] sm:$0xff]  ;;  %v242_v1 = vld [vmem:[%s2196_s11 + $0x10] sm:$0xff] }
  0x2c   : > { %v244_v2 = vld [vmem:[%s2196_s11 + $0x20] sm:$0xff]  ;;  %241 = vst [vmem:[%s179_s26] sm:$0xff] %v240_v0  ;;  %243 = vst [vmem:[%s179_s26 + $0x8] sm:$0xff] %v242_v1  ;;  %v246_v3 = vld [vmem:[%s2196_s11 + $0x30] sm:$0xff] }
  0x2d   : > { %245 = vst [vmem:[%s179_s26 + $0x10] sm:$0xff] %v244_v2  ;;  %v248_v4 = vld [vmem:[%s2196_s11 + $0x40] sm:$0xff]  ;;  %v250_v5 = vld [vmem:[%s2196_s11 + $0x50] sm:$0xff]  ;;  %247 = vst [vmem:[%s179_s26 + $0x18] sm:$0xff] %v246_v3 }
  0x2e   : > { %249 = vst [vmem:[%s179_s26 + $0x20] sm:$0xff] %v248_v4  ;;  %251 = vst [vmem:[%s179_s26 + $0x28] sm:$0xff] %v250_v5  ;;  %v252_v6 = vld [vmem:[%s2196_s11 + $0x60] sm:$0xff]  ;;  %v254_v7 = vld [vmem:[%s2196_s11 + $0x70] sm:$0xff] }
  0x2f   : > { %v256_v8 = vld [vmem:[%s2196_s11 + $0x80] sm:$0xff]  ;;  %253 = vst [vmem:[%s179_s26 + $0x30] sm:$0xff] %v252_v6  ;;  %255 = vst [vmem:[%s179_s26 + $0x38] sm:$0xff] %v254_v7  ;;  %v258_v9 = vld [vmem:[%s2196_s11 + $0x90] sm:$0xff] }
  0x30   : > { %257 = vst [vmem:[%s179_s26 + $0x40] sm:$0xff] %v256_v8  ;;  %v260_v10 = vld [vmem:[%s2196_s11 + $0xa0] sm:$0xff]  ;;  %v262_v11 = vld [vmem:[%s2196_s11 + $0xb0] sm:$0xff]  ;;  %259 = vst [vmem:[%s179_s26 + $0x48] sm:$0xff] %v258_v9 }
  0x31   : > { %261 = vst [vmem:[%s179_s26 + $0x50] sm:$0xff] %v260_v10  ;;  %263 = vst [vmem:[%s179_s26 + $0x58] sm:$0xff] %v262_v11  ;;  %v264_v12 = vld [vmem:[%s2196_s11 + $0xc0] sm:$0xff]  ;;  %v266_v13 = vld [vmem:[%s2196_s11 + $0xd0] sm:$0xff] }
  0x32   : > { %v268_v14 = vld [vmem:[%s2196_s11 + $0xe0] sm:$0xff]  ;;  %265 = vst [vmem:[%s179_s26 + $0x60] sm:$0xff] %v264_v12  ;;  %267 = vst [vmem:[%s179_s26 + $0x68] sm:$0xff] %v266_v13  ;;  %v270_v15 = vld [vmem:[%s2196_s11 + $0xf0] sm:$0xff] }
  0x33   : > { %269 = vst [vmem:[%s179_s26 + $0x70] sm:$0xff] %v268_v14  ;;  %271 = vst [vmem:[%s179_s26 + $0x78] sm:$0xff] %v270_v15 }
  0x34 PF: > { %277 = sbr.rel (!%p2171_p9) target bundleno = 78 (0x4e), region = 58  ;;  %s279_s5 = sand.u32 (%p2171_p9), 1, %s2033_s18  }
  0x35   : > { %s1706_s29 = sshll.u32 (%p2171_p9), %s2057_s24, 1  ;;  %s1704_s30 = sshll.u32 (%p2171_p9), %s279_s5, 8 }
  0x36   : > { %s1771_s8 = sshll.u32 (%p2171_p9), %s2053_s23, 7  ;;  %s2762_s1 = sld [smem:[#allocation17_spill]] (%p2171_p9) }
  0x37   : > { %s285_s6 = sadd.s32 (%p2171_p9), %s1771_s8, %s1706_s29  ;;  %s2227_s10 = scalar_lea.vmem (%p2171_p9), [#allocation4], %s1704_s30 }
  0x38   : > { %s1708_s9 = sshll.u32 (%p2171_p9), %s285_s6, 2 }
  0x3c   : > { %s2222_s27 = scalar_lea.vmem %s2762_s1, %s1708_s9 }
  0x3d   : > { %v377_v16 = vld [vmem:[%s2222_s27] sm:$0xff]  ;;  %v379_v17 = vld [vmem:[%s2222_s27 + $0x10] sm:$0xff] }
  0x3e   : > { %v381_v18 = vld [vmem:[%s2222_s27 + $0x20] sm:$0xff]  ;;  %378 = vst [vmem:[%s2227_s10] sm:$0xff] %v377_v16  ;;  %380 = vst [vmem:[%s2227_s10 + $0x8] sm:$0xff] %v379_v17  ;;  %v383_v19 = vld [vmem:[%s2222_s27 + $0x30] sm:$0xff] }
  0x3f   : > { %382 = vst [vmem:[%s2227_s10 + $0x10] sm:$0xff] %v381_v18  ;;  %v385_v20 = vld [vmem:[%s2222_s27 + $0x40] sm:$0xff]  ;;  %v387_v21 = vld [vmem:[%s2222_s27 + $0x50] sm:$0xff]  ;;  %384 = vst [vmem:[%s2227_s10 + $0x18] sm:$0xff] %v383_v19 }
  0x40   : > { %386 = vst [vmem:[%s2227_s10 + $0x20] sm:$0xff] %v385_v20  ;;  %388 = vst [vmem:[%s2227_s10 + $0x28] sm:$0xff] %v387_v21  ;;  %v389_v22 = vld [vmem:[%s2222_s27 + $0x60] sm:$0xff]  ;;  %v391_v23 = vld [vmem:[%s2222_s27 + $0x70] sm:$0xff] }
  0x41   : > { %v393_v24 = vld [vmem:[%s2222_s27 + $0x80] sm:$0xff]  ;;  %390 = vst [vmem:[%s2227_s10 + $0x30] sm:$0xff] %v389_v22  ;;  %392 = vst [vmem:[%s2227_s10 + $0x38] sm:$0xff] %v391_v23  ;;  %v395_v25 = vld [vmem:[%s2222_s27 + $0x90] sm:$0xff] }
  0x42   : > { %394 = vst [vmem:[%s2227_s10 + $0x40] sm:$0xff] %v393_v24  ;;  %v397_v26 = vld [vmem:[%s2222_s27 + $0xa0] sm:$0xff]  ;;  %v399_v27 = vld [vmem:[%s2222_s27 + $0xb0] sm:$0xff]  ;;  %396 = vst [vmem:[%s2227_s10 + $0x48] sm:$0xff] %v395_v25 }
  0x43   : > { %398 = vst [vmem:[%s2227_s10 + $0x50] sm:$0xff] %v397_v26  ;;  %400 = vst [vmem:[%s2227_s10 + $0x58] sm:$0xff] %v399_v27  ;;  %v401_v28 = vld [vmem:[%s2222_s27 + $0xc0] sm:$0xff]  ;;  %v403_v29 = vld [vmem:[%s2222_s27 + $0xd0] sm:$0xff] }
  0x44   : > { %v405_v30 = vld [vmem:[%s2222_s27 + $0xe0] sm:$0xff]  ;;  %402 = vst [vmem:[%s2227_s10 + $0x60] sm:$0xff] %v401_v28  ;;  %404 = vst [vmem:[%s2227_s10 + $0x68] sm:$0xff] %v403_v29  ;;  %v407_v31 = vld [vmem:[%s2222_s27 + $0xf0] sm:$0xff] }
  0x45   : > { %406 = vst [vmem:[%s2227_s10 + $0x70] sm:$0xff] %v405_v30  ;;  %v409_v32 = vld [vmem:[%s2222_s27 + $0x100] sm:$0xff]  ;;  %v411_v33 = vld [vmem:[%s2222_s27 + $0x110] sm:$0xff]  ;;  %408 = vst [vmem:[%s2227_s10 + $0x78] sm:$0xff] %v407_v31 }
  0x46   : > { %410 = vst [vmem:[%s2227_s10 + $0x80] sm:$0xff] %v409_v32  ;;  %412 = vst [vmem:[%s2227_s10 + $0x88] sm:$0xff] %v411_v33  ;;  %v413_v34 = vld [vmem:[%s2222_s27 + $0x120] sm:$0xff]  ;;  %v415_v35 = vld [vmem:[%s2222_s27 + $0x130] sm:$0xff] }
  0x47   : > { %v417_v36 = vld [vmem:[%s2222_s27 + $0x140] sm:$0xff]  ;;  %414 = vst [vmem:[%s2227_s10 + $0x90] sm:$0xff] %v413_v34  ;;  %416 = vst [vmem:[%s2227_s10 + $0x98] sm:$0xff] %v415_v35  ;;  %v419_v37 = vld [vmem:[%s2222_s27 + $0x150] sm:$0xff] }
  0x48   : > { %418 = vst [vmem:[%s2227_s10 + $0xa0] sm:$0xff] %v417_v36  ;;  %v421_v38 = vld [vmem:[%s2222_s27 + $0x160] sm:$0xff]  ;;  %v423_v39 = vld [vmem:[%s2222_s27 + $0x170] sm:$0xff]  ;;  %420 = vst [vmem:[%s2227_s10 + $0xa8] sm:$0xff] %v419_v37 }
  0x49   : > { %422 = vst [vmem:[%s2227_s10 + $0xb0] sm:$0xff] %v421_v38  ;;  %424 = vst [vmem:[%s2227_s10 + $0xb8] sm:$0xff] %v423_v39  ;;  %v425_v40 = vld [vmem:[%s2222_s27 + $0x180] sm:$0xff]  ;;  %v427_v41 = vld [vmem:[%s2222_s27 + $0x190] sm:$0xff] }
  0x4a   : > { %v429_v42 = vld [vmem:[%s2222_s27 + $0x1a0] sm:$0xff]  ;;  %426 = vst [vmem:[%s2227_s10 + $0xc0] sm:$0xff] %v425_v40  ;;  %428 = vst [vmem:[%s2227_s10 + $0xc8] sm:$0xff] %v427_v41  ;;  %v431_v43 = vld [vmem:[%s2222_s27 + $0x1b0] sm:$0xff] }
  0x4b   : > { %430 = vst [vmem:[%s2227_s10 + $0xd0] sm:$0xff] %v429_v42  ;;  %v433_v44 = vld [vmem:[%s2222_s27 + $0x1c0] sm:$0xff]  ;;  %v435_v45 = vld [vmem:[%s2222_s27 + $0x1d0] sm:$0xff]  ;;  %432 = vst [vmem:[%s2227_s10 + $0xd8] sm:$0xff] %v431_v43 }
  0x4c   : > { %434 = vst [vmem:[%s2227_s10 + $0xe0] sm:$0xff] %v433_v44  ;;  %436 = vst [vmem:[%s2227_s10 + $0xe8] sm:$0xff] %v435_v45  ;;  %v437_v46 = vld [vmem:[%s2222_s27 + $0x1e0] sm:$0xff]  ;;  %v439_v47 = vld [vmem:[%s2222_s27 + $0x1f0] sm:$0xff] }
  0x4d   : > { %438 = vst [vmem:[%s2227_s10 + $0xf0] sm:$0xff] %v437_v46  ;;  %440 = vst [vmem:[%s2227_s10 + $0xf8] sm:$0xff] %v439_v47 }
  0x4e PF: > { %p1709_p0 = scmp.ge.s32.totalorder %s2061_s25, 1  ;;  %p461_p1 = scmp.lt.s32.totalorder %s2061_s25, 5 }
  0x50   : > { %p462_p2 = pnand %p1709_p0, %p461_p1 }
  0x51   : > { %s468_s0 = sand.u32 (!%p462_p2), 1, %s2037_s19   ;;  %s475_s28 = sand.u32 (!%p462_p2), 1, %s2029_s17  }
  0x52   : > { %465 = sbr.rel (%p462_p2) target bundleno = 557 (0x22d), region = 104  ;;  %s1710_s11 = sshll.u32 (!%p462_p2), %s468_s0, 7 }
  0x53   : > { %s1711_s26 = sshll.u32 (!%p462_p2), %s475_s28, 8  ;;  %s508_s5 = sand.u32 (!%p462_p2), 1, %s2021_s15  }
  0x54   : > { %s1713_s27 = sshll.u32 (!%p462_p2), %s2049_s22, 1  ;;  %s1712_s29 = sshll.u32 (!%p462_p2), %s508_s5, 8 }
  0x55   : > { %p515_p3 = scmp.lt.s32.totalorder (!%p462_p2), %s1713_s27, 3  ;;  %s2306_s19 = scalar_lea.vmem (!%p462_p2), [#allocation3], %s1710_s11 }
  0x56   : > { %s2308_s17 = scalar_lea.vmem (!%p462_p2), [#allocation4], %s1711_s26  ;;  %s2310_s15 = scalar_lea.vmem (!%p462_p2), [#allocation5], %s1712_s29 }
  0x57   : > { %p1715_p4 = scmp.ne.s32.totalorder (!%p462_p2), %s2045_s21, 0 }
  0x59   : > { %s2798_s27 = smov (!%p515_p3, %s1713_s27), 3  ;;  %528 = sbr.rel (%p1715_p4) target bundleno = 107 (0x6b), region = 116 }
  0x5a   : > { %s517_s6 = scalar_lea.vmem %s2741_s2, %s2798_s27  ;;  %s522_s1 = scalar_lea.vmem %s2742_s3, %s2798_s27  ;;  %v2063_v48 = vmov (!%p1715_p4), 0.0  }
  0x5b   : > { %529 = vst [vmem:[#allocation2] sm:$0xff] (!%p1715_p4), %v2063_v48  ;;  %530 = vst [vmem:[#allocation2 + $0x8] sm:$0xff] (!%p1715_p4), %v2063_v48 }
  0x5c   : > { %531 = vst [vmem:[#allocation2 + $0x10] sm:$0xff] (!%p1715_p4), %v2063_v48  ;;  %532 = vst [vmem:[#allocation2 + $0x18] sm:$0xff] (!%p1715_p4), %v2063_v48 }
  0x5d   : > { %533 = vst [vmem:[#allocation2 + $0x20] sm:$0xff] (!%p1715_p4), %v2063_v48  ;;  %534 = vst [vmem:[#allocation2 + $0x28] sm:$0xff] (!%p1715_p4), %v2063_v48 }
  0x5e   : > { %535 = vst [vmem:[#allocation2 + $0x30] sm:$0xff] (!%p1715_p4), %v2063_v48  ;;  %536 = vst [vmem:[#allocation2 + $0x38] sm:$0xff] (!%p1715_p4), %v2063_v48 }
  0x5f   : > { %537 = vst [vmem:[#allocation2 + $0x40] sm:$0xff] (!%p1715_p4), %v2063_v48  ;;  %538 = vst [vmem:[#allocation2 + $0x48] sm:$0xff] (!%p1715_p4), %v2063_v48 }
  0x60   : > { %539 = vst [vmem:[#allocation2 + $0x50] sm:$0xff] %v2063_v48  ;;  %540 = vst [vmem:[#allocation2 + $0x58] sm:$0xff] %v2063_v48 }
  0x61   : > { %541 = vst [vmem:[#allocation2 + $0x60] sm:$0xff] %v2063_v48  ;;  %542 = vst [vmem:[#allocation2 + $0x68] sm:$0xff] %v2063_v48 }
  0x62   : > { %543 = vst [vmem:[#allocation2 + $0x70] sm:$0xff] %v2063_v48  ;;  %544 = vst [vmem:[#allocation2 + $0x78] sm:$0xff] %v2063_v48 }
  0x63   : > { %545 = vst [vmem:[#allocation2 + $0x80] sm:$0xff] %v2063_v48  ;;  %546 = vst [vmem:[#allocation2 + $0x88] sm:$0xff] %v2063_v48 }
  0x64   : > { %547 = vst [vmem:[#allocation2 + $0x90] sm:$0xff] %v2063_v48  ;;  %548 = vst [vmem:[#allocation2 + $0x98] sm:$0xff] %v2063_v48 }
  0x65   : > { %549 = vst [vmem:[#allocation2 + $0xa0] sm:$0xff] %v2063_v48  ;;  %550 = vst [vmem:[#allocation2 + $0xa8] sm:$0xff] %v2063_v48 }
  0x66   : > { %551 = vst [vmem:[#allocation2 + $0xb0] sm:$0xff] %v2063_v48  ;;  %552 = vst [vmem:[#allocation2 + $0xb8] sm:$0xff] %v2063_v48 }
  0x67   : > { %553 = vst [vmem:[#allocation2 + $0xc0] sm:$0xff] %v2063_v48  ;;  %554 = vst [vmem:[#allocation2 + $0xc8] sm:$0xff] %v2063_v48 }
  0x68   : > { %555 = vst [vmem:[#allocation2 + $0xd0] sm:$0xff] %v2063_v48  ;;  %556 = vst [vmem:[#allocation2 + $0xd8] sm:$0xff] %v2063_v48 }
  0x69   : > { %557 = vst [vmem:[#allocation2 + $0xe0] sm:$0xff] %v2063_v48  ;;  %558 = vst [vmem:[#allocation2 + $0xe8] sm:$0xff] %v2063_v48 }
  0x6a   : > { %559 = vst [vmem:[#allocation2 + $0xf0] sm:$0xff] %v2063_v48  ;;  %560 = vst [vmem:[#allocation2 + $0xf8] sm:$0xff] %v2063_v48 }
  0x6b PF: > { %v1895_v49 = vld [vmem:[%s2308_s17 + $0x4] ss:$8 sps:$4 sm:$0xff]   ;;  %v1897_v50 = vld [vmem:[%s2308_s17] ss:$8 sps:$4 sm:$0xff]   ;;  %v1898_v51 = vld [vmem:[%s2308_s17 + $0x14] ss:$8 sps:$4 sm:$0xff]  }
  0x6c   : > { %881 = vmatprep.subr.bf16.mxu0 %v1895_v49  ;;  %1773 = vmatprep.subr.bf16.mxu1 %v1895_v49  ;;  %v1900_v52 = vld [vmem:[%s2308_s17 + $0x10] ss:$8 sps:$4 sm:$0xff]   ;;  %v1901_v53 = vld [vmem:[%s2308_s17 + $0x24] ss:$8 sps:$4 sm:$0xff]   ;;  %v1903_v54 = vld [vmem:[%s2308_s17 + $0x20] ss:$8 sps:$4 sm:$0xff]  }
  0x6d   : > { %882 = vmatpush1.bf16.msra.mxu0 %v1897_v50  ;;  %1789 = vmatpush1.bf16.msra.mxu1 %v1897_v50  ;;  %v1904_v55 = vld [vmem:[%s2308_s17 + $0x34] ss:$8 sps:$4 sm:$0xff]   ;;  %v1906_v56 = vld [vmem:[%s2308_s17 + $0x30] ss:$8 sps:$4 sm:$0xff]   ;;  %v1907_v57 = vld [vmem:[%s2308_s17 + $0x44] ss:$8 sps:$4 sm:$0xff]  }
  0x6e   : > { %883 = vmatprep.subr.bf16.mxu0 %v1898_v51  ;;  %1774 = vmatprep.subr.bf16.mxu1 %v1898_v51  ;;  %v1909_v58 = vld [vmem:[%s2308_s17 + $0x40] ss:$8 sps:$4 sm:$0xff]   ;;  %v1910_v59 = vld [vmem:[%s2308_s17 + $0x54] ss:$8 sps:$4 sm:$0xff]   ;;  %v1912_v60 = vld [vmem:[%s2308_s17 + $0x50] ss:$8 sps:$4 sm:$0xff]  }
  0x6f   : > { %v1913_v61 = vld [vmem:[%s2308_s17 + $0x64] ss:$8 sps:$4 sm:$0xff]   ;;  %v1915_v63 = vld [vmem:[%s2308_s17 + $0x60] ss:$8 sps:$4 sm:$0xff]   ;;  %v1916_v1 = vld [vmem:[%s2308_s17 + $0x74] ss:$8 sps:$4 sm:$0xff]  }
  0x70   : > { %v1945_v62 = vld [vmem:[%s2306_s19 + $0x4] ss:$8 sps:$4 sm:$0xff]   ;;  %v1918_v2 = vld [vmem:[%s2308_s17 + $0x70] ss:$8 sps:$4 sm:$0xff]   ;;  %v1921_v4 = vld [vmem:[%s2308_s17 + $0x80] ss:$8 sps:$4 sm:$0xff]  }
  0x71   : > { %884 = vmatpush1.bf16.msra.mxu0 %v1900_v52  ;;  %1790 = vmatpush1.bf16.msra.mxu1 %v1900_v52  ;;  %v1948_v0 = vld [vmem:[%s2306_s19 + $0x44] ss:$8 sps:$4 sm:$0xff]   ;;  %v1922_v5 = vld [vmem:[%s2308_s17 + $0x94] ss:$8 sps:$4 sm:$0xff]   ;;  %v1924_v6 = vld [vmem:[%s2308_s17 + $0x90] ss:$8 sps:$4 sm:$0xff]  }
  0x72   : > { %885 = vmatprep.subr.bf16.mxu0 %v1901_v53  ;;  %1775 = vmatprep.subr.bf16.mxu1 %v1901_v53  ;;  %v1919_v3 = vld [vmem:[%s2308_s17 + $0x84] ss:$8 sps:$4 sm:$0xff]   ;;  %v1927_v8 = vld [vmem:[%s2308_s17 + $0xa0] ss:$8 sps:$4 sm:$0xff]   ;;  %v1928_v9 = vld [vmem:[%s2308_s17 + $0xb4] ss:$8 sps:$4 sm:$0xff]  }
  0x73   : > { %913 = vmatprep.mubr.bf16.mxu0 %v1945_v62  ;;  %953 = vmatprep.mubr.bf16.mxu1 %v1948_v0  ;;  %v1925_v7 = vld [vmem:[%s2308_s17 + $0xa4] ss:$8 sps:$4 sm:$0xff]   ;;  %v1930_v10 = vld [vmem:[%s2308_s17 + $0xb0] ss:$8 sps:$4 sm:$0xff]   ;;  %v1933_v12 = vld [vmem:[%s2308_s17 + $0xc0] ss:$8 sps:$4 sm:$0xff]  }
  0x74   : > { %v1931_v11 = vld [vmem:[%s2308_s17 + $0xc4] ss:$8 sps:$4 sm:$0xff]   ;;  %v1934_v13 = vld [vmem:[%s2308_s17 + $0xd4] ss:$8 sps:$4 sm:$0xff]   ;;  %v1936_v14 = vld [vmem:[%s2308_s17 + $0xd0] ss:$8 sps:$4 sm:$0xff]  }
  0x75   : > { %886 = vmatpush1.bf16.msra.mxu0 %v1903_v54  ;;  %1791 = vmatpush1.bf16.msra.mxu1 %v1903_v54  ;;  %v1937_v15 = vld [vmem:[%s2308_s17 + $0xe4] ss:$8 sps:$4 sm:$0xff]   ;;  %v1939_v16 = vld [vmem:[%s2308_s17 + $0xe0] ss:$8 sps:$4 sm:$0xff]   ;;  %v1940_v17 = vld [vmem:[%s2308_s17 + $0xf4] ss:$8 sps:$4 sm:$0xff]  }
  0x76   : > { %887 = vmatprep.subr.bf16.mxu0 %v1904_v55  ;;  %1776 = vmatprep.subr.bf16.mxu1 %v1904_v55  ;;  %v1942_v18 = vld [vmem:[%s2308_s17 + $0xf0] ss:$8 sps:$4 sm:$0xff]   ;;  %v1943_v19 = vld [vmem:[%s2306_s19] ss:$8 sps:$4 sm:$0xff]   ;;  %v1949_v21 = vld [vmem:[%s2306_s19 + $0x14] ss:$8 sps:$4 sm:$0xff]  }
  0x77   : > { %v1946_v20 = vld [vmem:[%s2306_s19 + $0x40] ss:$8 sps:$4 sm:$0xff]   ;;  %v1951_v22 = vld [vmem:[%s2306_s19 + $0x54] ss:$8 sps:$4 sm:$0xff]   ;;  %v1953_v23 = vld [vmem:[%s2306_s19 + $0x10] ss:$8 sps:$4 sm:$0xff]  }
  0x78   : > { %v1954_v24 = vld [vmem:[%s2306_s19 + $0x50] ss:$8 sps:$4 sm:$0xff]   ;;  %v1955_v25 = vld [vmem:[%s2306_s19 + $0x24] ss:$8 sps:$4 sm:$0xff]   ;;  %v1959_v27 = vld [vmem:[%s2306_s19 + $0x20] ss:$8 sps:$4 sm:$0xff]  }
  0x79   : > { %888 = vmatpush1.bf16.msra.mxu0 %v1906_v56  ;;  %1792 = vmatpush1.bf16.msra.mxu1 %v1906_v56  ;;  %v1957_v26 = vld [vmem:[%s2306_s19 + $0x64] ss:$8 sps:$4 sm:$0xff]   ;;  %v1960_v28 = vld [vmem:[%s2306_s19 + $0x60] ss:$8 sps:$4 sm:$0xff]   ;;  %v1961_v29 = vld [vmem:[%s2306_s19 + $0x34] ss:$8 sps:$4 sm:$0xff]  }
  0x7a   : > { %889 = vmatprep.subr.bf16.mxu0 %v1907_v57  ;;  %1777 = vmatprep.subr.bf16.mxu1 %v1907_v57  ;;  %v1963_v30 = vld [vmem:[%s2306_s19 + $0x74] ss:$8 sps:$4 sm:$0xff]   ;;  %v1965_v31 = vld [vmem:[%s2306_s19 + $0x30] ss:$8 sps:$4 sm:$0xff]   ;;  %v561_v33 = vld [vmem:[#allocation2] sm:$0xff]  ;;  %p1764_p5 = scmp.ne.s32.totalorder %s2045_s21, 1 }
  0x7b   : > { %v1966_v32 = vld [vmem:[%s2306_s19 + $0x70] ss:$8 sps:$4 sm:$0xff]   ;;  %v577_v34 = vld [vmem:[#allocation2 + $0x80] sm:$0xff]  ;;  %v562_v35 = vld [vmem:[#allocation2 + $0x8] sm:$0xff] }
  0x7c   : > { %v578_v36 = vld [vmem:[#allocation2 + $0x88] sm:$0xff]  ;;  %v563_v39 = vld [vmem:[#allocation2 + $0x10] sm:$0xff]  ;;  %v564_v45 = vld [vmem:[#allocation2 + $0x18] sm:$0xff] }
  0x7d   : > { %890 = vmatpush1.bf16.msra.mxu0 %v1909_v58  ;;  %1793 = vmatpush1.bf16.msra.mxu1 %v1909_v58  ;;  %v579_v40 = vld [vmem:[#allocation2 + $0x90] sm:$0xff]  ;;  %v580_v46 = vld [vmem:[#allocation2 + $0x98] sm:$0xff]  ;;  %v565_v57 = vld [vmem:[#allocation2 + $0x20] sm:$0xff] }
  0x7e   : > { %891 = vmatprep.subr.bf16.mxu0 %v1910_v59  ;;  %1778 = vmatprep.subr.bf16.mxu1 %v1910_v59  ;;  %v581_v58 = vld [vmem:[#allocation2 + $0xa0] sm:$0xff]  ;;  %v566_v59 = vld [vmem:[#allocation2 + $0x28] sm:$0xff]  ;;  %v583_v0 = vld [vmem:[#allocation2 + $0xb0] sm:$0xff] }
  0x81   : > { %892 = vmatpush1.bf16.msra.mxu0 %v1912_v60  ;;  %1794 = vmatpush1.bf16.msra.mxu1 %v1912_v60  ;;  %v582_v60 = vld [vmem:[#allocation2 + $0xa8] sm:$0xff] }
  0x82   : > { %893 = vmatprep.subr.bf16.mxu0 %v1913_v61  ;;  %1779 = vmatprep.subr.bf16.mxu1 %v1913_v61 }
  0x85   : > { %894 = vmatpush1.bf16.msra.mxu0 %v1915_v63  ;;  %1795 = vmatpush1.bf16.msra.mxu1 %v1915_v63  ;;  %v567_v63 = vld [vmem:[#allocation2 + $0x30] sm:$0xff] }
  0x86   : > { %895 = vmatprep.subr.bf16.mxu0 %v1916_v1  ;;  %1780 = vmatprep.subr.bf16.mxu1 %v1916_v1 }
  0x89   : > { %896 = vmatpush1.bf16.msra.mxu0 %v1918_v2  ;;  %1796 = vmatpush1.bf16.msra.mxu1 %v1918_v2 }
  0x8a   : > { %897 = vmatprep.subr.bf16.mxu0 %v1919_v3  ;;  %1781 = vmatprep.subr.bf16.mxu1 %v1919_v3 }
  0x8d   : > { %898 = vmatpush1.bf16.msra.mxu0 %v1921_v4  ;;  %1797 = vmatpush1.bf16.msra.mxu1 %v1921_v4 }
  0x8e   : > { %899 = vmatprep.subr.bf16.mxu0 %v1922_v5  ;;  %1782 = vmatprep.subr.bf16.mxu1 %v1922_v5  ;;  %v568_v5 = vld [vmem:[#allocation2 + $0x38] sm:$0xff] }
  0x91   : > { %900 = vmatpush1.bf16.msra.mxu0 %v1924_v6  ;;  %1798 = vmatpush1.bf16.msra.mxu1 %v1924_v6  ;;  %v584_v6 = vld [vmem:[#allocation2 + $0xb8] sm:$0xff] }
  0x92   : > { %901 = vmatprep.subr.bf16.mxu0 %v1925_v7  ;;  %1783 = vmatprep.subr.bf16.mxu1 %v1925_v7 }
  0x95   : > { %902 = vmatpush1.bf16.msra.mxu0 %v1927_v8  ;;  %1799 = vmatpush1.bf16.msra.mxu1 %v1927_v8 }
  0x96   : > { %903 = vmatprep.subr.bf16.mxu0 %v1928_v9  ;;  %1784 = vmatprep.subr.bf16.mxu1 %v1928_v9 }
  0x99   : > { %904 = vmatpush1.bf16.msra.mxu0 %v1930_v10  ;;  %1800 = vmatpush1.bf16.msra.mxu1 %v1930_v10 }
  0x9a   : > { %905 = vmatprep.subr.bf16.mxu0 %v1931_v11  ;;  %1785 = vmatprep.subr.bf16.mxu1 %v1931_v11 }
  0x9d   : > { %906 = vmatpush1.bf16.msra.mxu0 %v1933_v12  ;;  %1801 = vmatpush1.bf16.msra.mxu1 %v1933_v12 }
  0x9e   : > { %907 = vmatprep.subr.bf16.mxu0 %v1934_v13  ;;  %1786 = vmatprep.subr.bf16.mxu1 %v1934_v13 }
  0xa1   : > { %908 = vmatpush1.bf16.msra.mxu0 %v1936_v14  ;;  %1802 = vmatpush1.bf16.msra.mxu1 %v1936_v14 }
  0xa2   : > { %909 = vmatprep.subr.bf16.mxu0 %v1937_v15  ;;  %1787 = vmatprep.subr.bf16.mxu1 %v1937_v15 }
  0xa5   : > { %910 = vmatpush1.bf16.msra.mxu0 %v1939_v16  ;;  %1803 = vmatpush1.bf16.msra.mxu1 %v1939_v16 }
  0xa6   : > { %911 = vmatprep.subr.bf16.mxu0 %v1940_v17  ;;  %1788 = vmatprep.subr.bf16.mxu1 %v1940_v17  ;;  %v569_v17 = vld [vmem:[#allocation2 + $0x40] sm:$0xff] }
  0xa9   : > { %912 = vmatpush1.bf16.msra.mxu0 %v1942_v18  ;;  %1804 = vmatpush1.bf16.msra.mxu1 %v1942_v18  ;;  %v585_v18 = vld [vmem:[#allocation2 + $0xc0] sm:$0xff] }
  0xac   : > { %914 = vmatmul.mubr.bf16.vlgmr.msra.gmra.mrb[0].mxu0 %v1943_v19  ;;  %954 = vmatmul.mubr.bf16.vlgmr.msra.gmra.mrb[0].mxu1 %v1946_v20  ;;  %v570_v19 = vld [vmem:[#allocation2 + $0x48] sm:$0xff] }
  0xad   : > { %923 = vmatprep.mubr.bf16.mxu0 %v1949_v21  ;;  %963 = vmatprep.mubr.bf16.mxu1 %v1951_v22  ;;  %v586_v20 = vld [vmem:[#allocation2 + $0xc8] sm:$0xff] }
  0xb4   : > { %924 = vmatmul.mubr.bf16.gmra.mrb[4].mxu0 %v1953_v23  ;;  %964 = vmatmul.mubr.bf16.gmra.mrb[4].mxu1 %v1954_v24  ;;  %v571_v23 = vld [vmem:[#allocation2 + $0x50] sm:$0xff] }
  0xb5   : > { %933 = vmatprep.mubr.bf16.mxu0 %v1955_v25  ;;  %973 = vmatprep.mubr.bf16.mxu1 %v1957_v26  ;;  %v587_v24 = vld [vmem:[#allocation2 + $0xd0] sm:$0xff] }
  0xbc   : > { %934 = vmatmul.mubr.bf16.gmra.mrb[8].mxu0 %v1959_v27  ;;  %974 = vmatmul.mubr.bf16.gmra.mrb[8].mxu1 %v1960_v28 }
  0xbd   : > { %943 = vmatprep.mubr.bf16.mxu0 %v1961_v29  ;;  %983 = vmatprep.mubr.bf16.mxu1 %v1963_v30  ;;  %v572_v29 = vld [vmem:[#allocation2 + $0x58] sm:$0xff] }
  0xbe   : > { %v588_v30 = vld [vmem:[#allocation2 + $0xd8] sm:$0xff] }
  0xc4   : > { %944 = vmatmul.mubr.bf16.gmra.mrb[12].mxu0 %v1965_v31  ;;  %984 = vmatmul.mubr.bf16.gmra.mrb[12].mxu1 %v1966_v32 }
 0x17f   : > { %v915_v37 = vpop.f32.mrb[0].mxu0  ;;  %v955_v38 = vpop.f32.mrb[0].mxu1 }
 0x180   : > { %v994_v41 = vadd.f32 %v915_v37, %v561_v33  ;;  %v1010_v42 = vadd.f32 %v955_v38, %v577_v34  ;;  %v917_v43 = vpop.f32.mrb[1].mxu0  ;;  %v957_v44 = vpop.f32.mrb[1].mxu1 }
 0x181   : > { %v995_v47 = vadd.f32 %v917_v43, %v562_v35  ;;  %v1011_v48 = vadd.f32 %v957_v44, %v578_v36  ;;  %v919_v49 = vpop.f32.mrb[2].mxu0  ;;  %v959_v50 = vpop.f32.mrb[2].mxu1  ;;  %v574_v43 = vld [vmem:[#allocation2 + $0x68] sm:$0xff] }
 0x182   : > { %1026 = vst [vmem:[#allocation2] sm:$0xff] %v994_v41  ;;  %1042 = vst [vmem:[#allocation2 + $0x80] sm:$0xff] %v1010_v42  ;;  %v996_v51 = vadd.f32 %v919_v49, %v563_v39  ;;  %v1012_v52 = vadd.f32 %v959_v50, %v579_v40  ;;  %v921_v53 = vpop.f32.mrb[3].mxu0  ;;  %v961_v54 = vpop.f32.mrb[3].mxu1  ;;  %v573_v41 = vld [vmem:[#allocation2 + $0x60] sm:$0xff]  ;;  %v590_v44 = vld [vmem:[#allocation2 + $0xe8] sm:$0xff] }
 0x183   : > { %1027 = vst [vmem:[#allocation2 + $0x8] sm:$0xff] %v995_v47  ;;  %1043 = vst [vmem:[#allocation2 + $0x88] sm:$0xff] %v1011_v48  ;;  %v997_v55 = vadd.f32 %v921_v53, %v564_v45  ;;  %v1013_v56 = vadd.f32 %v961_v54, %v580_v46  ;;  %v589_v42 = vld [vmem:[#allocation2 + $0xe0] sm:$0xff]  ;;  %v575_v47 = vld [vmem:[#allocation2 + $0x70] sm:$0xff] }
 0x184   : > { %1028 = vst [vmem:[#allocation2 + $0x10] sm:$0xff] %v996_v51  ;;  %1044 = vst [vmem:[#allocation2 + $0x90] sm:$0xff] %v1012_v52  ;;  %v591_v48 = vld [vmem:[#allocation2 + $0xf0] sm:$0xff]  ;;  %v576_v53 = vld [vmem:[#allocation2 + $0x78] sm:$0xff] }
 0x185   : > { %1029 = vst [vmem:[#allocation2 + $0x18] sm:$0xff] %v997_v55  ;;  %1045 = vst [vmem:[#allocation2 + $0x98] sm:$0xff] %v1013_v56  ;;  %v592_v54 = vld [vmem:[#allocation2 + $0xf8] sm:$0xff] }
 0x187   : > { %v925_v61 = vpop.f32.mrb[4].mxu0  ;;  %v965_v62 = vpop.f32.mrb[4].mxu1 }
 0x188   : > { %v998_v1 = vadd.f32 %v925_v61, %v565_v57  ;;  %v1014_v2 = vadd.f32 %v965_v62, %v581_v58  ;;  %v927_v3 = vpop.f32.mrb[5].mxu0  ;;  %v967_v4 = vpop.f32.mrb[5].mxu1 }
 0x189   : > { %v999_v7 = vadd.f32 %v927_v3, %v566_v59  ;;  %v1015_v8 = vadd.f32 %v967_v4, %v582_v60  ;;  %v929_v9 = vpop.f32.mrb[6].mxu0  ;;  %v969_v10 = vpop.f32.mrb[6].mxu1 }
 0x18a   : > { %1030 = vst [vmem:[#allocation2 + $0x20] sm:$0xff] %v998_v1  ;;  %1046 = vst [vmem:[#allocation2 + $0xa0] sm:$0xff] %v1014_v2  ;;  %v1000_v11 = vadd.f32 %v929_v9, %v567_v63  ;;  %v1016_v12 = vadd.f32 %v969_v10, %v583_v0  ;;  %v931_v13 = vpop.f32.mrb[7].mxu0  ;;  %v971_v14 = vpop.f32.mrb[7].mxu1 }
 0x18b   : > { %1031 = vst [vmem:[#allocation2 + $0x28] sm:$0xff] %v999_v7  ;;  %1047 = vst [vmem:[#allocation2 + $0xa8] sm:$0xff] %v1015_v8  ;;  %v1001_v15 = vadd.f32 %v931_v13, %v568_v5  ;;  %v1017_v16 = vadd.f32 %v971_v14, %v584_v6 }
 0x18c   : > { %1032 = vst [vmem:[#allocation2 + $0x30] sm:$0xff] %v1000_v11  ;;  %1048 = vst [vmem:[#allocation2 + $0xb0] sm:$0xff] %v1016_v12 }
 0x18d   : > { %1033 = vst [vmem:[#allocation2 + $0x38] sm:$0xff] %v1001_v15  ;;  %1049 = vst [vmem:[#allocation2 + $0xb8] sm:$0xff] %v1017_v16 }
 0x18f   : > { %v935_v21 = vpop.f32.mrb[8].mxu0  ;;  %v975_v22 = vpop.f32.mrb[8].mxu1 }
 0x190   : > { %v1002_v25 = vadd.f32 %v935_v21, %v569_v17  ;;  %v1018_v26 = vadd.f32 %v975_v22, %v585_v18  ;;  %v937_v27 = vpop.f32.mrb[9].mxu0  ;;  %v977_v28 = vpop.f32.mrb[9].mxu1 }
 0x191   : > { %v1003_v31 = vadd.f32 %v937_v27, %v570_v19  ;;  %v1019_v32 = vadd.f32 %v977_v28, %v586_v20  ;;  %v939_v33 = vpop.f32.mrb[10].mxu0  ;;  %v979_v34 = vpop.f32.mrb[10].mxu1 }
 0x192   : > { %1034 = vst [vmem:[#allocation2 + $0x40] sm:$0xff] %v1002_v25  ;;  %1050 = vst [vmem:[#allocation2 + $0xc0] sm:$0xff] %v1018_v26  ;;  %v1004_v35 = vadd.f32 %v939_v33, %v571_v23  ;;  %v1020_v36 = vadd.f32 %v979_v34, %v587_v24  ;;  %v941_v37 = vpop.f32.mrb[11].mxu0  ;;  %v981_v38 = vpop.f32.mrb[11].mxu1 }
 0x193   : > { %1035 = vst [vmem:[#allocation2 + $0x48] sm:$0xff] %v1003_v31  ;;  %1051 = vst [vmem:[#allocation2 + $0xc8] sm:$0xff] %v1019_v32  ;;  %v1005_v39 = vadd.f32 %v941_v37, %v572_v29  ;;  %v1021_v40 = vadd.f32 %v981_v38, %v588_v30 }
 0x194   : > { %1036 = vst [vmem:[#allocation2 + $0x50] sm:$0xff] %v1004_v35  ;;  %1052 = vst [vmem:[#allocation2 + $0xd0] sm:$0xff] %v1020_v36 }
 0x195   : > { %1037 = vst [vmem:[#allocation2 + $0x58] sm:$0xff] %v1005_v39  ;;  %1053 = vst [vmem:[#allocation2 + $0xd8] sm:$0xff] %v1021_v40 }
 0x197   : > { %v945_v45 = vpop.f32.mrb[12].mxu0  ;;  %v985_v46 = vpop.f32.mrb[12].mxu1  ;;  %1061 = sbr.rel (%p1764_p5) target bundleno = 539 (0x21b), region = 120 }
 0x198   : > { %v1006_v49 = vadd.f32 %v945_v45, %v573_v41  ;;  %v1022_v50 = vadd.f32 %v985_v46, %v589_v42  ;;  %v947_v51 = vpop.f32.mrb[13].mxu0  ;;  %v987_v52 = vpop.f32.mrb[13].mxu1 }
 0x199   : > { %v1007_v55 = vadd.f32 %v947_v51, %v574_v43  ;;  %v1023_v56 = vadd.f32 %v987_v52, %v590_v44  ;;  %v949_v57 = vpop.f32.mrb[14].mxu0  ;;  %v989_v58 = vpop.f32.mrb[14].mxu1 }
 0x19a   : > { %1038 = vst [vmem:[#allocation2 + $0x60] sm:$0xff] %v1006_v49  ;;  %1054 = vst [vmem:[#allocation2 + $0xe0] sm:$0xff] %v1022_v50  ;;  %v1008_v59 = vadd.f32 %v949_v57, %v575_v47  ;;  %v1024_v60 = vadd.f32 %v989_v58, %v591_v48  ;;  %v951_v61 = vpop.f32.mrb[15].mxu0  ;;  %v991_v62 = vpop.f32.mrb[15].mxu1 }
 0x19b   : > { %1039 = vst [vmem:[#allocation2 + $0x68] sm:$0xff] %v1007_v55  ;;  %1055 = vst [vmem:[#allocation2 + $0xe8] sm:$0xff] %v1023_v56  ;;  %v1009_v63 = vadd.f32 %v951_v61, %v576_v53  ;;  %v1025_v0 = vadd.f32 %v991_v62, %v592_v54 }
 0x19c   : > { %1040 = vst [vmem:[#allocation2 + $0x70] sm:$0xff] %v1008_v59  ;;  %1056 = vst [vmem:[#allocation2 + $0xf0] sm:$0xff] %v1024_v60 }
 0x19d   : > { %1041 = vst [vmem:[#allocation2 + $0x78] sm:$0xff] %v1009_v63  ;;  %1057 = vst [vmem:[#allocation2 + $0xf8] sm:$0xff] %v1025_v0 }
 0x19e   : > { %v2362_v1 = vld [vmem:[#allocation2] sm:$0xff]  ;;  %v2364_v2 = vld [vmem:[#allocation2 + $0x8] sm:$0xff]  ;;  %v2366_v3 = vld [vmem:[#allocation2 + $0x10] sm:$0xff] }
 0x19f   : > { %v2368_v4 = vld [vmem:[#allocation2 + $0x18] sm:$0xff]  ;;  %v2370_v5 = vld [vmem:[#allocation2 + $0x20] sm:$0xff]  ;;  %v2372_v6 = vld [vmem:[#allocation2 + $0x28] sm:$0xff]  ;;  %v1096_v7 = vadd.f32 %v2366_v3, %v2362_v1 }
 0x1a0   : > { %v1109_v8 = vadd.f32 %v2368_v4, %v2364_v2  ;;  %v2378_v9 = vld [vmem:[#allocation2 + $0x30] sm:$0xff]  ;;  %v2380_v10 = vld [vmem:[#allocation2 + $0x38] sm:$0xff]  ;;  %v2382_v11 = vld [vmem:[#allocation2 + $0x40] sm:$0xff] }
 0x1a1   : > { %v1097_v12 = vadd.f32 %v1096_v7, %v2370_v5  ;;  %v2386_v14 = vld [vmem:[#allocation2 + $0x48] sm:$0xff]  ;;  %v2388_v15 = vld [vmem:[#allocation2 + $0x50] sm:$0xff]  ;;  %v2390_v16 = vld [vmem:[#allocation2 + $0x58] sm:$0xff] }
 0x1a2   : > { %v1110_v13 = vadd.f32 %v1109_v8, %v2372_v6  ;;  %v2394_v19 = vld [vmem:[#allocation2 + $0x80] sm:$0xff]  ;;  %v2396_v20 = vld [vmem:[#allocation2 + $0x88] sm:$0xff]  ;;  %v2398_v21 = vld [vmem:[#allocation2 + $0x90] sm:$0xff] }
 0x1a3   : > { %v1098_v17 = vadd.f32 %v1097_v12, %v2378_v9  ;;  %v2400_v22 = vld [vmem:[#allocation2 + $0x98] sm:$0xff]  ;;  %v2402_v23 = vld [vmem:[#allocation2 + $0xa0] sm:$0xff]  ;;  %v2404_v24 = vld [vmem:[#allocation2 + $0xa8] sm:$0xff]  ;;  %v1299_v25 = vadd.f32 %v2398_v21, %v2394_v19 }
 0x1a4   : > { %v1111_v18 = vadd.f32 %v1110_v13, %v2380_v10  ;;  %v2410_v28 = vld [vmem:[#allocation2 + $0xb0] sm:$0xff]  ;;  %v1312_v29 = vadd.f32 %v2400_v22, %v2396_v20  ;;  %v2414_v30 = vld [vmem:[#allocation2 + $0x60] sm:$0xff]  ;;  %v2416_v31 = vld [vmem:[#allocation2 + $0x68] sm:$0xff] }
 0x1a5   : > { %v1099_v26 = vadd.f32 %v1098_v17, %v2382_v11  ;;  %v2418_v32 = vld [vmem:[#allocation2 + $0xb8] sm:$0xff]  ;;  %v1300_v33 = vadd.f32 %v1299_v25, %v2402_v23  ;;  %v2423_v36 = vld [vmem:[#allocation2 + $0xc0] sm:$0xff]  ;;  %v2426_v38 = vld [vmem:[#allocation2 + $0x70] sm:$0xff] }
 0x1a6   : > { %v1112_v27 = vadd.f32 %v1111_v18, %v2386_v14  ;;  %2763 = vst [vmem:[#allocation8_spill] sm:$0xff] %v2423_v36  ;;  %v1313_v37 = vadd.f32 %v1312_v29, %v2404_v24  ;;  %v2428_v39 = vld [vmem:[#allocation2 + $0x78] sm:$0xff]  ;;  %v2430_v40 = vld [vmem:[#allocation2 + $0xc8] sm:$0xff]  ;;  %v2435_v44 = vld [vmem:[#allocation2 + $0xd0] sm:$0xff] }
 0x1a7   : > { %v1100_v34 = vadd.f32 %v1099_v26, %v2388_v15  ;;  %2764 = vst [vmem:[#allocation9_spill] sm:$0xff] %v2430_v40  ;;  %v1301_v41 = vadd.f32 %v1300_v33, %v2410_v28  ;;  %2765 = vst [vmem:[#allocation10_spill] sm:$0xff] %v2435_v44  ;;  %v2438_v46 = vld [vmem:[#allocation2 + $0xd8] sm:$0xff]  ;;  %v2443_v50 = vld [vmem:[#allocation2 + $0xe0] sm:$0xff] }
 0x1a8   : > { %v1113_v35 = vadd.f32 %v1112_v27, %v2390_v16  ;;  %v1314_v45 = vadd.f32 %v1313_v37, %v2418_v32  ;;  %2766 = vst [vmem:[#allocation11_spill] sm:$0xff] %v2438_v46  ;;  %2767 = vst [vmem:[#allocation12_spill] sm:$0xff] %v2443_v50  ;;  %v2446_v52 = vld [vmem:[#allocation2 + $0xe8] sm:$0xff]  ;;  %v2449_v56 = vld [vmem:[#allocation2 + $0xf0] sm:$0xff] }
 0x1a9   : > { %v1101_v42 = vadd.f32 %v1100_v34, %v2414_v30  ;;  %v1302_v47 = vadd.f32 %v1301_v41, %v2423_v36  ;;  %2768 = vst [vmem:[#allocation13_spill] sm:$0xff] %v2446_v52  ;;  %2769 = vst [vmem:[#allocation14_spill] sm:$0xff] %v2449_v56  ;;  %v2452_v58 = vld [vmem:[#allocation2 + $0xf8] sm:$0xff] }
 0x1aa   : > { %v1114_v43 = vadd.f32 %v1113_v35, %v2416_v31  ;;  %v1315_v51 = vadd.f32 %v1314_v45, %v2430_v40  ;;  %2770 = vst [vmem:[#allocation15_spill] sm:$0xff] %v2452_v58 }
 0x1ab   : > { %v1102_v48 = vadd.f32 %v1101_v42, %v2426_v38  ;;  %v1303_v53 = vadd.f32 %v1302_v47, %v2435_v44 }
 0x1ac   : > { %v1115_v49 = vadd.f32 %v1114_v43, %v2428_v39  ;;  %v1316_v57 = vadd.f32 %v1315_v51, %v2438_v46 }
 0x1ad   : > { %v1103_v54 = vrot.slane %v1102_v48, 4  ;;  %v1304_v59 = vadd.f32 %v1303_v53, %v2443_v50 }
 0x1ae   : > { %v1116_v55 = vrot.slane %v1115_v49, 4  ;;  %v1317_v62 = vadd.f32 %v1316_v57, %v2446_v52 }
 0x1af   : > { %v1104_v60 = vadd.f32 %v1103_v54, %v1102_v48  ;;  %v1305_v63 = vadd.f32 %v1304_v59, %v2449_v56 }
 0x1b0   : > { %v1117_v61 = vadd.f32 %v1116_v55, %v1115_v49  ;;  %v1318_v8 = vadd.f32 %v1317_v62, %v2452_v58 }
 0x1b1   : > { %v1105_v0 = vrot.slane %v1104_v60, 2  ;;  %v1306_v12 = vrot.slane %v1305_v63, 4 }
 0x1b2   : > { %v1118_v7 = vrot.slane %v1117_v61, 2  ;;  %v1319_v18 = vrot.slane %v1318_v8, 4 }
 0x1b3   : > { %v1106_v13 = vadd.f32 %v1105_v0, %v1104_v60  ;;  %v1307_v25 = vadd.f32 %v1306_v12, %v1305_v63 }
 0x1b4   : > { %v1119_v17 = vadd.f32 %v1118_v7, %v1117_v61  ;;  %v1320_v33 = vadd.f32 %v1319_v18, %v1318_v8 }
 0x1b5   : > { %v1107_v26 = vrot.slane %v1106_v13, 1  ;;  %v1308_v29 = vrot.slane %v1307_v25, 2 }
 0x1b6   : > { %v1120_v27 = vrot.slane %v1119_v17, 1  ;;  %v1321_v43 = vrot.slane %v1320_v33, 2 }
 0x1b7   : > { %v1108_v34 = vadd.f32 %v1107_v26, %v1106_v13  ;;  %v1309_v42 = vadd.f32 %v1308_v29, %v1307_v25 }
 0x1b8   : > { %v1121_v35 = vadd.f32 %v1120_v27, %v1119_v17  ;;  %v1322_v59 = vadd.f32 %v1321_v43, %v1320_v33 }
 0x1b9   : > { %v2458_v37 = vmul.f32 0.015625, %v1108_v34  ;;  %v1310_v57 = vrot.slane %v1309_v42, 1 }
 0x1ba   : > { %v2460_v41 = vmul.f32 0.015625, %v1121_v35  ;;  %v1323_v33 = vrot.slane %v1322_v59, 1 }
 0x1bb   : > { %v1125_v45 = vsub.f32 %v2362_v1, %v2458_v37  ;;  %v1127_v48 = vsub.f32 %v2366_v3, %v2458_v37  ;;  %v1129_v51 = vsub.f32 %v2370_v5, %v2458_v37  ;;  %v1131_v54 = vsub.f32 %v2378_v9, %v2458_v37 }
 0x1bc   : > { %v1126_v47 = vsub.f32 %v2364_v2, %v2460_v41  ;;  %v1128_v49 = vsub.f32 %v2368_v4, %v2460_v41  ;;  %v1130_v53 = vsub.f32 %v2372_v6, %v2460_v41  ;;  %v1132_v55 = vsub.f32 %v2380_v10, %v2460_v41 }
 0x1bd   : > { %v1141_v60 = vmul.f32 %v1125_v45, %v1125_v45  ;;  %v1143_v62 = vmul.f32 %v1127_v48, %v1127_v48  ;;  %v1133_v0 = vsub.f32 %v2382_v11, %v2458_v37  ;;  %v1134_v7 = vsub.f32 %v2386_v14, %v2460_v41 }
 0x1be   : > { %v1142_v61 = vmul.f32 %v1126_v47, %v1126_v47  ;;  %v1144_v63 = vmul.f32 %v1128_v49, %v1128_v49  ;;  %v1145_v8 = vmul.f32 %v1129_v51, %v1129_v51  ;;  %v1146_v12 = vmul.f32 %v1130_v53, %v1130_v53 }
 0x1bf   : > { %v1135_v13 = vsub.f32 %v2388_v15, %v2458_v37  ;;  %v1136_v17 = vsub.f32 %v2390_v16, %v2460_v41  ;;  %v1147_v18 = vmul.f32 %v1131_v54, %v1131_v54  ;;  %v1148_v25 = vmul.f32 %v1132_v55, %v1132_v55 }
 0x1c0   : > { %v1157_v26 = vadd.f32 %v1143_v62, %v1141_v60  ;;  %v1170_v27 = vadd.f32 %v1144_v63, %v1142_v61  ;;  %v1311_v29 = vadd.f32 %v1310_v57, %v1309_v42  ;;  %v1137_v34 = vsub.f32 %v2414_v30, %v2458_v37 }
 0x1c1   : > { %v1138_v35 = vsub.f32 %v2416_v31, %v2460_v41  ;;  %v1149_v43 = vmul.f32 %v1133_v0, %v1133_v0  ;;  %v1150_v45 = vmul.f32 %v1134_v7, %v1134_v7  ;;  %v1324_v49 = vadd.f32 %v1323_v33, %v1322_v59 }
 0x1c2   : > { %v1158_v47 = vadd.f32 %v1157_v26, %v1145_v8  ;;  %v1171_v48 = vadd.f32 %v1170_v27, %v1146_v12  ;;  %v1139_v51 = vsub.f32 %v2426_v38, %v2458_v37  ;;  %v1140_v53 = vsub.f32 %v2428_v39, %v2460_v41 }
 0x1c3   : > { %v1151_v54 = vmul.f32 %v1135_v13, %v1135_v13  ;;  %v2494_v42 = vmul.f32 0.015625, %v1311_v29  ;;  %v1152_v55 = vmul.f32 %v1136_v17, %v1136_v17  ;;  %v2496_v61 = vmul.f32 0.015625, %v1324_v49 }
 0x1c4   : > { %v1159_v57 = vadd.f32 %v1158_v47, %v1147_v18  ;;  %v1172_v60 = vadd.f32 %v1171_v48, %v1148_v25  ;;  %v1153_v62 = vmul.f32 %v1137_v34, %v1137_v34  ;;  %v1154_v63 = vmul.f32 %v1138_v35, %v1138_v35 }
 0x1c5   : > { %v1327_v59 = vsub.f32 %v2394_v19, %v2494_v42  ;;  %v1328_v8 = vsub.f32 %v2396_v20, %v2496_v61  ;;  %v1329_v12 = vsub.f32 %v2398_v21, %v2494_v42  ;;  %v1330_v13 = vsub.f32 %v2400_v22, %v2496_v61 }
 0x1c6   : > { %v1160_v0 = vadd.f32 %v1159_v57, %v1149_v43  ;;  %v1173_v7 = vadd.f32 %v1172_v60, %v1150_v45  ;;  %v1155_v17 = vmul.f32 %v1139_v51, %v1139_v51  ;;  %v1156_v18 = vmul.f32 %v1140_v53, %v1140_v53 }
 0x1c7   : > { %v1331_v27 = vsub.f32 %v2402_v23, %v2494_v42  ;;  %v1332_v29 = vsub.f32 %v2404_v24, %v2496_v61  ;;  %v1333_v35 = vsub.f32 %v2410_v28, %v2494_v42  ;;  %v1334_v43 = vsub.f32 %v2418_v32, %v2496_v61 }
 0x1c8   : > { %v1161_v25 = vadd.f32 %v1160_v0, %v1151_v54  ;;  %v1174_v26 = vadd.f32 %v1173_v7, %v1152_v55  ;;  %v1343_v45 = vmul.f32 %v1327_v59, %v1327_v59  ;;  %v1344_v47 = vmul.f32 %v1328_v8, %v1328_v8 }
 0x1c9   : > { %v1345_v48 = vmul.f32 %v1329_v12, %v1329_v12  ;;  %v1346_v49 = vmul.f32 %v1330_v13, %v1330_v13  ;;  %v1335_v54 = vsub.f32 %v2423_v36, %v2494_v42  ;;  %v1336_v55 = vsub.f32 %v2430_v40, %v2496_v61 }
 0x1ca   : > { %v1162_v33 = vadd.f32 %v1161_v25, %v1153_v62  ;;  %v1175_v34 = vadd.f32 %v1174_v26, %v1154_v63  ;;  %v1347_v57 = vmul.f32 %v1331_v27, %v1331_v27  ;;  %v1348_v60 = vmul.f32 %v1332_v29, %v1332_v29 }
 0x1cb   : > { %v1337_v0 = vsub.f32 %v2435_v44, %v2494_v42  ;;  %v1338_v7 = vsub.f32 %v2438_v46, %v2496_v61  ;;  %v1349_v59 = vmul.f32 %v1333_v35, %v1333_v35  ;;  %v1350_v8 = vmul.f32 %v1334_v43, %v1334_v43 }
 0x1cc   : > { %v1163_v51 = vadd.f32 %v1162_v33, %v1155_v17  ;;  %v1176_v53 = vadd.f32 %v1175_v34, %v1156_v18  ;;  %v1359_v12 = vadd.f32 %v1345_v48, %v1343_v45  ;;  %v1372_v13 = vadd.f32 %v1346_v49, %v1344_v47 }
 0x1cd   : > { %v1339_v25 = vsub.f32 %v2443_v50, %v2494_v42  ;;  %v1340_v26 = vsub.f32 %v2446_v52, %v2496_v61  ;;  %v1351_v27 = vmul.f32 %v1335_v54, %v1335_v54  ;;  %v1352_v29 = vmul.f32 %v1336_v55, %v1336_v55 }
 0x1ce   : > { %v1164_v62 = vrot.slane %v1163_v51, 4  ;;  %v1177_v63 = vrot.slane %v1176_v53, 4  ;;  %v1360_v33 = vadd.f32 %v1359_v12, %v1347_v57  ;;  %v1373_v34 = vadd.f32 %v1372_v13, %v1348_v60 }
 0x1cf   : > { %v1341_v35 = vsub.f32 %v2449_v56, %v2494_v42  ;;  %v1342_v43 = vsub.f32 %v2452_v58, %v2496_v61  ;;  %v1353_v45 = vmul.f32 %v1337_v0, %v1337_v0  ;;  %v1354_v47 = vmul.f32 %v1338_v7, %v1338_v7 }
 0x1d0   : > { %v1165_v17 = vadd.f32 %v1164_v62, %v1163_v51  ;;  %v1178_v18 = vadd.f32 %v1177_v63, %v1176_v53  ;;  %v1361_v48 = vadd.f32 %v1360_v33, %v1349_v59  ;;  %v1374_v49 = vadd.f32 %v1373_v34, %v1350_v8 }
 0x1d1   : > { %v1355_v62 = vmul.f32 %v1339_v25, %v1339_v25  ;;  %v1356_v63 = vmul.f32 %v1340_v26, %v1340_v26  ;;  %v1357_v12 = vmul.f32 %v1341_v35, %v1341_v35  ;;  %v1358_v13 = vmul.f32 %v1342_v43, %v1342_v43 }
 0x1d2   : > { %v1166_v44 = vrot.slane %v1165_v17, 2  ;;  %v1179_v40 = vrot.slane %v1178_v18, 2  ;;  %v1362_v54 = vadd.f32 %v1361_v48, %v1351_v27  ;;  %v1375_v55 = vadd.f32 %v1374_v49, %v1352_v29 }
 0x1d3   : > { %v2064_v27 = vmov 1966171168   ;;  %v1195_v33 = vlaneseq }
 0x1d4   : > { %v1167_v51 = vadd.f32 %v1166_v44, %v1165_v17  ;;  %v1180_v53 = vadd.f32 %v1179_v40, %v1178_v18  ;;  %v1363_v52 = vadd.f32 %v1362_v54, %v1353_v45  ;;  %v1376_v50 = vadd.f32 %v1375_v55, %v1354_v47 }
 0x1d5   : > { %v1193_v29 = vunpack.c.l.s4 %v2064_v27 }
 0x1d6   : > { %v1168_v57 = vrot.slane %v1167_v51, 1  ;;  %v1181_v60 = vrot.slane %v1180_v53, 1  ;;  %v1364_v36 = vadd.f32 %v1363_v52, %v1355_v62  ;;  %v1377_v58 = vadd.f32 %v1376_v50, %v1356_v63 }
 0x1d7   : > { %v1194_v50 = vunpack.c.0.s8 %v1193_v29 }
 0x1d8   : > { %v1169_v56 = vadd.f32 %v1168_v57, %v1167_v51  ;;  %v1182_v46 = vadd.f32 %v1181_v60, %v1180_v53  ;;  %v1365_v59 = vadd.f32 %v1364_v36, %v1357_v12  ;;  %v1378_v8 = vadd.f32 %v1377_v58, %v1358_v13  ;;  %v1062_v57 = vld [vmem:[%s517_s6] sm:$0x3] }
 0x1da   : > { %v1183_v0 = vmul.f32 0.015625, %v1169_v56  ;;  %v1184_v7 = vmul.f32 0.015625, %v1182_v46  ;;  %v1366_v17 = vrot.slane %v1365_v59, 4  ;;  %v1379_v18 = vrot.slane %v1378_v8, 4 }
 0x1db   : > { %v1196_v46 = vshrl.u32 %v1195_v33, 7 }
 0x1dc   : > { %v1185_v44 = vadd.f32 1e-05, %v1183_v0  ;;  %v1186_v40 = vadd.f32 1e-05, %v1184_v7  ;;  %v1367_v25 = vadd.f32 %v1366_v17, %v1365_v59  ;;  %v1380_v26 = vadd.f32 %v1379_v18, %v1378_v8 }
 0x1dd   : > { %v2530_v48 = vsub.s32 %v1194_v50, %v1196_v46  ;;  %v2539_v12 = vsub.s32 0, %v1196_v46  ;;  %v2541_v13 = vsub.s32 1, %v1196_v46 }
 0x1de   : > { %1967 = vrsqrt.f32 %v1185_v44  ;;  %v1368_v34 = vrot.slane %v1367_v25, 2  ;;  %v1381_v35 = vrot.slane %v1380_v26, 2 }
 0x1df   : > { %1969 = vrsqrt.f32 %v1186_v40 }
 0x1e0   : > { %v1369_v43 = vadd.f32 %v1368_v34, %v1367_v25  ;;  %v1382_v52 = vadd.f32 %v1381_v35, %v1380_v26  ;;  %v2553_v26 = vld [vmem:[%s522_s1] sm:$0x3] }
 0x1e2   : > { %v1370_v36 = vrot.slane %v1369_v43, 1  ;;  %v1383_v56 = vrot.slane %v1382_v52, 1 }
 0x1e4   : > { %v1371_v58 = vadd.f32 %v1370_v36, %v1369_v43  ;;  %v1384_v45 = vadd.f32 %v1383_v56, %v1382_v52 }
 0x1e6   : > { %v1385_v51 = vmul.f32 0.015625, %v1371_v58  ;;  %v1386_v53 = vmul.f32 0.015625, %v1384_v45 }
 0x1e8   : > { %v1968_v47 = vpop.eup %1967  ;;  %v1387_v63 = vadd.f32 1e-05, %v1385_v51  ;;  %v1388_v54 = vadd.f32 1e-05, %v1386_v53 }
 0x1e9   : > { %v1970_v49 = vpop.eup %1969 }
 0x1ea   : > { %v1191_v62 = vcombine.low %v1968_v47, %v1970_v49  ;;  %1971 = vrsqrt.f32 %v1387_v63 }
 0x1eb   : > { %1973 = vrsqrt.f32 %v1388_v54 }
 0x1ec   : > { %v1198_v55 = vrot.slane %v1191_v62, %v2530_v48 }
 0x1ee   : > { %v1205_v60 = vrot.slane %v1198_v55, %v2530_v48 }
 0x1f0   : > { %v1207_v0 = vmul.f32 %v1205_v60, %v1062_v57 }
 0x1f2   : > { %v1212_v7 = vrot.slane %v1207_v0, %v2539_v12  ;;  %v1216_v59 = vrot.slane %v1207_v0, %v2541_v13 }
 0x1f4   : > { %v1235_v8 = vmul.f32 %v1212_v7, %v2458_v37  ;;  %v1236_v44 = vmul.f32 %v1216_v59, %v2460_v41  ;;  %v1972_v17 = vpop.eup %1971  ;;  %v1219_v29 = vmul.f32 %v1212_v7, %v2362_v1  ;;  %v1220_v37 = vmul.f32 %v1216_v59, %v2364_v2 }
 0x1f5   : > { %v1974_v18 = vpop.eup %1973  ;;  %v1221_v41 = vmul.f32 %v1212_v7, %v2366_v3  ;;  %v1222_v34 = vmul.f32 %v1216_v59, %v2368_v4  ;;  %v1223_v35 = vmul.f32 %v1212_v7, %v2370_v5  ;;  %v1224_v50 = vmul.f32 %v1216_v59, %v2372_v6 }
 0x1f6   : > { %v1239_v40 = vcombine.low %v1235_v8, %v1236_v44  ;;  %v1393_v27 = vcombine.low %v1972_v17, %v1974_v18  ;;  %v1225_v46 = vmul.f32 %v1212_v7, %v2378_v9  ;;  %v1226_v1 = vmul.f32 %v1216_v59, %v2380_v10 }
 0x1f7   : > { %v1227_v36 = vmul.f32 %v1212_v7, %v2382_v11  ;;  %v1228_v2 = vmul.f32 %v1216_v59, %v2386_v14  ;;  %v1229_v3 = vmul.f32 %v1212_v7, %v2388_v15  ;;  %v1230_v6 = vmul.f32 %v1216_v59, %v2390_v16 }
 0x1f8   : > { %v1246_v25 = vrot.slane %v1239_v40, %v2530_v48  ;;  %v1400_v43 = vrot.slane %v1393_v27, %v2530_v48  ;;  %v1231_v9 = vmul.f32 %v1212_v7, %v2414_v30  ;;  %v1232_v10 = vmul.f32 %v1216_v59, %v2416_v31 }
 0x1f9   : > { %v1233_v11 = vmul.f32 %v1212_v7, %v2426_v38  ;;  %v1234_v14 = vmul.f32 %v1216_v59, %v2428_v39 }
 0x1fa   : > { %v1253_v33 = vrot.slane %v1246_v25, %v2530_v48  ;;  %v1407_v4 = vrot.slane %v1400_v43, %v2530_v48  ;;  %v2776_v43 = vld [vmem:[#allocation13_spill] sm:$0xff] }
 0x1fc   : > { %v1255_v52 = vsub.f32 %v2553_v26, %v1253_v33  ;;  %v1409_v15 = vmul.f32 %v1407_v4, %v1062_v57 }
 0x1fe   : > { %v1260_v5 = vrot.slane %v1255_v52, %v2539_v12  ;;  %v1264_v56 = vrot.slane %v1255_v52, %v2541_v13  ;;  %v1414_v60 = vrot.slane %v1409_v15, %v2539_v12  ;;  %v1418_v0 = vrot.slane %v1409_v15, %v2541_v13  ;;  %v2777_v52 = vld [vmem:[#allocation14_spill] sm:$0xff] }
 0x200   : > { %v1267_v58 = vadd.f32 %v1260_v5, %v1219_v29  ;;  %v1268_v45 = vadd.f32 %v1264_v56, %v1220_v37  ;;  %v1269_v47 = vadd.f32 %v1260_v5, %v1221_v41  ;;  %v1270_v49 = vadd.f32 %v1264_v56, %v1222_v34  ;;  %v2771_v41 = vld [vmem:[#allocation8_spill] sm:$0xff]  ;;  %v2772_v34 = vld [vmem:[#allocation9_spill] sm:$0xff] }
 0x201   : > { %v1271_v16 = vadd.f32 %v1260_v5, %v1223_v35  ;;  %v1272_v51 = vadd.f32 %v1264_v56, %v1224_v50  ;;  %v1273_v53 = vadd.f32 %v1260_v5, %v1225_v46  ;;  %v1274_v30 = vadd.f32 %v1264_v56, %v1226_v1  ;;  %v2774_v35 = vld [vmem:[#allocation11_spill] sm:$0xff] }
 0x202   : > { %1283 = vst [vmem:[%s2310_s15] sm:$0xff] %v1267_v58  ;;  %1284 = vst [vmem:[%s2310_s15 + $0x8] sm:$0xff] %v1268_v45  ;;  %v1275_v31 = vadd.f32 %v1260_v5, %v1227_v36  ;;  %v1276_v38 = vadd.f32 %v1264_v56, %v1228_v2  ;;  %v1277_v39 = vadd.f32 %v1260_v5, %v1229_v3  ;;  %v2778_v46 = vld [vmem:[#allocation15_spill] sm:$0xff] }
 0x203   : > { %1285 = vst [vmem:[%s2310_s15 + $0x10] sm:$0xff] %v1269_v47  ;;  %1286 = vst [vmem:[%s2310_s15 + $0x18] sm:$0xff] %v1270_v49  ;;  %v1278_v62 = vadd.f32 %v1264_v56, %v1230_v6  ;;  %v1279_v63 = vadd.f32 %v1260_v5, %v1231_v9  ;;  %v1280_v54 = vadd.f32 %v1264_v56, %v1232_v10 }
 0x204   : > { %1287 = vst [vmem:[%s2310_s15 + $0x20] sm:$0xff] %v1271_v16  ;;  %1288 = vst [vmem:[%s2310_s15 + $0x28] sm:$0xff] %v1272_v51  ;;  %v1281_v55 = vadd.f32 %v1260_v5, %v1233_v11  ;;  %v1282_v57 = vadd.f32 %v1264_v56, %v1234_v14  ;;  %v1437_v7 = vmul.f32 %v1414_v60, %v2494_v42 }
 0x205   : > { %1289 = vst [vmem:[%s2310_s15 + $0x30] sm:$0xff] %v1273_v53  ;;  %1290 = vst [vmem:[%s2310_s15 + $0x38] sm:$0xff] %v1274_v30  ;;  %v1438_v59 = vmul.f32 %v1418_v0, %v2496_v61  ;;  %v1421_v17 = vmul.f32 %v1414_v60, %v2394_v19  ;;  %v1422_v18 = vmul.f32 %v1418_v0, %v2396_v20 }
 0x206   : > { %1291 = vst [vmem:[%s2310_s15 + $0x40] sm:$0xff] %v1275_v31  ;;  %1292 = vst [vmem:[%s2310_s15 + $0x48] sm:$0xff] %v1276_v38  ;;  %v1423_v25 = vmul.f32 %v1414_v60, %v2398_v21  ;;  %v1424_v29 = vmul.f32 %v1418_v0, %v2400_v22  ;;  %v1425_v33 = vmul.f32 %v1414_v60, %v2402_v23 }
 0x207   : > { %1293 = vst [vmem:[%s2310_s15 + $0x50] sm:$0xff] %v1277_v39  ;;  %1294 = vst [vmem:[%s2310_s15 + $0x58] sm:$0xff] %v1278_v62  ;;  %v1441_v8 = vcombine.low %v1437_v7, %v1438_v59  ;;  %v1426_v42 = vmul.f32 %v1418_v0, %v2404_v24  ;;  %v1427_v61 = vmul.f32 %v1414_v60, %v2410_v28  ;;  %v2775_v24 = vld [vmem:[#allocation12_spill] sm:$0xff] }
 0x208   : > { %1295 = vst [vmem:[%s2310_s15 + $0x60] sm:$0xff] %v1279_v63  ;;  %1296 = vst [vmem:[%s2310_s15 + $0x68] sm:$0xff] %v1280_v54  ;;  %v1428_v37 = vmul.f32 %v1418_v0, %v2418_v32  ;;  %v1430_v19 = vmul.f32 %v1418_v0, %v2772_v34  ;;  %v1432_v23 = vmul.f32 %v1418_v0, %v2774_v35 }
 0x209   : > { %1297 = vst [vmem:[%s2310_s15 + $0x70] sm:$0xff] %v1281_v55  ;;  %1298 = vst [vmem:[%s2310_s15 + $0x78] sm:$0xff] %v1282_v57  ;;  %v1448_v44 = vrot.slane %v1441_v8, %v2530_v48  ;;  %v1433_v28 = vmul.f32 %v1414_v60, %v2775_v24  ;;  %v1434_v32 = vmul.f32 %v1418_v0, %v2776_v43 }
 0x20a   : > { %v1435_v50 = vmul.f32 %v1414_v60, %v2777_v52  ;;  %v1436_v1 = vmul.f32 %v1418_v0, %v2778_v46 }
 0x20b   : > { %v1455_v40 = vrot.slane %v1448_v44, %v2530_v48  ;;  %v1429_v48 = vmul.f32 %v1414_v60, %v2771_v41 }
 0x20d   : > { %v1457_v27 = vsub.f32 %v2553_v26, %v1455_v40  ;;  %v2773_v26 = vld [vmem:[#allocation10_spill] sm:$0xff] }
 0x20e   : > { %v1431_v22 = vmul.f32 %v1414_v60, %v2773_v26 }
 0x20f   : > { %v1462_v20 = vrot.slane %v1457_v27, %v2539_v12  ;;  %v1466_v21 = vrot.slane %v1457_v27, %v2541_v13 }
 0x211   : > { %v1469_v36 = vadd.f32 %v1462_v20, %v1421_v17  ;;  %v1470_v12 = vadd.f32 %v1466_v21, %v1422_v18  ;;  %v1471_v13 = vadd.f32 %v1462_v20, %v1423_v25  ;;  %v1472_v2 = vadd.f32 %v1466_v21, %v1424_v29 }
 0x212   : > { %v1473_v3 = vadd.f32 %v1462_v20, %v1425_v33  ;;  %v1474_v4 = vadd.f32 %v1466_v21, %v1426_v42  ;;  %v1475_v5 = vadd.f32 %v1462_v20, %v1427_v61  ;;  %v1476_v56 = vadd.f32 %v1466_v21, %v1428_v37 }
 0x213   : > { %1485 = vst [vmem:[%s2310_s15 + $0x80] sm:$0xff] %v1469_v36  ;;  %1486 = vst [vmem:[%s2310_s15 + $0x88] sm:$0xff] %v1470_v12  ;;  %v1477_v6 = vadd.f32 %v1462_v20, %v1429_v48  ;;  %v1478_v9 = vadd.f32 %v1466_v21, %v1430_v19  ;;  %v1479_v10 = vadd.f32 %v1462_v20, %v1431_v22 }
 0x214   : > { %1487 = vst [vmem:[%s2310_s15 + $0x90] sm:$0xff] %v1471_v13  ;;  %1488 = vst [vmem:[%s2310_s15 + $0x98] sm:$0xff] %v1472_v2  ;;  %v1480_v11 = vadd.f32 %v1466_v21, %v1432_v23  ;;  %v1481_v14 = vadd.f32 %v1462_v20, %v1433_v28  ;;  %v1482_v15 = vadd.f32 %v1466_v21, %v1434_v32 }
 0x215   : > { %1489 = vst [vmem:[%s2310_s15 + $0xa0] sm:$0xff] %v1473_v3  ;;  %1490 = vst [vmem:[%s2310_s15 + $0xa8] sm:$0xff] %v1474_v4  ;;  %v1483_v58 = vadd.f32 %v1462_v20, %v1435_v50  ;;  %v1484_v45 = vadd.f32 %v1466_v21, %v1436_v1 }
 0x216   : > { %1491 = vst [vmem:[%s2310_s15 + $0xb0] sm:$0xff] %v1475_v5  ;;  %1492 = vst [vmem:[%s2310_s15 + $0xb8] sm:$0xff] %v1476_v56 }
 0x217   : > { %1493 = vst [vmem:[%s2310_s15 + $0xc0] sm:$0xff] %v1477_v6  ;;  %1494 = vst [vmem:[%s2310_s15 + $0xc8] sm:$0xff] %v1478_v9 }
 0x218   : > { %1495 = vst [vmem:[%s2310_s15 + $0xd0] sm:$0xff] %v1479_v10  ;;  %1496 = vst [vmem:[%s2310_s15 + $0xd8] sm:$0xff] %v1480_v11 }
 0x219   : > { %1497 = vst [vmem:[%s2310_s15 + $0xe0] sm:$0xff] %v1481_v14  ;;  %1498 = vst [vmem:[%s2310_s15 + $0xe8] sm:$0xff] %v1482_v15 }
 0x21a   : > { %1499 = vst [vmem:[%s2310_s15 + $0xf0] sm:$0xff] %v1483_v58  ;;  %1500 = vst [vmem:[%s2310_s15 + $0xf8] sm:$0xff] %v1484_v45 }
 0x21b PF: > { %1507 = sbr.rel (!%p2184_p12) target bundleno = 557 (0x22d), region = 124  ;;  %s1772_s1 = sshll.u32 (%p2184_p12), %s2049_s22, 4  ;;  %v1523_v47 = vld [vmem:[%s2310_s15] sm:$0xff] (%p2184_p12)  ;;  %v1525_v49 = vld [vmem:[%s2310_s15 + $0x8] sm:$0xff] (%p2184_p12)  ;;  %v1527_v16 = vld [vmem:[%s2310_s15 + $0x10] sm:$0xff] (%p2184_p12) }
 0x21c   : > { %s2643_s27 = scalar_lea.vmem (%p2184_p12), %s2743_s4, %s1772_s1  ;;  %v1529_v51 = vld [vmem:[%s2310_s15 + $0x18] sm:$0xff] (%p2184_p12)  ;;  %v1531_v53 = vld [vmem:[%s2310_s15 + $0x20] sm:$0xff] (%p2184_p12)  ;;  %v1533_v30 = vld [vmem:[%s2310_s15 + $0x28] sm:$0xff] (%p2184_p12) }
 0x21d   : > { %1524 = vst [vmem:[%s2643_s27] sm:$0xff] (%p2184_p12), %v1523_v47  ;;  %1526 = vst [vmem:[%s2643_s27 + $0x8] sm:$0xff] (%p2184_p12), %v1525_v49  ;;  %v1535_v31 = vld [vmem:[%s2310_s15 + $0x30] sm:$0xff] (%p2184_p12)  ;;  %v1537_v38 = vld [vmem:[%s2310_s15 + $0x38] sm:$0xff] (%p2184_p12) }
 0x21e   : > { %1528 = vst [vmem:[%s2643_s27 + $0x20] sm:$0xff] (%p2184_p12), %v1527_v16  ;;  %1530 = vst [vmem:[%s2643_s27 + $0x28] sm:$0xff] (%p2184_p12), %v1529_v51  ;;  %v1539_v39 = vld [vmem:[%s2310_s15 + $0x40] sm:$0xff] (%p2184_p12)  ;;  %v1541_v62 = vld [vmem:[%s2310_s15 + $0x48] sm:$0xff] (%p2184_p12) }
 0x21f   : > { %1532 = vst [vmem:[%s2643_s27 + $0x40] sm:$0xff] (%p2184_p12), %v1531_v53  ;;  %1534 = vst [vmem:[%s2643_s27 + $0x48] sm:$0xff] (%p2184_p12), %v1533_v30  ;;  %v1543_v63 = vld [vmem:[%s2310_s15 + $0x50] sm:$0xff] (%p2184_p12)  ;;  %v1545_v54 = vld [vmem:[%s2310_s15 + $0x58] sm:$0xff] (%p2184_p12) }
 0x220   : > { %1536 = vst [vmem:[%s2643_s27 + $0x60] sm:$0xff] (%p2184_p12), %v1535_v31  ;;  %1538 = vst [vmem:[%s2643_s27 + $0x68] sm:$0xff] (%p2184_p12), %v1537_v38  ;;  %v1547_v55 = vld [vmem:[%s2310_s15 + $0x60] sm:$0xff] (%p2184_p12)  ;;  %v1549_v57 = vld [vmem:[%s2310_s15 + $0x68] sm:$0xff] (%p2184_p12) }
 0x221   : > { %1540 = vst [vmem:[%s2643_s27 + $0x80] sm:$0xff] (%p2184_p12), %v1539_v39  ;;  %1542 = vst [vmem:[%s2643_s27 + $0x88] sm:$0xff] (%p2184_p12), %v1541_v62  ;;  %v1551_v60 = vld [vmem:[%s2310_s15 + $0x70] sm:$0xff] (%p2184_p12)  ;;  %v1553_v0 = vld [vmem:[%s2310_s15 + $0x78] sm:$0xff] (%p2184_p12) }
 0x222   : > { %1544 = vst [vmem:[%s2643_s27 + $0xa0] sm:$0xff] %v1543_v63  ;;  %1546 = vst [vmem:[%s2643_s27 + $0xa8] sm:$0xff] %v1545_v54  ;;  %v1555_v7 = vld [vmem:[%s2310_s15 + $0x80] sm:$0xff]  ;;  %v1557_v59 = vld [vmem:[%s2310_s15 + $0x88] sm:$0xff] }
 0x223   : > { %1548 = vst [vmem:[%s2643_s27 + $0xc0] sm:$0xff] %v1547_v55  ;;  %1550 = vst [vmem:[%s2643_s27 + $0xc8] sm:$0xff] %v1549_v57  ;;  %v1559_v8 = vld [vmem:[%s2310_s15 + $0x90] sm:$0xff]  ;;  %v1561_v44 = vld [vmem:[%s2310_s15 + $0x98] sm:$0xff] }
 0x224   : > { %1552 = vst [vmem:[%s2643_s27 + $0xe0] sm:$0xff] %v1551_v60  ;;  %1554 = vst [vmem:[%s2643_s27 + $0xe8] sm:$0xff] %v1553_v0  ;;  %v1563_v40 = vld [vmem:[%s2310_s15 + $0xa0] sm:$0xff]  ;;  %v1565_v17 = vld [vmem:[%s2310_s15 + $0xa8] sm:$0xff] }
 0x225   : > { %1556 = vst [vmem:[%s2643_s27 + $0x100] sm:$0xff] %v1555_v7  ;;  %1558 = vst [vmem:[%s2643_s27 + $0x108] sm:$0xff] %v1557_v59  ;;  %v1567_v18 = vld [vmem:[%s2310_s15 + $0xb0] sm:$0xff]  ;;  %v1569_v25 = vld [vmem:[%s2310_s15 + $0xb8] sm:$0xff] }
 0x226   : > { %1560 = vst [vmem:[%s2643_s27 + $0x120] sm:$0xff] %v1559_v8  ;;  %1562 = vst [vmem:[%s2643_s27 + $0x128] sm:$0xff] %v1561_v44  ;;  %v1571_v27 = vld [vmem:[%s2310_s15 + $0xc0] sm:$0xff]  ;;  %v1573_v29 = vld [vmem:[%s2310_s15 + $0xc8] sm:$0xff] }
 0x227   : > { %1564 = vst [vmem:[%s2643_s27 + $0x140] sm:$0xff] %v1563_v40  ;;  %1566 = vst [vmem:[%s2643_s27 + $0x148] sm:$0xff] %v1565_v17  ;;  %v1575_v33 = vld [vmem:[%s2310_s15 + $0xd0] sm:$0xff]  ;;  %v1577_v42 = vld [vmem:[%s2310_s15 + $0xd8] sm:$0xff] }
 0x228   : > { %1568 = vst [vmem:[%s2643_s27 + $0x160] sm:$0xff] %v1567_v18  ;;  %1570 = vst [vmem:[%s2643_s27 + $0x168] sm:$0xff] %v1569_v25  ;;  %v1579_v61 = vld [vmem:[%s2310_s15 + $0xe0] sm:$0xff]  ;;  %v1581_v37 = vld [vmem:[%s2310_s15 + $0xe8] sm:$0xff] }
 0x229   : > { %1572 = vst [vmem:[%s2643_s27 + $0x180] sm:$0xff] %v1571_v27  ;;  %1574 = vst [vmem:[%s2643_s27 + $0x188] sm:$0xff] %v1573_v29  ;;  %v1583_v41 = vld [vmem:[%s2310_s15 + $0xf0] sm:$0xff]  ;;  %v1585_v48 = vld [vmem:[%s2310_s15 + $0xf8] sm:$0xff] }
 0x22a   : > { %1576 = vst [vmem:[%s2643_s27 + $0x1a0] sm:$0xff] %v1575_v33  ;;  %1578 = vst [vmem:[%s2643_s27 + $0x1a8] sm:$0xff] %v1577_v42 }
 0x22b   : > { %1580 = vst [vmem:[%s2643_s27 + $0x1c0] sm:$0xff] %v1579_v61  ;;  %1582 = vst [vmem:[%s2643_s27 + $0x1c8] sm:$0xff] %v1581_v37 }
 0x22c   : > { %1584 = vst [vmem:[%s2643_s27 + $0x1e0] sm:$0xff] %v1583_v41  ;;  %1586 = vst [vmem:[%s2643_s27 + $0x1e8] sm:$0xff] %v1585_v48 }
 0x22d PF: > { %s14_s25 = sadd.s32 1, %s2061_s25   ;;  %s2779_s14 = sld [smem:[#allocation6_spill]] }
 0x22e   : > { %p11_p6 = scmp.ge.s32.totalorder %s14_s25, 6   ;;  %s2780_s29 = sld [smem:[#allocation7_spill]] }
 0x22f   : > { %s2781_s15 = smov %s2025_s16  ;;  %s2782_s16 = smov %s2182_s13 }
 0x230   : > { %s2783_s17 = smov %s2033_s18  ;;  %s2784_s18 = smov %s2179_s12 }
 0x231   : > { %s2785_s19 = smov %s2041_s20  ;;  %s2786_s20 = smov %s2165_s7 }
 0x232   : > { %s2787_s21 = smov %s2053_s23  ;;  %s2788_s22 = smov %s2057_s24 }
 0x233   : > { %s2789_s23 = smov %s2779_s14  ;;  %13 = sbr.rel (!%p11_p6) target bundleno = 9 (0x9), region = 192 }
 0x234   : > { %s2790_s24 = smov %s2780_s29 }

</bundles_post_ra>
